<compile_context>
chip_gen: v5e
topology: v5e:2x2
jax: 0.10.0
libtpu: 0.0.40
codegen_flags: <defaults>
</compile_context>

<pallas_src>
import functools

import jax
import jax.numpy as jnp
import numpy as np
from jax.experimental import pallas as pl
from jax.experimental.pallas import tpu as pltpu


# ------------------------------ Pallas kernel ------------------------------ #
def _conv3d_lrelu_kernel(x_ref, w_ref, b_ref, o_ref, acc_ref, *, K, alpha):
    """One grid step: batch n, output depth d, kernel depth-tap kd.

    x_ref : (1, 1, Hp, Wp, Cin)   padded input slab at depth d + kd (VMEM)
    w_ref : (K, K*K*Cin, Cout)    full weight, resident in VMEM
    b_ref : (1, Cout)             bias, resident in VMEM
    o_ref : (1, 1, Ho, Wo, Cout)  output tile for (n, d)
    acc_ref: (Ho*Wo, Cout) f32    accumulator scratch across kd
    """
    kd = pl.program_id(2)

    @pl.when(kd == 0)
    def _():
        acc_ref[...] = jnp.zeros_like(acc_ref)

    x_view = x_ref[0, 0]                    # (Hp, Wp, Cin)
    _, _, cin = x_view.shape
    _, _, ho, wo, cout = o_ref.shape

    # In-VMEM im2col for the K*K (kh, kw) taps of this depth-tap.
    # Static slices; reshape only collapses the two MAJOR dims (lane dim kept).
    taps = []
    for kh in range(K):
        for kw in range(K):
            t = x_view[kh:kh + ho, kw:kw + wo, :]          # (Ho, Wo, Cin)
            taps.append(t.reshape(ho * wo, cin))
    a = jnp.concatenate(taps, axis=1)                      # (Ho*Wo, K*K*Cin)

    w_slab = w_ref[kd]                                     # (K*K*Cin, Cout)
    acc_ref[...] += jnp.dot(a, w_slab, preferred_element_type=jnp.float32)

    @pl.when(kd == K - 1)
    def _():
        y = acc_ref[...] + b_ref[...]                      # bias (broadcast)
        y = jnp.where(y >= 0, y, alpha * y)                # fused LeakyReLU
        o_ref[0, 0] = y.reshape(ho, wo, cout).astype(o_ref.dtype)


# ------------------------------- wrapper (JAX) ------------------------------ #
def conv3_leakyrelu_forward(x, weight, bias, *, stride=1, padding=1, alpha=0.1):
    """Conv3d(Cin, Cout, K, stride, padding, bias=True) + LeakyReLU(alpha).

    x      : (N, Cin, D, H, W)      -- PyTorch NCDHW layout
    weight : (Cout, Cin, K, K, K)   -- PyTorch Conv3d weight layout
    bias   : (Cout,)
    returns: (N, Cout, Do, Ho, Wo)  -- PyTorch NCDHW layout
    """
    assert stride == 1, "TODO(synk): stride > 1 not implemented (default is 1)"
    N, Cin, D, H, W = x.shape
    Cout, Cin_w, K, K2, K3 = weight.shape
    assert Cin == Cin_w and K == K2 == K3

    Do = D + 2 * padding - K + 1
    Ho = H + 2 * padding - K + 1
    Wo = W + 2 * padding - K + 1
    Hp, Wp = H + 2 * padding, W + 2 * padding

    # Channels-last padded input (single small XLA transpose + pad of the input).
    x_cl = jnp.transpose(x, (0, 2, 3, 4, 1))               # (N, D, H, W, Cin)
    xp = jnp.pad(x_cl, ((0, 0), (padding, padding), (padding, padding),
                        (padding, padding), (0, 0)))

    # Weight -> (K, K*K*Cin, Cout), rows ordered (kh, kw, cin); kept VMEM-resident.
    w_mat = jnp.transpose(weight, (2, 3, 4, 1, 0)).reshape(K, K * K * Cin, Cout)
    b_mat = bias.reshape(1, Cout).astype(jnp.float32)

    kernel = functools.partial(_conv3d_lrelu_kernel, K=K, alpha=float(alpha))

    out_cl = pl.pallas_call(
        kernel,
        out_shape=jax.ShapeDtypeStruct((N, Do, Ho, Wo, Cout), x.dtype),
        grid_spec=pltpu.PrefetchScalarGridSpec(
            num_scalar_prefetch=0,
            grid=(N, Do, K),
            in_specs=[
                # depth-slab d + kd of the padded input (block size 1 along Dp
                # => block index equals element index)
                pl.BlockSpec((1, 1, Hp, Wp, Cin),
                             lambda n, d, kd: (n, d + kd, 0, 0, 0)),
                # full weight, always block 0 -> stays resident, no re-DMA
                pl.BlockSpec((K, K * K * Cin, Cout),
                             lambda n, d, kd: (0, 0, 0)),
                # bias, resident
                pl.BlockSpec((1, Cout), lambda n, d, kd: (0, 0)),
            ],
            out_specs=pl.BlockSpec((1, 1, Ho, Wo, Cout),
                                   lambda n, d, kd: (n, d, 0, 0, 0)),
            scratch_shapes=[pltpu.VMEM((Ho * Wo, Cout), jnp.float32)],
        ),
        compiler_params=pltpu.CompilerParams(
            dimension_semantics=("parallel", "parallel", "arbitrary")
        ),
    )(xp, w_mat, b_mat)

    # Back to PyTorch NCDHW. TODO(synk): drop this transpose if the consumer
    # accepts channels-last activations.
    return jnp.transpose(out_cl, (0, 4, 1, 2, 3))


# ----------------- pure numpy reference (PyTorch semantics) ----------------- #
def conv3d_leakyrelu_ref(x, w, b, stride, padding, alpha):
    x = np.asarray(x, dtype=np.float64)
    w = np.asarray(w, dtype=np.float64)
    b = np.asarray(b, dtype=np.float64)
    N, Cin, D, H, W = x.shape
    Cout, _, K, _, _ = w.shape
    Do = (D + 2 * padding - K) // stride + 1
    Ho = (H + 2 * padding - K) // stride + 1
    Wo = (W + 2 * padding - K) // stride + 1
    xp = np.pad(x, ((0, 0), (0, 0), (padding,) * 2, (padding,) * 2, (padding,) * 2))
    out = np.zeros((N, Cout, Do, Ho, Wo), dtype=np.float64)
    for kd in range(K):
        for kh in range(K):
            for kw in range(K):
                patch = xp[:, :,
                           kd:kd + (Do - 1) * stride + 1:stride,
                           kh:kh + (Ho - 1) * stride + 1:stride,
                           kw:kw + (Wo - 1) * stride + 1:stride]
                out += np.einsum("ncdhw,oc->nodhw", patch, w[:, :, kd, kh, kw])
    out += b[None, :, None, None, None]
    return np.where(out >= 0.0, out, alpha * out)


# ----------------------------------- main ----------------------------------- #
if __name__ == "__main__":
    key = jax.random.PRNGKey(0)
    k_x, k_w, k_b = jax.random.split(key, 3)

    N, Cin, Cout = 2, 4, 8
    D = H = W = 16
    K, stride, padding, alpha = 3, 1, 1, 0.1

    x = jax.random.normal(k_x, (N, Cin, D, H, W), dtype=jnp.float32)
    # PyTorch Conv3d weight layout: (out_channels, in_channels, K, K, K)
    weight = jax.random.normal(k_w, (Cout, Cin, K, K, K), dtype=jnp.float32) * 0.1
    bias = jax.random.normal(k_b, (Cout,), dtype=jnp.float32) * 0.1

    fwd = jax.jit(functools.partial(conv3_leakyrelu_forward,
                                    stride=stride, padding=padding, alpha=alpha))
    out = jax.block_until_ready(fwd(x, weight, bias))

    ref = conv3d_leakyrelu_ref(x, weight, bias, stride, padding, alpha)
    assert out.shape == ref.shape, (out.shape, ref.shape)
    np.testing.assert_allclose(np.asarray(out), ref, rtol=1e-4, atol=1e-4)

    print("KERNEL_OK")
</pallas_src>

<mosaic_0001>
module attributes {stable_mosaic.version = 11 : i64} {
  func.func @_conv3d_lrelu_kernel(%arg0: i32, %arg1: i32, %arg2: i32, %arg3: memref<1x1x18x18x4xf32, #tpu.memory_space<vmem>>, %arg4: memref<3x36x8xf32, #tpu.memory_space<vmem>>, %arg5: memref<1x8xf32, #tpu.memory_space<vmem>>, %arg6: memref<1x1x16x16x8xf32, #tpu.memory_space<vmem>>, %arg7: memref<256x8xf32, #tpu.memory_space<vmem>>) attributes {dimension_semantics = [#tpu.dimension_semantics<parallel>, #tpu.dimension_semantics<parallel>, #tpu.dimension_semantics<arbitrary>], iteration_bounds = array<i64: 2, 16, 3>, scalar_prefetch = 0 : i64, scratch_operands = 1 : i64, tpu.core_type = #tpu.core_type<tc>, window_params = [{transform_indices = @transform_0, window_bounds = array<i64: 1, 1, 18, 18, 4>}, {pipeline_mode = #tpu.pipeline_mode<synchronous>, transform_indices = @transform_1, window_bounds = array<i64: 3, 36, 8>}, {pipeline_mode = #tpu.pipeline_mode<synchronous>, transform_indices = @transform_2, window_bounds = array<i64: 1, 8>}, {transform_indices = @transform_3, window_bounds = array<i64: 1, 1, 16, 16, 8>}]} {
    %c0_i32 = arith.constant 0 : i32
    %0 = arith.cmpi eq, %arg2, %c0_i32 : i32
    %1 = arith.extui %0 : i1 to i32
    %c0_i32_0 = arith.constant 0 : i32
    %2 = arith.cmpi ne, %1, %c0_i32_0 : i32
    scf.if %2 {
      %cst_12 = arith.constant 0.000000e+00 : f32
      %34 = vector.broadcast %cst_12 : f32 to vector<256x8xf32>
      %c0_13 = arith.constant 0 : index
      %c0_14 = arith.constant 0 : index
      %35 = vector.load %arg7[%c0_13, %c0_14] : memref<256x8xf32, #tpu.memory_space<vmem>>, vector<256x8xf32>
      tpu.vector_store %arg7[%c0_13, %c0_14], %34 {strides = array<i32>} : memref<256x8xf32, #tpu.memory_space<vmem>>, vector<256x8xf32>,
    } else {
    }
    %c0 = arith.constant 0 : index
    %c0_1 = arith.constant 0 : index
    %c0_2 = arith.constant 0 : index
    %c0_3 = arith.constant 0 : index
    %c0_4 = arith.constant 0 : index
    %3 = vector.load %arg3[%c0, %c0_1, %c0_2, %c0_3, %c0_4] : memref<1x1x18x18x4xf32, #tpu.memory_space<vmem>>, vector<1x1x18x18x4xf32>
    %4 = vector.shape_cast %3 : vector<1x1x18x18x4xf32> to vector<18x18x4xf32>
    %5 = vector.extract_strided_slice %4 {offsets = [0, 0, 0], sizes = [16, 16, 4], strides = [1, 1, 1]} : vector<18x18x4xf32> to vector<16x16x4xf32>
    %6 = vector.shape_cast %5 : vector<16x16x4xf32> to vector<256x4xf32>
    %7 = vector.extract_strided_slice %4 {offsets = [0, 1, 0], sizes = [16, 16, 4], strides = [1, 1, 1]} : vector<18x18x4xf32> to vector<16x16x4xf32>
    %8 = vector.shape_cast %7 : vector<16x16x4xf32> to vector<256x4xf32>
    %9 = vector.extract_strided_slice %4 {offsets = [0, 2, 0], sizes = [16, 16, 4], strides = [1, 1, 1]} : vector<18x18x4xf32> to vector<16x16x4xf32>
    %10 = vector.shape_cast %9 : vector<16x16x4xf32> to vector<256x4xf32>
    %11 = vector.extract_strided_slice %4 {offsets = [1, 0, 0], sizes = [16, 16, 4], strides = [1, 1, 1]} : vector<18x18x4xf32> to vector<16x16x4xf32>
    %12 = vector.shape_cast %11 : vector<16x16x4xf32> to vector<256x4xf32>
    %13 = vector.extract_strided_slice %4 {offsets = [1, 1, 0], sizes = [16, 16, 4], strides = [1, 1, 1]} : vector<18x18x4xf32> to vector<16x16x4xf32>
    %14 = vector.shape_cast %13 : vector<16x16x4xf32> to vector<256x4xf32>
    %15 = vector.extract_strided_slice %4 {offsets = [1, 2, 0], sizes = [16, 16, 4], strides = [1, 1, 1]} : vector<18x18x4xf32> to vector<16x16x4xf32>
    %16 = vector.shape_cast %15 : vector<16x16x4xf32> to vector<256x4xf32>
    %17 = vector.extract_strided_slice %4 {offsets = [2, 0, 0], sizes = [16, 16, 4], strides = [1, 1, 1]} : vector<18x18x4xf32> to vector<16x16x4xf32>
    %18 = vector.shape_cast %17 : vector<16x16x4xf32> to vector<256x4xf32>
    %19 = vector.extract_strided_slice %4 {offsets = [2, 1, 0], sizes = [16, 16, 4], strides = [1, 1, 1]} : vector<18x18x4xf32> to vector<16x16x4xf32>
    %20 = vector.shape_cast %19 : vector<16x16x4xf32> to vector<256x4xf32>
    %21 = vector.extract_strided_slice %4 {offsets = [2, 2, 0], sizes = [16, 16, 4], strides = [1, 1, 1]} : vector<18x18x4xf32> to vector<16x16x4xf32>
    %22 = vector.shape_cast %21 : vector<16x16x4xf32> to vector<256x4xf32>
    %23 = tpu.concatenate %6, %8, %10, %12, %14, %16, %18, %20, %22 in 1 : vector<256x4xf32>, vector<256x4xf32>, vector<256x4xf32>, vector<256x4xf32>, vector<256x4xf32>, vector<256x4xf32>, vector<256x4xf32>, vector<256x4xf32>, vector<256x4xf32> -> vector<256x36xf32>
    %24 = arith.index_cast %arg2 : i32 to index
    %c0_5 = arith.constant 0 : index
    %c0_6 = arith.constant 0 : index
    %25 = vector.load %arg4[%24, %c0_5, %c0_6] : memref<3x36x8xf32, #tpu.memory_space<vmem>>, vector<1x36x8xf32>
    %26 = vector.shape_cast %25 : vector<1x36x8xf32> to vector<36x8xf32>
    %c0_7 = arith.constant 0 : index
    %c0_8 = arith.constant 0 : index
    %27 = vector.load %arg7[%c0_7, %c0_8] : memref<256x8xf32, #tpu.memory_space<vmem>>, vector<256x8xf32>
    %cst = arith.constant dense<0.000000e+00> : vector<256x8xf32>
    %28 = tpu.matmul %23, %26, %cst {dimension_numbers = #tpu.dot_dimension_numbers<[1], [0], [0], [1], [0, 0, 1, 1], [], []>} : vector<256x36xf32>, vector<36x8xf32>, vector<256x8xf32> -> vector<256x8xf32>
    %29 = arith.addf %27, %28 : vector<256x8xf32>
    %c0_9 = arith.constant 0 : index
    %c0_10 = arith.constant 0 : index
    %30 = vector.load %arg7[%c0_9, %c0_10] : memref<256x8xf32, #tpu.memory_space<vmem>>, vector<256x8xf32>
    tpu.vector_store %arg7[%c0_9, %c0_10], %29 {strides = array<i32>} : memref<256x8xf32, #tpu.memory_space<vmem>>, vector<256x8xf32>,
    %c2_i32 = arith.constant 2 : i32
    %31 = arith.cmpi eq, %arg2, %c2_i32 : i32
    %32 = arith.extui %31 : i1 to i32
    %c0_i32_11 = arith.constant 0 : i32
    %33 = arith.cmpi ne, %32, %c0_i32_11 : i32
    scf.if %33 {
      %c0_12 = arith.constant 0 : index
      %c0_13 = arith.constant 0 : index
      %34 = vector.load %arg7[%c0_12, %c0_13] : memref<256x8xf32, #tpu.memory_space<vmem>>, vector<256x8xf32>
      %c0_14 = arith.constant 0 : index
      %c0_15 = arith.constant 0 : index
      %35 = vector.load %arg5[%c0_14, %c0_15] : memref<1x8xf32, #tpu.memory_space<vmem>>, vector<1x8xf32>
      %36 = vector.broadcast %35 : vector<1x8xf32> to vector<256x8xf32>
      %37 = arith.addf %34, %36 : vector<256x8xf32>
      %cst_16 = arith.constant 0.000000e+00 : f32
      %38 = vector.broadcast %cst_16 : f32 to vector<256x8xf32>
      %39 = arith.cmpf oge, %37, %38 : vector<256x8xf32>
      %cst_17 = arith.constant 1.000000e-01 : f32
      %40 = vector.broadcast %cst_17 : f32 to vector<256x8xf32>
      %41 = arith.mulf %40, %37 : vector<256x8xf32>
      %42 = arith.select %39, %37, %41 : vector<256x8xi1>, vector<256x8xf32>
      %43 = vector.shape_cast %42 : vector<256x8xf32> to vector<16x16x8xf32>
      %c0_18 = arith.constant 0 : index
      %c0_19 = arith.constant 0 : index
      %c0_20 = arith.constant 0 : index
      %c0_21 = arith.constant 0 : index
      %c0_22 = arith.constant 0 : index
      %44 = vector.load %arg6[%c0_18, %c0_19, %c0_20, %c0_21, %c0_22] : memref<1x1x16x16x8xf32, #tpu.memory_space<vmem>>, vector<1x1x16x16x8xf32>
      %45 = vector.shape_cast %44 : vector<1x1x16x16x8xf32> to vector<16x16x8xf32>
      %46 = vector.shape_cast %43 : vector<16x16x8xf32> to vector<1x1x16x16x8xf32>
      tpu.vector_store %arg6[%c0_18, %c0_19, %c0_20, %c0_21, %c0_22], %46 {strides = array<i32>} : memref<1x1x16x16x8xf32, #tpu.memory_space<vmem>>, vector<1x1x16x16x8xf32>,
    } else {
    }
    return
  }
  func.func @transform_0(%arg0: i32, %arg1: i32, %arg2: i32) -> (i32, i32, i32, i32, i32) {
    %0 = arith.addi %arg1, %arg2 : i32
    %c0_i32 = arith.constant 0 : i32
    %c0_i32_0 = arith.constant 0 : i32
    %c0_i32_1 = arith.constant 0 : i32
    %c0_i32_2 = arith.constant 0 : i32
    return %arg0, %0, %c0_i32, %c0_i32_0, %c0_i32_1 : i32, i32, i32, i32, i32
  }
  func.func @transform_1(%arg0: i32, %arg1: i32, %arg2: i32) -> (i32, i32, i32) {
    %c0_i32 = arith.constant 0 : i32
    %c0_i32_0 = arith.constant 0 : i32
    %c0_i32_1 = arith.constant 0 : i32
    %c0_i32_2 = arith.constant 0 : i32
    return %c0_i32, %c0_i32_0, %c0_i32_1 : i32, i32, i32
  }
  func.func @transform_2(%arg0: i32, %arg1: i32, %arg2: i32) -> (i32, i32) {
    %c0_i32 = arith.constant 0 : i32
    %c0_i32_0 = arith.constant 0 : i32
    %c0_i32_1 = arith.constant 0 : i32
    return %c0_i32, %c0_i32_0 : i32, i32
  }
  func.func @transform_3(%arg0: i32, %arg1: i32, %arg2: i32) -> (i32, i32, i32, i32, i32) {
    %c0_i32 = arith.constant 0 : i32
    %c0_i32_0 = arith.constant 0 : i32
    %c0_i32_1 = arith.constant 0 : i32
    %c0_i32_2 = arith.constant 0 : i32
    return %arg0, %arg1, %c0_i32, %c0_i32_0, %c0_i32_1 : i32, i32, i32, i32, i32
  }
}

</mosaic_0001>

<bundles_post_ra>
// kernel: conv3_leakyrelu_forward.1
= control target key start
LH: loop header
LB: loop body
LE: loop exit
PB: predicated region body
PF: predicated region fallthrough
CT: control target
= control target key end

     0   :  { %s2443_s12 = smov 0   ;;  %s2445_s13 = smov 0   ;;  %s4515_s0 = inlined_call_operand.vmem [shape: f32[2,18,18,18,4], index: 0, kind: input, shape index: {}]   ;;  %s4516_s1 = inlined_call_operand.vmem [shape: f32[3,36,8], index: 1, kind: input, shape index: {}]   ;;  %s4517_s2 = inlined_call_operand.vmem [shape: f32[1,8], index: 2, kind: input, shape index: {}]   ;;  %s4518_s3 = inlined_call_operand.vmem [shape: f32[2,16,16,16,8], index: 3, kind: output, shape index: {}]  }
   0x1   :  { %s2447_s14 = smov 0   ;;  %s2449_s15 = smov 0  }
   0x2   :  { %s2451_s16 = smov 0   ;;  %s2453_s17 = smov 0  }
   0x3   :  { %s2455_s18 = smov 0  }
   0x4 LB: > { %s25_s19 = sadd.s32 1, %s2400_s15  ;;  %s28_s20 = sadd.s32 1, %s2404_s16  ;;  %s2412_s18 = sphi %s2455_s18, %s13_s18   ;;  %s2408_s17 = sphi %s2453_s17, %s4955_s17   ;;  %s2404_s16 = sphi %s2451_s16, %s4954_s16   ;;  %s2400_s15 = sphi %s2449_s15, %s4953_s15   ;;  %s2396_s14 = sphi %s2447_s14, %s4952_s14   ;;  %s2392_s13 = sphi %s2445_s13, %s4951_s13   ;;  %s2388_s12 = sphi %s2443_s12, %s4950_s12  }
   0x5   : > { %p26_p0 = scmp.ge.s32.totalorder %s25_s19, 3  ;;  %p2204_p1 = scmp.ge.s32.totalorder %s2412_s18, 1 }
   0x6   : > { %p168_p2 = scmp.lt.s32.totalorder %s2412_s18, 97  ;;  %s32_s21 = sadd.s32 1, %s2408_s17 }
   0x7   : > { %s4957_s19 = smov (%p26_p0, %s25_s19), 0  ;;  %s4959_s20 = smov (!%p26_p0, %s28_s20), %s2404_s16 }
   0x8   : > { %p169_p3 = pnand %p2204_p1, %p168_p2  ;;  %p30_p4 = scmp.ge.s32.totalorder %s4959_s20, 16 }
   0xa   : > { %s4961_s20 = smov (%p30_p4, %s4959_s20), 0  ;;  %s4963_s21 = smov (!%p30_p4, %s32_s21), %s2408_s17 }
   0xb   : > { %p34_p5 = scmp.ge.s32.totalorder %s4963_s21, 2  ;;  %172 = sbr.rel (%p169_p3) target bundleno = 1029 (0x405), region = 32 }
   0xd   : > { %s4965_s21 = smov (%p34_p5, %s4963_s21), 0 }
  0x10   : > { %s201_s22 = sadd.s32 %s2388_s12, %s2392_s13  ;;  %p202_p6 = scmp.lt.s32.totalorder %s2396_s14, 1 }
  0x11   : > { %p204_p7 = scmp.lt.s32.totalorder %s201_s22, 17  ;;  %p214_p8 = scmp.lt.s32.totalorder %s2392_s13, 15 }
  0x12   : > { %s4967_s14 = smov (!%p202_p6, %s2396_s14), 1  ;;  %p2209_p9 = scmp.ne.s32.totalorder %s2388_s12, 0 }
  0x13   : > { %s4969_s22 = smov (!%p204_p7, %s201_s22), 17  ;;  %s2262_s23 = smul.u32 972, %s4967_s14 }
  0x14   : > { %s2261_s24 = smul.u32 54, %s4969_s22  ;;  %s2207_s25 = sshll.u32 %s4967_s14, 9 }
  0x15   : > { %s4971_s13 = smov (!%p214_p8, %s2392_s13), 15  ;;  %224 = sbr.rel (%p2209_p9) target bundleno = 59 (0x3b), region = 36 }
  0x16   : > { %s208_s26 = sadd.s32 %s2262_s23, %s2261_s24  ;;  %s2206_s28 = sshll.u32 %s4971_s13, 5 }
  0x17   : > { %s2205_s27 = sshll.u32 %s208_s26, 3  ;;  %s218_s5 = sadd.s32 %s2207_s25, %s2206_s28 }
  0x18   : > { %s2496_s4 = scalar_lea.vmem %s4515_s0, %s2205_s27  ;;  %s2208_s6 = sshll.u32 %s218_s5, 3 }
  0x19   : > { %s2501_s9 = scalar_lea.vmem %s4518_s3, %s2208_s6 }
  0x1a   : > { %vm225_vm0 = vcmask 64512   ;;  %v2414_v0 = vmov 0.0  }
  0x1b   : > { %226 = vst.msk [vmem:[#allocation2] sm:$0xff] %vm225_vm0, %v2414_v0 }
  0x1c   : > { %227 = vst.msk [vmem:[#allocation2 + $0x8] sm:$0xff] %vm225_vm0, %v2414_v0 }
  0x1d   : > { %228 = vst.msk [vmem:[#allocation2 + $0x10] sm:$0xff] %vm225_vm0, %v2414_v0 }
  0x1e   : > { %229 = vst.msk [vmem:[#allocation2 + $0x18] sm:$0xff] %vm225_vm0, %v2414_v0 }
  0x1f   : > { %230 = vst.msk [vmem:[#allocation2 + $0x20] sm:$0xff] %vm225_vm0, %v2414_v0 }
  0x20   : > { %231 = vst.msk [vmem:[#allocation2 + $0x28] sm:$0xff] %vm225_vm0, %v2414_v0 }
  0x21   : > { %232 = vst.msk [vmem:[#allocation2 + $0x30] sm:$0xff] %vm225_vm0, %v2414_v0 }
  0x22   : > { %233 = vst.msk [vmem:[#allocation2 + $0x38] sm:$0xff] %vm225_vm0, %v2414_v0 }
  0x23   : > { %234 = vst.msk [vmem:[#allocation2 + $0x40] sm:$0xff] %vm225_vm0, %v2414_v0 }
  0x24   : > { %235 = vst.msk [vmem:[#allocation2 + $0x48] sm:$0xff] %vm225_vm0, %v2414_v0 }
  0x25   : > { %236 = vst.msk [vmem:[#allocation2 + $0x50] sm:$0xff] %vm225_vm0, %v2414_v0 }
  0x26   : > { %237 = vst.msk [vmem:[#allocation2 + $0x58] sm:$0xff] %vm225_vm0, %v2414_v0 }
  0x27   : > { %238 = vst.msk [vmem:[#allocation2 + $0x60] sm:$0xff] %vm225_vm0, %v2414_v0 }
  0x28   : > { %239 = vst.msk [vmem:[#allocation2 + $0x68] sm:$0xff] %vm225_vm0, %v2414_v0 }
  0x29   : > { %240 = vst.msk [vmem:[#allocation2 + $0x70] sm:$0xff] %vm225_vm0, %v2414_v0 }
  0x2a   : > { %241 = vst.msk [vmem:[#allocation2 + $0x78] sm:$0xff] %vm225_vm0, %v2414_v0 }
  0x2b   : > { %242 = vst.msk [vmem:[#allocation2 + $0x80] sm:$0xff] %vm225_vm0, %v2414_v0 }
  0x2c   : > { %243 = vst.msk [vmem:[#allocation2 + $0x88] sm:$0xff] %vm225_vm0, %v2414_v0 }
  0x2d   : > { %244 = vst.msk [vmem:[#allocation2 + $0x90] sm:$0xff] %vm225_vm0, %v2414_v0 }
  0x2e   : > { %245 = vst.msk [vmem:[#allocation2 + $0x98] sm:$0xff] %vm225_vm0, %v2414_v0 }
  0x2f   : > { %246 = vst.msk [vmem:[#allocation2 + $0xa0] sm:$0xff] %vm225_vm0, %v2414_v0 }
  0x30   : > { %247 = vst.msk [vmem:[#allocation2 + $0xa8] sm:$0xff] %vm225_vm0, %v2414_v0 }
  0x31   : > { %248 = vst.msk [vmem:[#allocation2 + $0xb0] sm:$0xff] %vm225_vm0, %v2414_v0 }
  0x32   : > { %249 = vst.msk [vmem:[#allocation2 + $0xb8] sm:$0xff] %vm225_vm0, %v2414_v0 }
  0x33   : > { %250 = vst.msk [vmem:[#allocation2 + $0xc0] sm:$0xff] %vm225_vm0, %v2414_v0 }
  0x34   : > { %251 = vst.msk [vmem:[#allocation2 + $0xc8] sm:$0xff] %vm225_vm0, %v2414_v0 }
  0x35   : > { %252 = vst.msk [vmem:[#allocation2 + $0xd0] sm:$0xff] %vm225_vm0, %v2414_v0 }
  0x36   : > { %253 = vst.msk [vmem:[#allocation2 + $0xd8] sm:$0xff] %vm225_vm0, %v2414_v0 }
  0x37   : > { %254 = vst.msk [vmem:[#allocation2 + $0xe0] sm:$0xff] %vm225_vm0, %v2414_v0 }
  0x38   : > { %255 = vst.msk [vmem:[#allocation2 + $0xe8] sm:$0xff] %vm225_vm0, %v2414_v0 }
  0x39   : > { %256 = vst.msk [vmem:[#allocation2 + $0xf0] sm:$0xff] %vm225_vm0, %v2414_v0 }
  0x3a   : > { %257 = vst.msk [vmem:[#allocation2 + $0xf8] sm:$0xff] %vm225_vm0, %v2414_v0 }
  0x3b PF: > { %v2537_v1 = vld [vmem:[%s2496_s4 + $0x30] sm:$0xff]  ;;  %v2540_v2 = vld [vmem:[%s2496_s4 + $0x38] sm:$0xff]  ;;  %vm360_vm1 = vcmask 1046528   ;;  %v2548_v6 = vld [vmem:[%s2496_s4 + $0x20] sm:$0xff]  ;;  %s2415_s10 = smov 4   ;;  %vm441_vm2 = vcmask 1045504  }
  0x3c   : > { %v2543_v3 = vld [vmem:[%s2496_s4 + $0x18] sm:$0xff]  ;;  %v371_v4 = vrot.slane %v2537_v1, 1  ;;  %v372_v5 = vrot.slane %v2540_v2, 1  ;;  %v2552_v8 = vld [vmem:[%s2496_s4] sm:$0xff]  ;;  %v2555_v9 = vld [vmem:[%s2496_s4 + $0x8] sm:$0xff]  ;;  %v367_v10 = vrot.slane %v2548_v6, 1 }
  0x3d   : > { %v366_v7 = vrot.slane %v2543_v3, 1  ;;  %v361_v11 = vrot.slane %v2552_v8, 1  ;;  %v362_v12 = vrot.slane %v2555_v9, 1  ;;  %v2561_v13 = vld [vmem:[%s2496_s4 + $0x40] sm:$0x3]  ;;  %v2595_v26 = vld [vmem:[%s2496_s4 + $0x68] sm:$0xff] }
  0x3e   : > { %v2564_v14 = vsel %vm360_vm1, %v371_v4, %v372_v5  ;;  %v2567_v15 = vld [vmem:[%s2496_s4 + $0x28] sm:$0x3]  ;;  %v2570_v16 = vld [vmem:[%s2496_s4 + $0x10] sm:$0x3]  ;;  %v374_v19 = vrot.slane %v2561_v13, 1  ;;  %v2592_v25 = vld [vmem:[%s2496_s4 + $0x60] sm:$0xff] }
  0x3f   : > { %556 = vrot.lane.b32.xlu2 %v2564_v14, %s2415_s10  ;;  %v2575_v17 = vsel %vm360_vm1, %v366_v7, %v367_v10  ;;  %v363_v18 = vsel %vm360_vm1, %v361_v11, %v362_v12  ;;  %v369_v20 = vrot.slane %v2567_v15, 1  ;;  %v364_v21 = vrot.slane %v2570_v16, 1  ;;  %v2598_v27 = vld [vmem:[%s2496_s4 + $0x50] sm:$0xff]  ;;  %v2601_v28 = vld [vmem:[%s2496_s4 + $0x58] sm:$0x3]  ;;  %v2604_v29 = vld [vmem:[%s2496_s4 + $0x48] sm:$0xff] }
  0x40   : > { %552 = vrot.lane.b32.xlu1 %v2575_v17, %s2415_s10  ;;  %548 = vrot.lane.b32.xlu0 %v363_v18, %s2415_s10  ;;  %v2585_v22 = vsel %vm360_vm1, %v372_v5, %v374_v19  ;;  %v381_v30 = vrot.slane %v2592_v25, 1  ;;  %v382_v31 = vrot.slane %v2595_v26, 1  ;;  %v377_v32 = vrot.slane %v2598_v27, 1  ;;  %v2626_v38 = vld [vmem:[%s2496_s4 + $0x80] sm:$0xff]  ;;  %v2629_v39 = vld [vmem:[%s2496_s4 + $0x88] sm:$0x3] }
  0x41   : > { %4613 = vst [vmem:[#allocation3_spill] sm:$0xff] %v2585_v22  ;;  %v2588_v23 = vsel %vm360_vm1, %v367_v10, %v369_v20  ;;  %v365_v24 = vsel %vm360_vm1, %v362_v12, %v364_v21  ;;  %v379_v33 = vrot.slane %v2601_v28, 1  ;;  %v376_v34 = vrot.slane %v2604_v29, 1  ;;  %v2632_v40 = vld [vmem:[%s2496_s4 + $0x78] sm:$0xff]  ;;  %v2635_v41 = vld [vmem:[%s2496_s4 + $0x70] sm:$0x3] }
  0x42   : > { %v2617_v35 = vsel %vm360_vm1, %v381_v30, %v382_v31  ;;  %v387_v42 = vrot.slane %v2626_v38, 1  ;;  %v389_v43 = vrot.slane %v2629_v39, 1  ;;  %v386_v44 = vrot.slane %v2632_v40, 1  ;;  %v2657_v49 = vld [vmem:[%s2496_s4 + $0xa8] sm:$0xff]  ;;  %v2660_v50 = vld [vmem:[%s2496_s4 + $0xb0] sm:$0xff]  ;;  %v2663_v51 = vld [vmem:[%s2496_s4 + $0x98] sm:$0xff] }
  0x43   : > { %4614 = vst [vmem:[#allocation4_spill] sm:$0xff] %v2617_v35  ;;  %v2620_v36 = vsel %vm360_vm1, %v377_v32, %v379_v33  ;;  %v2623_v37 = vsel %vm360_vm1, %v376_v34, %v377_v32  ;;  %v384_v45 = vrot.slane %v2635_v41, 1  ;;  %v2666_v52 = vld [vmem:[%s2496_s4 + $0xa0] sm:$0x3]  ;;  %v2669_v53 = vld [vmem:[%s2496_s4 + $0x90] sm:$0xff]  ;;  %v396_v54 = vrot.slane %v2657_v49, 1 }
  0x44   : > { %4615 = vst [vmem:[#allocation5_spill] sm:$0xff] %v2620_v36  ;;  %v2648_v46 = vsel %vm360_vm1, %v387_v42, %v389_v43  ;;  %v2651_v47 = vsel %vm360_vm1, %v386_v44, %v387_v42  ;;  %v397_v55 = vrot.slane %v2660_v50, 1  ;;  %v392_v56 = vrot.slane %v2663_v51, 1  ;;  %v2692_v62 = vld [vmem:[%s2496_s4 + $0xc8] sm:$0xff]  ;;  %v2695_v63 = vld [vmem:[%s2496_s4 + $0xd0] sm:$0x3] }
  0x45   : > { %4616 = vst [vmem:[#allocation6_spill] sm:$0xff] %v2623_v37  ;;  %v2654_v48 = vsel %vm360_vm1, %v382_v31, %v384_v45  ;;  %v394_v57 = vrot.slane %v2666_v52, 1  ;;  %v391_v58 = vrot.slane %v2669_v53, 1  ;;  %v2698_v0 = vld [vmem:[%s2496_s4 + $0xc0] sm:$0xff]  ;;  %v2701_v4 = vld [vmem:[%s2496_s4 + $0xb8] sm:$0x3] }
  0x46   : > { %4617 = vst [vmem:[#allocation7_spill] sm:$0xff] %v2648_v46  ;;  %v2683_v59 = vsel %vm360_vm1, %v396_v54, %v397_v55  ;;  %v402_v5 = vrot.slane %v2692_v62, 1  ;;  %v404_v7 = vrot.slane %v2695_v63, 1  ;;  %v401_v10 = vrot.slane %v2698_v0, 1  ;;  %v2723_v20 = vld [vmem:[%s2496_s4 + $0xf0] sm:$0xff]  ;;  %v2726_v21 = vld [vmem:[%s2496_s4 + $0xf8] sm:$0xff] }
  0x47   : > { %558 = vrot.lane.b32.xlu2 %v2585_v22, %s2415_s10  ;;  %4618 = vst [vmem:[#allocation8_spill] sm:$0xff] %v2651_v47  ;;  %v2686_v60 = vsel %vm360_vm1, %v392_v56, %v394_v57  ;;  %v2689_v61 = vsel %vm360_vm1, %v391_v58, %v392_v56  ;;  %v399_v11 = vrot.slane %v2701_v4, 1  ;;  %v2732_v30 = vld [vmem:[%s2496_s4 + $0xe8] sm:$0x3]  ;;  %v2735_v31 = vld [vmem:[%s2496_s4 + $0xd8] sm:$0xff]  ;;  %v411_v32 = vrot.slane %v2723_v20, 1 }
  0x48   : > { %554 = vrot.lane.b32.xlu1 %v2588_v23, %s2415_s10  ;;  %550 = vrot.lane.b32.xlu0 %v365_v24, %s2415_s10  ;;  %4619 = vst [vmem:[#allocation9_spill] sm:$0xff] %v2654_v48  ;;  %v2714_v12 = vsel %vm360_vm1, %v402_v5, %v404_v7  ;;  %v2717_v18 = vsel %vm360_vm1, %v401_v10, %v402_v5  ;;  %v2729_v24 = vld [vmem:[%s2496_s4 + $0xe0] sm:$0xff]  ;;  %v412_v33 = vrot.slane %v2726_v21, 1  ;;  %v409_v42 = vrot.slane %v2732_v30, 1  ;;  %v2761_v56 = vld [vmem:[%s2496_s4 + $0x118] sm:$0x3] }
  0x49   : > { %4620 = vst [vmem:[#allocation10_spill] sm:$0xff] %v2683_v59  ;;  %v2720_v19 = vsel %vm360_vm1, %v397_v55, %v399_v11  ;;  %v407_v34 = vrot.slane %v2729_v24, 1  ;;  %v406_v43 = vrot.slane %v2735_v31, 1  ;;  %v2758_v55 = vld [vmem:[%s2496_s4 + $0x110] sm:$0xff]  ;;  %v2764_v57 = vld [vmem:[%s2496_s4 + $0x108] sm:$0xff]  ;;  %v419_v7 = vrot.slane %v2761_v56, 1 }
  0x4a   : > { %4621 = vst [vmem:[#allocation11_spill] sm:$0xff] %v2686_v60  ;;  %v2749_v44 = vsel %vm360_vm1, %v411_v32, %v412_v33  ;;  %v2767_v58 = vld [vmem:[%s2496_s4 + $0x100] sm:$0x3]  ;;  %v417_v5 = vrot.slane %v2758_v55, 1  ;;  %v416_v10 = vrot.slane %v2764_v57, 1  ;;  %s2416_s11 = smov 8  }
  0x4b   : > { %4622 = vst [vmem:[#allocation12_spill] sm:$0xff] %v2689_v61  ;;  %v2752_v45 = vsel %vm360_vm1, %v407_v34, %v409_v42  ;;  %v2755_v54 = vsel %vm360_vm1, %v406_v43, %v407_v34  ;;  %v414_v11 = vrot.slane %v2767_v58, 1  ;;  %v2789_v43 = vld [vmem:[%s2496_s4 + $0x138] sm:$0xff]  ;;  %s2417_s13 = smov 12   ;;  %s2418_s14 = smov 16   ;;  %vm1316_vm3 = vcmask 31744  }
  0x4c   : > { %4623 = vst [vmem:[#allocation13_spill] sm:$0xff] %v2714_v12  ;;  %v2780_v32 = vsel %vm360_vm1, %v417_v5, %v419_v7  ;;  %v2783_v34 = vsel %vm360_vm1, %v416_v10, %v417_v5  ;;  %v2801_v7 = vld [vmem:[%s2496_s4 + $0x120] sm:$0xff]  ;;  %s2419_s22 = smov 20   ;;  %s2420_s23 = smov 24   ;;  %vm1349_vm4 = vcmask 64512   ;;  %vm1382_vm5 = vcmask 97280  }
  0x4d   : > { %4624 = vst [vmem:[#allocation14_spill] sm:$0xff] %v2717_v18  ;;  %v2786_v42 = vsel %vm360_vm1, %v412_v33, %v414_v11  ;;  %v426_v33 = vrot.slane %v2789_v43, 1  ;;  %vm1415_vm6 = vcmask 130048   ;;  %vm1448_vm7 = vcmask 162816   ;;  %s2421_s24 = smov 32   ;;  %s2422_s25 = smov 28  }
  0x4e   : > { %4625 = vst [vmem:[#allocation15_spill] sm:$0xff] %v2720_v19  ;;  %vm1481_vm8 = vcmask 195584   ;;  %s1580_s26 = smul.u32 40, %s2388_s12  ;;  %vm1716_vm9 = vcmask 1043456   ;;  %vm1514_vm10 = vcmask 228352   ;;  %vm1547_vm11 = vcmask 261120  }
  0x4f   : > { %564 = vrot.lane.b32.xlu2 %v2617_v35, %s2415_s10  ;;  %4626 = vst [vmem:[#allocation16_spill] sm:$0xff] %v2749_v44  ;;  %v2861_v35 = vld [vmem:[%s2496_s4 + $0x168] sm:$0xff]  ;;  %vm1619_vm12 = vcmask 293888   ;;  %p2243_p10 = scmp.ne.s32.totalorder %s2388_s12, 2 }
  0x50   : > { %562 = vrot.lane.b32.xlu1 %v2620_v36, %s2415_s10  ;;  %560 = vrot.lane.b32.xlu0 %v2623_v37, %s2415_s10  ;;  %4627 = vst [vmem:[#allocation17_spill] sm:$0xff] %v2752_v45  ;;  %s3987_s29 = scalar_lea.vmem %s4516_s1, %s1580_s26 }
  0x51   : > { %4628 = vst [vmem:[#allocation18_spill] sm:$0xff] %v2755_v54 }
  0x52   : > { %4629 = vst [vmem:[#allocation19_spill] sm:$0xff] %v2780_v32 }
  0x53   : > { %4630 = vst [vmem:[#allocation20_spill] sm:$0xff] %v2783_v34 }
  0x54   : > { %4631 = vst [vmem:[#allocation21_spill] sm:$0xff] %v2786_v42 }
  0x55   : > { %4640 = vst [vmem:[#allocation30_spill] sm:$0xff] %v2861_v35 }
  0x57   : > { %570 = vrot.lane.b32.xlu2 %v2648_v46, %s2415_s10  ;;  %v2833_v46 = vld [vmem:[%s2496_s4 + $0x148] sm:$0x3] }
  0x58   : > { %568 = vrot.lane.b32.xlu1 %v2651_v47, %s2415_s10  ;;  %566 = vrot.lane.b32.xlu0 %v2654_v48, %s2415_s10 }
  0x5f   : > { %576 = vrot.lane.b32.xlu2 %v2683_v59, %s2415_s10 }
  0x60   : > { %574 = vrot.lane.b32.xlu1 %v2686_v60, %s2415_s10  ;;  %572 = vrot.lane.b32.xlu0 %v2689_v61, %s2415_s10 }
  0x67   : > { %582 = vrot.lane.b32.xlu2 %v2714_v12, %s2415_s10  ;;  %v2795_v12 = vld [vmem:[%s2496_s4 + $0x128] sm:$0xff] }
  0x68   : > { %580 = vrot.lane.b32.xlu1 %v2717_v18, %s2415_s10  ;;  %578 = vrot.lane.b32.xlu0 %v2720_v19, %s2415_s10  ;;  %v422_v10 = vrot.slane %v2795_v12, 1  ;;  %v2827_v19 = vld [vmem:[%s2496_s4 + $0x160] sm:$0x3]  ;;  %v2830_v18 = vld [vmem:[%s2496_s4 + $0x150] sm:$0xff] }
  0x6f   : > { %588 = vrot.lane.b32.xlu2 %v2749_v44, %s2415_s10  ;;  %v2792_v44 = vld [vmem:[%s2496_s4 + $0x140] sm:$0xff] }
  0x70   : > { %586 = vrot.lane.b32.xlu1 %v2752_v45, %s2415_s10  ;;  %584 = vrot.lane.b32.xlu0 %v2755_v54, %s2415_s10  ;;  %4632 = vst [vmem:[#allocation22_spill] sm:$0xff] %v2792_v44  ;;  %v2798_v54 = vld [vmem:[%s2496_s4 + $0x130] sm:$0x3]  ;;  %v427_v5 = vrot.slane %v2792_v44, 1  ;;  %v421_v45 = vrot.slane %v2801_v7, 1 }
  0x71   : > { %v424_v11 = vrot.slane %v2798_v54, 1 }
  0x72   : > { %v2815_v59 = vsel %vm360_vm1, %v426_v33, %v427_v5  ;;  %v434_v33 = vrot.slane %v2827_v19, 1 }
  0x73   : > { %4633 = vst [vmem:[#allocation23_spill] sm:$0xff] %v2815_v59 }
  0x77   : > { %594 = vrot.lane.b32.xlu2 %v2780_v32, %s2415_s10  ;;  %v2818_v32 = vsel %vm360_vm1, %v422_v10, %v424_v11  ;;  %v429_v11 = vrot.slane %v2833_v46, 1 }
  0x78   : > { %592 = vrot.lane.b32.xlu1 %v2783_v34, %s2415_s10  ;;  %590 = vrot.lane.b32.xlu0 %v2786_v42, %s2415_s10  ;;  %4634 = vst [vmem:[#allocation24_spill] sm:$0xff] %v2818_v32  ;;  %v2821_v34 = vsel %vm360_vm1, %v421_v45, %v422_v10  ;;  %v2824_v42 = vld [vmem:[%s2496_s4 + $0x158] sm:$0xff]  ;;  %v431_v10 = vrot.slane %v2830_v18, 1 }
  0x79   : > { %4635 = vst [vmem:[#allocation25_spill] sm:$0xff] %v2821_v34  ;;  %v432_v45 = vrot.slane %v2824_v42, 1 }
  0x7a   : > { %4636 = vst [vmem:[#allocation26_spill] sm:$0xff] %v2824_v42 }
  0x7b   : > { %v2846_v61 = vsel %vm360_vm1, %v432_v45, %v434_v33  ;;  %v2849_v60 = vsel %vm360_vm1, %v431_v10, %v432_v45  ;;  %v442_v45 = vrot.slane %v2552_v8, 2  ;;  %v448_v8 = vrot.slane %v2548_v6, 2 }
  0x7c   : > { %4637 = vst [vmem:[#allocation27_spill] sm:$0xff] %v2846_v61 }
  0x7d   : > { %4638 = vst [vmem:[#allocation28_spill] sm:$0xff] %v2849_v60 }
  0x7f   : > { %600 = vrot.lane.b32.xlu2 %v2815_v59, %s2415_s10  ;;  %v2852_v59 = vsel %vm360_vm1, %v427_v5, %v429_v11  ;;  %v443_v5 = vrot.slane %v2555_v9, 2  ;;  %v436_v11 = vrot.slane %v2861_v35, 1  ;;  %v450_v9 = vrot.slane %v2567_v15, 2 }
  0x80   : > { %598 = vrot.lane.b32.xlu1 %v2818_v32, %s2415_s10  ;;  %596 = vrot.lane.b32.xlu0 %v2821_v34, %s2415_s10  ;;  %4639 = vst [vmem:[#allocation29_spill] sm:$0xff] %v2852_v59  ;;  %v2855_v32 = vld [vmem:[%s2496_s4 + $0x170] sm:$0xff]  ;;  %v2858_v34 = vld [vmem:[%s2496_s4 + $0x178] sm:$0x3]  ;;  %v457_v15 = vrot.slane %v2604_v29, 2 }
  0x81   : > { %v437_v33 = vrot.slane %v2855_v32, 1  ;;  %v439_v10 = vrot.slane %v2858_v34, 1  ;;  %v444_v48 = vsel %vm441_vm2, %v442_v45, %v443_v5  ;;  %v447_v45 = vrot.slane %v2543_v3, 2 }
  0x87   : > { %606 = vrot.lane.b32.xlu2 %v2846_v61, %s2415_s10  ;;  %v2876_v61 = vsel %vm360_vm1, %v437_v33, %v439_v10  ;;  %v445_v10 = vrot.slane %v2570_v16, 2  ;;  %v458_v16 = vrot.slane %v2598_v27, 2 }
  0x88   : > { %604 = vrot.lane.b32.xlu1 %v2849_v60, %s2415_s10  ;;  %602 = vrot.lane.b32.xlu0 %v2852_v59, %s2415_s10  ;;  %4641 = vst [vmem:[#allocation31_spill] sm:$0xff] %v2876_v61  ;;  %v2879_v60 = vsel %vm360_vm1, %v436_v11, %v437_v33  ;;  %v2891_v33 = vsel %vm441_vm2, %v448_v8, %v450_v9  ;;  %v453_v9 = vrot.slane %v2540_v2, 2 }
  0x89   : > { %4642 = vst [vmem:[#allocation32_spill] sm:$0xff] %v2879_v60  ;;  %v2894_v11 = vsel %vm441_vm2, %v447_v45, %v448_v8  ;;  %v455_v8 = vrot.slane %v2561_v13, 2  ;;  %v2910_v45 = vsel %vm441_vm2, %v457_v15, %v458_v16  ;;  %v463_v13 = vrot.slane %v2595_v26, 2 }
  0x8a   : > { %4643 = vst [vmem:[#allocation33_spill] sm:$0xff] %v2891_v33  ;;  %v465_v15 = vrot.slane %v2635_v41, 2  ;;  %v473_v41 = vrot.slane %v2663_v51, 2 }
  0x8b   : > { %4645 = vst [vmem:[#allocation35_spill] sm:$0xff] %v2910_v45 }
  0x8f   : > { %644 = vrot.lane.b32.xlu2 %v444_v48, %s2416_s11  ;;  %v446_v48 = vsel %vm441_vm2, %v443_v5, %v445_v10  ;;  %v452_v5 = vrot.slane %v2537_v1, 2  ;;  %v2913_v10 = vsel %vm441_vm2, %v453_v9, %v455_v8  ;;  %v462_v8 = vrot.slane %v2592_v25, 2 }
  0x90   : > { %610 = vrot.lane.b32.xlu1 %v2876_v61, %s2415_s10  ;;  %608 = vrot.lane.b32.xlu0 %v2879_v60, %s2415_s10  ;;  %4646 = vst [vmem:[#allocation36_spill] sm:$0xff] %v2913_v10 }
  0x97   : > { %650 = vrot.lane.b32.xlu2 %v2891_v33, %s2416_s11 }
  0x98   : > { %648 = vrot.lane.b32.xlu1 %v2894_v11, %s2416_s11  ;;  %646 = vrot.lane.b32.xlu0 %v446_v48, %s2416_s11  ;;  %v2916_v48 = vsel %vm441_vm2, %v452_v5, %v453_v9  ;;  %v460_v9 = vrot.slane %v2601_v28, 2  ;;  %v2931_v5 = vsel %vm441_vm2, %v463_v13, %v465_v15  ;;  %v472_v28 = vrot.slane %v2669_v53, 2 }
  0x99   : > { %v2904_v60 = vpop.permute.xlu2 %556  ;;  %4648 = vst [vmem:[#allocation38_spill] sm:$0xff] %v2931_v5 }
  0x9a   : > { %4644 = vst [vmem:[#allocation34_spill] sm:$0xff] %v2904_v60  ;;  %v2937_v33 = vsel %vm441_vm2, %v458_v16, %v460_v9  ;;  %v470_v16 = vrot.slane %v2629_v39, 2  ;;  %v2953_v9 = vsel %vm441_vm2, %v472_v28, %v473_v41  ;;  %v478_v39 = vrot.slane %v2660_v50, 2 }
  0x9b   : > { %4650 = vst [vmem:[#allocation40_spill] sm:$0xff] %v2937_v33  ;;  %v480_v28 = vrot.slane %v2701_v4, 2  ;;  %v488_v4 = vrot.slane %v2729_v24, 2 }
  0x9c   : > { %4652 = vst [vmem:[#allocation42_spill] sm:$0xff] %v2953_v9 }
  0x9f   : > { %656 = vrot.lane.b32.xlu2 %v2910_v45, %s2416_s11  ;;  %v2934_v45 = vsel %vm441_vm2, %v462_v8, %v463_v13  ;;  %v468_v13 = vrot.slane %v2626_v38, 2  ;;  %v467_v8 = vrot.slane %v2632_v40, 2 }
  0xa0   : > { %654 = vrot.lane.b32.xlu1 %v2913_v10, %s2416_s11  ;;  %652 = vrot.lane.b32.xlu0 %v2916_v48, %s2416_s11  ;;  %4649 = vst [vmem:[#allocation39_spill] sm:$0xff] %v2934_v45 }
  0xa1   : > { %v2926_v60 = vpop.permute.xlu2 %558 }
  0xa2   : > { %4647 = vst [vmem:[#allocation37_spill] sm:$0xff] %v2926_v60  ;;  %v2956_v60 = vsel %vm441_vm2, %v468_v13, %v470_v16  ;;  %v477_v16 = vrot.slane %v2657_v49, 2 }
  0xa3   : > { %4653 = vst [vmem:[#allocation43_spill] sm:$0xff] %v2956_v60 }
  0xa7   : > { %662 = vrot.lane.b32.xlu2 %v2931_v5, %s2416_s11  ;;  %v2959_v5 = vsel %vm441_vm2, %v467_v8, %v468_v13  ;;  %v475_v13 = vrot.slane %v2666_v52, 2  ;;  %v487_v52 = vrot.slane %v2735_v31, 2 }
  0xa8   : > { %660 = vrot.lane.b32.xlu1 %v2934_v45, %s2416_s11  ;;  %658 = vrot.lane.b32.xlu0 %v2937_v33, %s2416_s11  ;;  %4654 = vst [vmem:[#allocation44_spill] sm:$0xff] %v2959_v5 }
  0xa9   : > { %v2947_v15 = vpop.permute.xlu2 %564 }
  0xaa   : > { %4651 = vst [vmem:[#allocation41_spill] sm:$0xff] %v2947_v15 }
  0xaf   : > { %668 = vrot.lane.b32.xlu2 %v2953_v9, %s2416_s11  ;;  %v2978_v9 = vsel %vm441_vm2, %v478_v39, %v480_v28 }
  0xb0   : > { %666 = vrot.lane.b32.xlu1 %v2956_v60, %s2416_s11  ;;  %664 = vrot.lane.b32.xlu0 %v2959_v5, %s2416_s11  ;;  %4658 = vst [vmem:[#allocation48_spill] sm:$0xff] %v2978_v9  ;;  %v2981_v60 = vsel %vm441_vm2, %v477_v16, %v478_v39  ;;  %v2984_v5 = vsel %vm441_vm2, %v473_v41, %v475_v13  ;;  %v483_v39 = vrot.slane %v2692_v62, 2  ;;  %v485_v41 = vrot.slane %v2695_v63, 2 }
  0xb1   : > { %v2969_v15 = vpop.permute.xlu2 %570  ;;  %4659 = vst [vmem:[#allocation49_spill] sm:$0xff] %v2981_v60  ;;  %v482_v16 = vrot.slane %v2698_v0, 2  ;;  %v493_v63 = vrot.slane %v2726_v21, 2 }
  0xb2   : > { %4655 = vst [vmem:[#allocation45_spill] sm:$0xff] %v2969_v15  ;;  %v2973_v8 = vpop.permute.xlu1 %552  ;;  %v2975_v33 = vpop.permute.xlu0 %548 }
  0xb3   : > { %4656 = vst [vmem:[#allocation46_spill] sm:$0xff] %v2973_v8  ;;  %v3004_v8 = vsel %vm441_vm2, %v487_v52, %v488_v4  ;;  %v495_v52 = vrot.slane %v2767_v58, 2  ;;  %v503_v58 = vrot.slane %v2795_v12, 2 }
  0xb4   : > { %4657 = vst [vmem:[#allocation47_spill] sm:$0xff] %v2975_v33  ;;  %v3007_v33 = vsel %vm441_vm2, %v483_v39, %v485_v41  ;;  %v492_v41 = vrot.slane %v2723_v20, 2 }
  0xb5   : > { %4660 = vst [vmem:[#allocation50_spill] sm:$0xff] %v2984_v5 }
  0xb6   : > { %4664 = vst [vmem:[#allocation54_spill] sm:$0xff] %v3004_v8 }
  0xb7   : > { %674 = vrot.lane.b32.xlu2 %v2978_v9, %s2416_s11  ;;  %4665 = vst [vmem:[#allocation55_spill] sm:$0xff] %v3007_v33  ;;  %v3010_v9 = vsel %vm441_vm2, %v482_v16, %v483_v39  ;;  %v490_v39 = vrot.slane %v2732_v30, 2  ;;  %v502_v30 = vrot.slane %v2801_v7, 2 }
  0xb8   : > { %672 = vrot.lane.b32.xlu1 %v2981_v60, %s2416_s11  ;;  %670 = vrot.lane.b32.xlu0 %v2984_v5, %s2416_s11  ;;  %4666 = vst [vmem:[#allocation56_spill] sm:$0xff] %v3010_v9 }
  0xb9   : > { %v2994_v28 = vpop.permute.xlu2 %576 }
  0xba   : > { %4661 = vst [vmem:[#allocation51_spill] sm:$0xff] %v2994_v28  ;;  %v2999_v13 = vpop.permute.xlu1 %554  ;;  %v3001_v15 = vpop.permute.xlu0 %550  ;;  %v3029_v28 = vsel %vm441_vm2, %v493_v63, %v495_v52 }
  0xbb   : > { %4662 = vst [vmem:[#allocation52_spill] sm:$0xff] %v2999_v13 }
  0xbc   : > { %4663 = vst [vmem:[#allocation53_spill] sm:$0xff] %v3001_v15 }
  0xbd   : > { %4670 = vst [vmem:[#allocation60_spill] sm:$0xff] %v3029_v28 }
  0xbf   : > { %680 = vrot.lane.b32.xlu2 %v3004_v8, %s2416_s11  ;;  %v3032_v8 = vsel %vm441_vm2, %v492_v41, %v493_v63  ;;  %v498_v63 = vrot.slane %v2758_v55, 2  ;;  %v497_v41 = vrot.slane %v2764_v57, 2 }
  0xc0   : > { %678 = vrot.lane.b32.xlu1 %v3007_v33, %s2416_s11  ;;  %676 = vrot.lane.b32.xlu0 %v3010_v9, %s2416_s11  ;;  %v3035_v9 = vsel %vm441_vm2, %v488_v4, %v490_v39  ;;  %v500_v4 = vrot.slane %v2761_v56, 2  ;;  %v508_v56 = vrot.slane %v2792_v44, 2 }
  0xc1   : > { %v3020_v13 = vpop.permute.xlu2 %582  ;;  %4671 = vst [vmem:[#allocation61_spill] sm:$0xff] %v3035_v9 }
  0xc2   : > { %4667 = vst [vmem:[#allocation57_spill] sm:$0xff] %v3020_v13  ;;  %v3024_v16 = vpop.permute.xlu1 %562  ;;  %v3026_v15 = vpop.permute.xlu0 %560  ;;  %v3058_v13 = vsel %vm441_vm2, %v498_v63, %v500_v4  ;;  %v507_v4 = vrot.slane %v2789_v43, 2 }
  0xc3   : > { %4668 = vst [vmem:[#allocation58_spill] sm:$0xff] %v3024_v16  ;;  %v3055_v16 = vsel %vm441_vm2, %v502_v30, %v503_v58  ;;  %v510_v30 = vrot.slane %v2833_v46, 2  ;;  %v517_v46 = vrot.slane %v2861_v35, 2 }
  0xc4   : > { %4669 = vst [vmem:[#allocation59_spill] sm:$0xff] %v3026_v15 }
  0xc5   : > { %4675 = vst [vmem:[#allocation65_spill] sm:$0xff] %v3055_v16 }
  0xc6   : > { %4676 = vst [vmem:[#allocation66_spill] sm:$0xff] %v3058_v13 }
  0xc7   : > { %686 = vrot.lane.b32.xlu2 %v3029_v28, %s2416_s11  ;;  %v3061_v28 = vsel %vm441_vm2, %v497_v41, %v498_v63  ;;  %v505_v63 = vrot.slane %v2798_v54, 2  ;;  %v518_v54 = vrot.slane %v2855_v32, 2 }
  0xc8   : > { %684 = vrot.lane.b32.xlu1 %v3032_v8, %s2416_s11  ;;  %682 = vrot.lane.b32.xlu0 %v3035_v9, %s2416_s11  ;;  %4677 = vst [vmem:[#allocation67_spill] sm:$0xff] %v3061_v28 }
  0xc9   : > { %v3045_v52 = vpop.permute.xlu2 %588 }
  0xca   : > { %4672 = vst [vmem:[#allocation62_spill] sm:$0xff] %v3045_v52  ;;  %v3050_v39 = vpop.permute.xlu1 %568  ;;  %v3052_v15 = vpop.permute.xlu0 %566  ;;  %v3080_v52 = vsel %vm441_vm2, %v508_v56, %v510_v30 }
  0xcb   : > { %4673 = vst [vmem:[#allocation63_spill] sm:$0xff] %v3050_v39 }
  0xcc   : > { %4674 = vst [vmem:[#allocation64_spill] sm:$0xff] %v3052_v15 }
  0xcd   : > { %4681 = vst [vmem:[#allocation71_spill] sm:$0xff] %v3080_v52 }
  0xcf   : > { %692 = vrot.lane.b32.xlu2 %v3055_v16, %s2416_s11  ;;  %v3083_v16 = vsel %vm441_vm2, %v507_v4, %v508_v56  ;;  %v513_v56 = vrot.slane %v2824_v42, 2  ;;  %v512_v4 = vrot.slane %v2830_v18, 2 }
  0xd0   : > { %690 = vrot.lane.b32.xlu1 %v3058_v13, %s2416_s11  ;;  %688 = vrot.lane.b32.xlu0 %v3061_v28, %s2416_s11  ;;  %4682 = vst [vmem:[#allocation72_spill] sm:$0xff] %v3083_v16  ;;  %v3086_v28 = vsel %vm441_vm2, %v503_v58, %v505_v63  ;;  %v515_v58 = vrot.slane %v2827_v19, 2 }
  0xd1   : > { %v3071_v15 = vpop.permute.xlu2 %594  ;;  %4683 = vst [vmem:[#allocation73_spill] sm:$0xff] %v3086_v28 }
  0xd2   : > { %4678 = vst [vmem:[#allocation68_spill] sm:$0xff] %v3071_v15  ;;  %v3075_v41 = vpop.permute.xlu1 %574  ;;  %v3077_v39 = vpop.permute.xlu0 %572  ;;  %v3106_v15 = vsel %vm441_vm2, %v517_v46, %v518_v54  ;;  %v520_v46 = vrot.slane %v2858_v34, 2 }
  0xd3   : > { %4679 = vst [vmem:[#allocation69_spill] sm:$0xff] %v3075_v41  ;;  %v3109_v41 = vsel %vm441_vm2, %v513_v56, %v515_v58 }
  0xd4   : > { %4680 = vst [vmem:[#allocation70_spill] sm:$0xff] %v3077_v39 }
  0xd5   : > { %4686 = vst [vmem:[#allocation76_spill] sm:$0xff] %v3109_v41 }
  0xd7   : > { %698 = vrot.lane.b32.xlu2 %v3080_v52, %s2416_s11  ;;  %v3112_v52 = vsel %vm441_vm2, %v512_v4, %v513_v56  ;;  %v3128_v56 = vsel %vm441_vm2, %v518_v54, %v520_v46 }
  0xd8   : > { %696 = vrot.lane.b32.xlu1 %v3083_v16, %s2416_s11  ;;  %694 = vrot.lane.b32.xlu0 %v3086_v28, %s2416_s11 }
  0xd9   : > { %v3096_v30 = vpop.permute.xlu2 %600 }
  0xda   : > { %4684 = vst [vmem:[#allocation74_spill] sm:$0xff] %v3096_v30  ;;  %v3101_v63 = vpop.permute.xlu1 %580  ;;  %v3103_v39 = vpop.permute.xlu0 %578 }
  0xdb   : > { %4685 = vst [vmem:[#allocation75_spill] sm:$0xff] %v3101_v63 }
  0xdf   : > { %704 = vrot.lane.b32.xlu2 %v3106_v15, %s2416_s11 }
  0xe0   : > { %702 = vrot.lane.b32.xlu1 %v3109_v41, %s2416_s11  ;;  %700 = vrot.lane.b32.xlu0 %v3112_v52, %s2416_s11 }
  0xe1   : > { %v3120_v19 = vpop.permute.xlu2 %606 }
  0xe2   : > { %4687 = vst [vmem:[#allocation77_spill] sm:$0xff] %v3120_v19  ;;  %v3123_v30 = vpop.permute.xlu1 %586  ;;  %v3125_v58 = vpop.permute.xlu0 %584 }
  0xe3   : > { %4688 = vst [vmem:[#allocation78_spill] sm:$0xff] %v3123_v30 }
  0xe7   : > { %742 = vrot.lane.b32.xlu2 %v2548_v6, %s2417_s13 }
  0xe8   : > { %740 = vrot.lane.b32.xlu1 %v2543_v3, %s2417_s13  ;;  %706 = vrot.lane.b32.xlu0 %v3128_v56, %s2416_s11 }
  0xe9   : > { %v3136_v4 = vpop.permute.xlu2 %644 }
  0xea   : > { %4689 = vst [vmem:[#allocation79_spill] sm:$0xff] %v3136_v4  ;;  %v3138_v34 = vpop.permute.xlu1 %592  ;;  %v3140_v19 = vpop.permute.xlu0 %590 }
  0xeb   : > { %4690 = vst [vmem:[#allocation80_spill] sm:$0xff] %v3138_v34 }
  0xef   : > { %748 = vrot.lane.b32.xlu2 %v2604_v29, %s2417_s13 }
  0xf0   : > { %746 = vrot.lane.b32.xlu1 %v2540_v2, %s2417_s13  ;;  %744 = vrot.lane.b32.xlu0 %v2537_v1, %s2417_s13 }
  0xf1   : > { %v3148_v6 = vpop.permute.xlu2 %650 }
  0xf2   : > { %4691 = vst [vmem:[#allocation81_spill] sm:$0xff] %v3148_v6  ;;  %v3150_v3 = vpop.permute.xlu1 %598  ;;  %v3152_v54 = vpop.permute.xlu0 %596 }
  0xf3   : > { %4692 = vst [vmem:[#allocation82_spill] sm:$0xff] %v3150_v3 }
  0xf7   : > { %754 = vrot.lane.b32.xlu2 %v2595_v26, %s2417_s13 }
  0xf8   : > { %752 = vrot.lane.b32.xlu1 %v2592_v25, %s2417_s13  ;;  %750 = vrot.lane.b32.xlu0 %v2598_v27, %s2417_s13 }
  0xf9   : > { %v3160_v46 = vpop.permute.xlu2 %656 }
  0xfa   : > { %4693 = vst [vmem:[#allocation83_spill] sm:$0xff] %v3160_v46  ;;  %v3162_v4 = vpop.permute.xlu1 %604  ;;  %v3164_v34 = vpop.permute.xlu0 %602 }
  0xfb   : > { %4694 = vst [vmem:[#allocation84_spill] sm:$0xff] %v3162_v4 }
  0xfc   : > { %4695 = vst [vmem:[#allocation85_spill] sm:$0xff] %v3164_v34 }
  0xff   : > { %760 = vrot.lane.b32.xlu2 %v2669_v53, %s2417_s13 }
 0x100   : > { %758 = vrot.lane.b32.xlu1 %v2626_v38, %s2417_s13  ;;  %756 = vrot.lane.b32.xlu0 %v2632_v40, %s2417_s13 }
 0x101   : > { %v3172_v6 = vpop.permute.xlu2 %662 }
 0x102   : > { %4696 = vst [vmem:[#allocation86_spill] sm:$0xff] %v3172_v6  ;;  %v3174_v3 = vpop.permute.xlu1 %610  ;;  %v3176_v30 = vpop.permute.xlu0 %608 }
 0x103   : > { %4697 = vst [vmem:[#allocation87_spill] sm:$0xff] %v3174_v3 }
 0x104   : > { %4698 = vst [vmem:[#allocation88_spill] sm:$0xff] %v3176_v30 }
 0x107   : > { %766 = vrot.lane.b32.xlu2 %v2660_v50, %s2417_s13 }
 0x108   : > { %764 = vrot.lane.b32.xlu1 %v2657_v49, %s2417_s13  ;;  %762 = vrot.lane.b32.xlu0 %v2663_v51, %s2417_s13 }
 0x109   : > { %v3184_v46 = vpop.permute.xlu2 %668 }
 0x10a   : > { %4699 = vst [vmem:[#allocation89_spill] sm:$0xff] %v3184_v46  ;;  %v3186_v4 = vpop.permute.xlu1 %648  ;;  %v3188_v63 = vpop.permute.xlu0 %646 }
 0x10b   : > { %4700 = vst [vmem:[#allocation90_spill] sm:$0xff] %v3186_v4 }
 0x10c   : > { %4701 = vst [vmem:[#allocation91_spill] sm:$0xff] %v3188_v63 }
 0x10f   : > { %772 = vrot.lane.b32.xlu2 %v2735_v31, %s2417_s13 }
 0x110   : > { %770 = vrot.lane.b32.xlu1 %v2692_v62, %s2417_s13  ;;  %768 = vrot.lane.b32.xlu0 %v2698_v0, %s2417_s13 }
 0x111   : > { %v3196_v6 = vpop.permute.xlu2 %674 }
 0x112   : > { %v3198_v3 = vpop.permute.xlu1 %654  ;;  %v3200_v30 = vpop.permute.xlu0 %652 }
 0x113   : > { %4702 = vst [vmem:[#allocation92_spill] sm:$0xff] %v3198_v3 }
 0x114   : > { %4703 = vst [vmem:[#allocation93_spill] sm:$0xff] %v3200_v30 }
 0x117   : > { %778 = vrot.lane.b32.xlu2 %v2726_v21, %s2417_s13 }
 0x118   : > { %776 = vrot.lane.b32.xlu1 %v2723_v20, %s2417_s13  ;;  %774 = vrot.lane.b32.xlu0 %v2729_v24, %s2417_s13 }
 0x119   : > { %v3208_v46 = vpop.permute.xlu2 %680 }
 0x11a   : > { %v3210_v4 = vpop.permute.xlu1 %660  ;;  %v3212_v63 = vpop.permute.xlu0 %658 }
 0x11b   : > { %4704 = vst [vmem:[#allocation94_spill] sm:$0xff] %v3210_v4 }
 0x11c   : > { %4705 = vst [vmem:[#allocation95_spill] sm:$0xff] %v3212_v63 }
 0x11f   : > { %784 = vrot.lane.b32.xlu2 %v2801_v7, %s2417_s13 }
 0x120   : > { %782 = vrot.lane.b32.xlu1 %v2758_v55, %s2417_s13  ;;  %780 = vrot.lane.b32.xlu0 %v2764_v57, %s2417_s13 }
 0x121   : > { %v3220_v3 = vpop.permute.xlu2 %686 }
 0x122   : > { %v3222_v30 = vpop.permute.xlu1 %666  ;;  %v3224_v34 = vpop.permute.xlu0 %664 }
 0x123   : > { %4706 = vst [vmem:[#allocation96_spill] sm:$0xff] %v3222_v30 }
 0x124   : > { %4707 = vst [vmem:[#allocation97_spill] sm:$0xff] %v3224_v34  ;;  %v3251_v34 = vld [vmem:[%s2496_s4 + $0x188] sm:$0xff] }
 0x125   : > { %4711 = vst [vmem:[#allocation101_spill] sm:$0xff] %v3251_v34 }
 0x127   : > { %790 = vrot.lane.b32.xlu2 %v2792_v44, %s2417_s13  ;;  %v3254_v44 = vld [vmem:[%s2496_s4 + $0x180] sm:$0xff] }
 0x128   : > { %788 = vrot.lane.b32.xlu1 %v2789_v43, %s2417_s13  ;;  %786 = vrot.lane.b32.xlu0 %v2795_v12, %s2417_s13  ;;  %4712 = vst [vmem:[#allocation102_spill] sm:$0xff] %v3254_v44 }
 0x129   : > { %v3232_v55 = vpop.permute.xlu2 %692 }
 0x12a   : > { %v3234_v4 = vpop.permute.xlu1 %672  ;;  %v3236_v63 = vpop.permute.xlu0 %670 }
 0x12f   : > { %796 = vrot.lane.b32.xlu2 %v2861_v35, %s2417_s13 }
 0x130   : > { %794 = vrot.lane.b32.xlu1 %v2824_v42, %s2417_s13  ;;  %792 = vrot.lane.b32.xlu0 %v2830_v18, %s2417_s13 }
 0x131   : > { %v3244_v30 = vpop.permute.xlu2 %698 }
 0x132   : > { %4708 = vst [vmem:[#allocation98_spill] sm:$0xff] %v3244_v30  ;;  %v3246_v43 = vpop.permute.xlu1 %678  ;;  %v3248_v12 = vpop.permute.xlu0 %676 }
 0x133   : > { %4709 = vst [vmem:[#allocation99_spill] sm:$0xff] %v3246_v43 }
 0x134   : > { %4710 = vst [vmem:[#allocation100_spill] sm:$0xff] %v3248_v12 }
 0x137   : > { %802 = vrot.lane.b32.xlu2 %v3251_v34, %s2417_s13 }
 0x138   : > { %800 = vrot.lane.b32.xlu1 %v3254_v44, %s2417_s13  ;;  %798 = vrot.lane.b32.xlu0 %v2855_v32, %s2417_s13 }
 0x139   : > { %v3262_v35 = vpop.permute.xlu2 %704 }
 0x13a   : > { %4713 = vst [vmem:[#allocation103_spill] sm:$0xff] %v3262_v35  ;;  %v3264_v42 = vpop.permute.xlu1 %684  ;;  %v3266_v43 = vpop.permute.xlu0 %682 }
 0x13b   : > { %4714 = vst [vmem:[#allocation104_spill] sm:$0xff] %v3264_v42  ;;  %v4745_v42 = vld [vmem:[#allocation20_spill] sm:$0xff] }
 0x13c   : > { %4715 = vst [vmem:[#allocation105_spill] sm:$0xff] %v3266_v43 }
 0x13f   : > { %840 = vrot.lane.b32.xlu2 %v2564_v14, %s2418_s14 }
 0x140   : > { %838 = vrot.lane.b32.xlu1 %v2588_v23, %s2418_s14  ;;  %836 = vrot.lane.b32.xlu0 %v2575_v17, %s2418_s14 }
 0x141   : > { %v3274_v12 = vpop.permute.xlu2 %742 }
 0x142   : > { %4716 = vst [vmem:[#allocation106_spill] sm:$0xff] %v3274_v12  ;;  %v3276_v30 = vpop.permute.xlu1 %690  ;;  %v3278_v32 = vpop.permute.xlu0 %688 }
 0x143   : > { %4717 = vst [vmem:[#allocation107_spill] sm:$0xff] %v3276_v30 }
 0x144   : > { %4718 = vst [vmem:[#allocation108_spill] sm:$0xff] %v3278_v32  ;;  %v4722_v32 = vld [vmem:[#allocation9_spill] sm:$0xff] }
 0x147   : > { %846 = vrot.lane.b32.xlu2 %v2620_v36, %s2418_s14  ;;  %v4723_v36 = vld [vmem:[#allocation4_spill] sm:$0xff] }
 0x148   : > { %844 = vrot.lane.b32.xlu1 %v2623_v37, %s2418_s14  ;;  %842 = vrot.lane.b32.xlu0 %v2585_v22, %s2418_s14 }
 0x149   : > { %v3286_v43 = vpop.permute.xlu2 %748 }
 0x14a   : > { %4719 = vst [vmem:[#allocation109_spill] sm:$0xff] %v3286_v43  ;;  %v3288_v23 = vpop.permute.xlu1 %696  ;;  %v3290_v17 = vpop.permute.xlu0 %694  ;;  %v4727_v43 = vld [vmem:[#allocation11_spill] sm:$0xff] }
 0x14b   : > { %4720 = vst [vmem:[#allocation110_spill] sm:$0xff] %v3288_v23 }
 0x14c   : > { %4721 = vst [vmem:[#allocation111_spill] sm:$0xff] %v3290_v17  ;;  %v4728_v17 = vld [vmem:[#allocation12_spill] sm:$0xff] }
 0x14f   : > { %852 = vrot.lane.b32.xlu2 %v2651_v47, %s2418_s14  ;;  %v4729_v47 = vld [vmem:[#allocation7_spill] sm:$0xff] }
 0x150   : > { %850 = vrot.lane.b32.xlu1 %v4722_v32, %s2418_s14  ;;  %848 = vrot.lane.b32.xlu0 %v4723_v36, %s2418_s14 }
 0x151   : > { %v3298_v30 = vpop.permute.xlu2 %754 }
 0x152   : > { %4724 = vst [vmem:[#allocation112_spill] sm:$0xff] %v3298_v30  ;;  %v3300_v37 = vpop.permute.xlu1 %702  ;;  %v3302_v22 = vpop.permute.xlu0 %700  ;;  %v4733_v30 = vld [vmem:[#allocation14_spill] sm:$0xff] }
 0x153   : > { %4725 = vst [vmem:[#allocation113_spill] sm:$0xff] %v3300_v37  ;;  %v4735_v37 = vld [vmem:[#allocation10_spill] sm:$0xff] }
 0x154   : > { %4726 = vst [vmem:[#allocation114_spill] sm:$0xff] %v3302_v22  ;;  %v4734_v22 = vld [vmem:[#allocation15_spill] sm:$0xff] }
 0x157   : > { %858 = vrot.lane.b32.xlu2 %v4727_v43, %s2418_s14 }
 0x158   : > { %856 = vrot.lane.b32.xlu1 %v4728_v17, %s2418_s14  ;;  %854 = vrot.lane.b32.xlu0 %v4729_v47, %s2418_s14 }
 0x159   : > { %v3310_v23 = vpop.permute.xlu2 %760 }
 0x15a   : > { %4730 = vst [vmem:[#allocation12_spill] sm:$0xff] %v3310_v23  ;;  %v3312_v32 = vpop.permute.xlu1 %740  ;;  %v3314_v36 = vpop.permute.xlu0 %706  ;;  %v4739_v23 = vld [vmem:[#allocation17_spill] sm:$0xff] }
 0x15b   : > { %4731 = vst [vmem:[#allocation115_spill] sm:$0xff] %v3312_v32 }
 0x15c   : > { %4732 = vst [vmem:[#allocation116_spill] sm:$0xff] %v3314_v36  ;;  %v4740_v36 = vld [vmem:[#allocation18_spill] sm:$0xff] }
 0x15f   : > { %864 = vrot.lane.b32.xlu2 %v4733_v30, %s2418_s14  ;;  %v4741_v30 = vld [vmem:[#allocation13_spill] sm:$0xff] }
 0x160   : > { %862 = vrot.lane.b32.xlu1 %v4734_v22, %s2418_s14  ;;  %860 = vrot.lane.b32.xlu0 %v4735_v37, %s2418_s14 }
 0x161   : > { %v3322_v43 = vpop.permute.xlu2 %766 }
 0x162   : > { %4736 = vst [vmem:[#allocation117_spill] sm:$0xff] %v3322_v43  ;;  %v3324_v12 = vpop.permute.xlu1 %746  ;;  %v3326_v47 = vpop.permute.xlu0 %744 }
 0x163   : > { %4737 = vst [vmem:[#allocation118_spill] sm:$0xff] %v3324_v12 }
 0x164   : > { %4738 = vst [vmem:[#allocation119_spill] sm:$0xff] %v3326_v47  ;;  %v4746_v47 = vld [vmem:[#allocation21_spill] sm:$0xff] }
 0x167   : > { %870 = vrot.lane.b32.xlu2 %v4739_v23, %s2418_s14  ;;  %v4747_v23 = vld [vmem:[#allocation16_spill] sm:$0xff] }
 0x168   : > { %868 = vrot.lane.b32.xlu1 %v4740_v36, %s2418_s14  ;;  %866 = vrot.lane.b32.xlu0 %v4741_v30, %s2418_s14 }
 0x169   : > { %v3334_v32 = vpop.permute.xlu2 %772 }
 0x16a   : > { %4742 = vst [vmem:[#allocation120_spill] sm:$0xff] %v3334_v32  ;;  %v3336_v22 = vpop.permute.xlu1 %752  ;;  %v3338_v37 = vpop.permute.xlu0 %750 }
 0x16b   : > { %4743 = vst [vmem:[#allocation121_spill] sm:$0xff] %v3336_v22  ;;  %v4751_v22 = vld [vmem:[#allocation24_spill] sm:$0xff] }
 0x16c   : > { %4744 = vst [vmem:[#allocation122_spill] sm:$0xff] %v3338_v37  ;;  %v4752_v37 = vld [vmem:[#allocation25_spill] sm:$0xff] }
 0x16f   : > { %876 = vrot.lane.b32.xlu2 %v4745_v42, %s2418_s14  ;;  %v4753_v42 = vld [vmem:[#allocation19_spill] sm:$0xff] }
 0x170   : > { %874 = vrot.lane.b32.xlu1 %v4746_v47, %s2418_s14  ;;  %872 = vrot.lane.b32.xlu0 %v4747_v23, %s2418_s14 }
 0x171   : > { %v3346_v36 = vpop.permute.xlu2 %778 }
 0x172   : > { %4748 = vst [vmem:[#allocation16_spill] sm:$0xff] %v3346_v36  ;;  %v3348_v12 = vpop.permute.xlu1 %758  ;;  %v3350_v30 = vpop.permute.xlu0 %756  ;;  %v4757_v36 = vld [vmem:[#allocation28_spill] sm:$0xff] }
 0x173   : > { %4749 = vst [vmem:[#allocation123_spill] sm:$0xff] %v3348_v12 }
 0x174   : > { %4750 = vst [vmem:[#allocation124_spill] sm:$0xff] %v3350_v30 }
 0x177   : > { %882 = vrot.lane.b32.xlu2 %v4751_v22, %s2418_s14  ;;  %v4758_v22 = vld [vmem:[#allocation23_spill] sm:$0xff] }
 0x178   : > { %880 = vrot.lane.b32.xlu1 %v4752_v37, %s2418_s14  ;;  %878 = vrot.lane.b32.xlu0 %v4753_v42, %s2418_s14  ;;  %v3377_v42 = vld [vmem:[%s2496_s4 + $0x190] sm:$0x3] }
 0x179   : > { %v3358_v47 = vpop.permute.xlu2 %784 }
 0x17a   : > { %4754 = vst [vmem:[#allocation125_spill] sm:$0xff] %v3358_v47  ;;  %v3360_v35 = vpop.permute.xlu1 %764  ;;  %v3362_v32 = vpop.permute.xlu0 %762  ;;  %v525_v47 = vrot.slane %v3254_v44, 1 }
 0x17b   : > { %4755 = vst [vmem:[#allocation126_spill] sm:$0xff] %v3360_v35  ;;  %v4762_v35 = vld [vmem:[#allocation27_spill] sm:$0xff] }
 0x17c   : > { %4756 = vst [vmem:[#allocation127_spill] sm:$0xff] %v3362_v32  ;;  %v4761_v32 = vld [vmem:[#allocation32_spill] sm:$0xff] }
 0x17f   : > { %888 = vrot.lane.b32.xlu2 %v4757_v36, %s2418_s14 }
 0x180   : > { %886 = vrot.lane.b32.xlu1 %v2852_v59, %s2418_s14  ;;  %884 = vrot.lane.b32.xlu0 %v4758_v22, %s2418_s14  ;;  %v526_v22 = vrot.slane %v3251_v34, 1 }
 0x181   : > { %v3370_v12 = vpop.permute.xlu2 %790 }
 0x182   : > { %4759 = vst [vmem:[#allocation28_spill] sm:$0xff] %v3370_v12  ;;  %v3372_v30 = vpop.permute.xlu1 %770  ;;  %v3374_v37 = vpop.permute.xlu0 %768  ;;  %v528_v12 = vrot.slane %v3377_v42, 1 }
 0x183   : > { %4760 = vst [vmem:[#allocation128_spill] sm:$0xff] %v3374_v37 }
 0x187   : > { %894 = vrot.lane.b32.xlu2 %v2876_v61, %s2418_s14  ;;  %v3395_v61 = vsel %vm360_vm1, %v526_v22, %v528_v12 }
 0x188   : > { %892 = vrot.lane.b32.xlu1 %v4761_v32, %s2418_s14  ;;  %890 = vrot.lane.b32.xlu0 %v4762_v35, %s2418_s14  ;;  %4765 = vst [vmem:[#allocation131_spill] sm:$0xff] %v3395_v61  ;;  %v3398_v32 = vsel %vm360_vm1, %v525_v47, %v526_v22  ;;  %v4769_v22 = vld [vmem:[#allocation33_spill] sm:$0xff] }
 0x189   : > { %v3385_v59 = vpop.permute.xlu2 %796  ;;  %4766 = vst [vmem:[#allocation132_spill] sm:$0xff] %v3398_v32 }
 0x18a   : > { %4763 = vst [vmem:[#allocation129_spill] sm:$0xff] %v3385_v59  ;;  %v3390_v37 = vpop.permute.xlu1 %776  ;;  %v3392_v43 = vpop.permute.xlu0 %774 }
 0x18b   : > { %4764 = vst [vmem:[#allocation130_spill] sm:$0xff] %v3392_v43 }
 0x18f   : > { %932 = vrot.lane.b32.xlu2 %v2894_v11, %s2419_s22 }
 0x190   : > { %898 = vrot.lane.b32.xlu1 %v3395_v61, %s2418_s14  ;;  %896 = vrot.lane.b32.xlu0 %v3398_v32, %s2418_s14  ;;  %v4772_v61 = vld [vmem:[#allocation40_spill] sm:$0xff]  ;;  %v4773_v32 = vld [vmem:[#allocation35_spill] sm:$0xff] }
 0x191   : > { %v3406_v59 = vpop.permute.xlu2 %802 }
 0x192   : > { %4767 = vst [vmem:[#allocation133_spill] sm:$0xff] %v3406_v59  ;;  %v3408_v35 = vpop.permute.xlu1 %782  ;;  %v3410_v43 = vpop.permute.xlu0 %780 }
 0x193   : > { %4768 = vst [vmem:[#allocation134_spill] sm:$0xff] %v3410_v43 }
 0x197   : > { %938 = vrot.lane.b32.xlu2 %v2913_v10, %s2419_s22 }
 0x198   : > { %936 = vrot.lane.b32.xlu1 %v2916_v48, %s2419_s22  ;;  %934 = vrot.lane.b32.xlu0 %v4769_v22, %s2419_s22 }
 0x199   : > { %v3418_v47 = vpop.permute.xlu2 %840 }
 0x19a   : > { %4770 = vst [vmem:[#allocation33_spill] sm:$0xff] %v3418_v47  ;;  %v3420_v11 = vpop.permute.xlu1 %788  ;;  %v3422_v12 = vpop.permute.xlu0 %786  ;;  %v4776_v47 = vld [vmem:[#allocation43_spill] sm:$0xff] }
 0x19b   : > { %4771 = vst [vmem:[#allocation135_spill] sm:$0xff] %v3422_v12  ;;  %v4777_v12 = vld [vmem:[#allocation44_spill] sm:$0xff] }
 0x19f   : > { %944 = vrot.lane.b32.xlu2 %v2934_v45, %s2419_s22  ;;  %v4778_v45 = vld [vmem:[#allocation38_spill] sm:$0xff] }
 0x1a0   : > { %942 = vrot.lane.b32.xlu1 %v4772_v61, %s2419_s22  ;;  %940 = vrot.lane.b32.xlu0 %v4773_v32, %s2419_s22 }
 0x1a1   : > { %v3430_v59 = vpop.permute.xlu2 %846 }
 0x1a2   : > { %4774 = vst [vmem:[#allocation136_spill] sm:$0xff] %v3430_v59  ;;  %v3432_v10 = vpop.permute.xlu1 %794  ;;  %v3434_v22 = vpop.permute.xlu0 %792 }
 0x1a3   : > { %4775 = vst [vmem:[#allocation137_spill] sm:$0xff] %v3434_v22 }
 0x1a7   : > { %950 = vrot.lane.b32.xlu2 %v4776_v47, %s2419_s22  ;;  %v4781_v47 = vld [vmem:[#allocation42_spill] sm:$0xff] }
 0x1a8   : > { %948 = vrot.lane.b32.xlu1 %v4777_v12, %s2419_s22  ;;  %946 = vrot.lane.b32.xlu0 %v4778_v45, %s2419_s22 }
 0x1a9   : > { %v3442_v43 = vpop.permute.xlu2 %852 }
 0x1aa   : > { %4779 = vst [vmem:[#allocation138_spill] sm:$0xff] %v3442_v43  ;;  %v3444_v61 = vpop.permute.xlu1 %800  ;;  %v3446_v32 = vpop.permute.xlu0 %798  ;;  %v4784_v43 = vld [vmem:[#allocation56_spill] sm:$0xff] }
 0x1ab   : > { %4780 = vst [vmem:[#allocation139_spill] sm:$0xff] %v3446_v32 }
 0x1af   : > { %956 = vrot.lane.b32.xlu2 %v2981_v60, %s2419_s22  ;;  %v4785_v60 = vld [vmem:[#allocation48_spill] sm:$0xff] }
 0x1b0   : > { %954 = vrot.lane.b32.xlu1 %v2984_v5, %s2419_s22  ;;  %952 = vrot.lane.b32.xlu0 %v4781_v47, %s2419_s22 }
 0x1b1   : > { %v3454_v59 = vpop.permute.xlu2 %858 }
 0x1b2   : > { %4782 = vst [vmem:[#allocation42_spill] sm:$0xff] %v3454_v59  ;;  %v3456_v12 = vpop.permute.xlu1 %838  ;;  %v3458_v45 = vpop.permute.xlu0 %836 }
 0x1b3   : > { %4783 = vst [vmem:[#allocation140_spill] sm:$0xff] %v3458_v45  ;;  %v4792_v45 = vld [vmem:[#allocation60_spill] sm:$0xff] }
 0x1b7   : > { %962 = vrot.lane.b32.xlu2 %v3007_v33, %s2419_s22  ;;  %v4788_v33 = vld [vmem:[#allocation54_spill] sm:$0xff] }
 0x1b8   : > { %960 = vrot.lane.b32.xlu1 %v4784_v43, %s2419_s22  ;;  %958 = vrot.lane.b32.xlu0 %v4785_v60, %s2419_s22 }
 0x1b9   : > { %v3466_v32 = vpop.permute.xlu2 %864 }
 0x1ba   : > { %v3468_v22 = vpop.permute.xlu1 %844  ;;  %v3470_v5 = vpop.permute.xlu0 %842 }
 0x1bb   : > { %4786 = vst [vmem:[#allocation141_spill] sm:$0xff] %v3468_v22 }
 0x1bc   : > { %4787 = vst [vmem:[#allocation142_spill] sm:$0xff] %v3470_v5  ;;  %v4791_v5 = vld [vmem:[#allocation67_spill] sm:$0xff] }
 0x1bf   : > { %968 = vrot.lane.b32.xlu2 %v3032_v8, %s2419_s22 }
 0x1c0   : > { %966 = vrot.lane.b32.xlu1 %v3035_v9, %s2419_s22  ;;  %964 = vrot.lane.b32.xlu0 %v4788_v33, %s2419_s22 }
 0x1c1   : > { %v3478_v59 = vpop.permute.xlu2 %870 }
 0x1c2   : > { %v3480_v43 = vpop.permute.xlu1 %850  ;;  %v3482_v60 = vpop.permute.xlu0 %848 }
 0x1c3   : > { %4789 = vst [vmem:[#allocation143_spill] sm:$0xff] %v3480_v43 }
 0x1c4   : > { %4790 = vst [vmem:[#allocation144_spill] sm:$0xff] %v3482_v60 }
 0x1c7   : > { %974 = vrot.lane.b32.xlu2 %v3058_v13, %s2419_s22  ;;  %v4795_v13 = vld [vmem:[#allocation65_spill] sm:$0xff] }
 0x1c8   : > { %972 = vrot.lane.b32.xlu1 %v4791_v5, %s2419_s22  ;;  %970 = vrot.lane.b32.xlu0 %v4792_v45, %s2419_s22 }
 0x1c9   : > { %v3490_v22 = vpop.permute.xlu2 %876 }
 0x1ca   : > { %v3492_v9 = vpop.permute.xlu1 %856  ;;  %v3494_v33 = vpop.permute.xlu0 %854 }
 0x1cb   : > { %4793 = vst [vmem:[#allocation60_spill] sm:$0xff] %v3492_v9  ;;  %v531_v9 = vrot.slane %v3251_v34, 2 }
 0x1cc   : > { %4794 = vst [vmem:[#allocation145_spill] sm:$0xff] %v3494_v33  ;;  %v530_v33 = vrot.slane %v3254_v44, 2 }
 0x1cf   : > { %980 = vrot.lane.b32.xlu2 %v3083_v16, %s2419_s22  ;;  %v4798_v16 = vld [vmem:[#allocation71_spill] sm:$0xff] }
 0x1d0   : > { %978 = vrot.lane.b32.xlu1 %v3086_v28, %s2419_s22  ;;  %976 = vrot.lane.b32.xlu0 %v4795_v13, %s2419_s22 }
 0x1d1   : > { %v3502_v60 = vpop.permute.xlu2 %882 }
 0x1d2   : > { %4796 = vst [vmem:[#allocation146_spill] sm:$0xff] %v3502_v60  ;;  %v3504_v43 = vpop.permute.xlu1 %862  ;;  %v3506_v5 = vpop.permute.xlu0 %860 }
 0x1d3   : > { %4797 = vst [vmem:[#allocation147_spill] sm:$0xff] %v3506_v5  ;;  %v3521_v5 = vsel %vm441_vm2, %v530_v33, %v531_v9 }
 0x1d4   : > { %4800 = vst [vmem:[#allocation149_spill] sm:$0xff] %v3521_v5 }
 0x1d7   : > { %986 = vrot.lane.b32.xlu2 %v3109_v41, %s2419_s22 }
 0x1d8   : > { %984 = vrot.lane.b32.xlu1 %v3112_v52, %s2419_s22  ;;  %982 = vrot.lane.b32.xlu0 %v4798_v16, %s2419_s22  ;;  %v533_v16 = vrot.slane %v3377_v42, 2 }
 0x1d9   : > { %v3516_v28 = vpop.permute.xlu2 %888 }
 0x1da   : > { %4799 = vst [vmem:[#allocation148_spill] sm:$0xff] %v3516_v28  ;;  %v3518_v13 = vpop.permute.xlu1 %868  ;;  %v867_v60 = vpop.permute.xlu0 %866  ;;  %v3535_v41 = vsel %vm441_vm2, %v531_v9, %v533_v16  ;;  %v1332_v16 = vsel %vm1316_vm3, %v2660_v50, %v3103_v39 }
 0x1db   : > { %4801 = vst [vmem:[#allocation150_spill] sm:$0xff] %v3535_v41 }
 0x1df   : > { %992 = vrot.lane.b32.xlu2 %v3521_v5, %s2419_s22 }
 0x1e0   : > { %990 = vrot.lane.b32.xlu1 %v3128_v56, %s2419_s22  ;;  %988 = vrot.lane.b32.xlu0 %v3106_v15, %s2419_s22 }
 0x1e1   : > { %v3529_v34 = vpop.permute.xlu2 %894 }
 0x1e2   : > { %v3532_v44 = vpop.permute.xlu1 %874  ;;  %v873_v28 = vpop.permute.xlu0 %872 }
 0x1e7   : > { %1030 = vrot.lane.b32.xlu2 %v2540_v2, %s2420_s23 }
 0x1e8   : > { %1028 = vrot.lane.b32.xlu1 %v2537_v1, %s2420_s23  ;;  %994 = vrot.lane.b32.xlu0 %v3535_v41, %s2419_s22 }
 0x1e9   : > { %v3543_v33 = vpop.permute.xlu2 %932 }
 0x1ea   : > { %v3545_v5 = vpop.permute.xlu1 %880  ;;  %v879_v42 = vpop.permute.xlu0 %878 }
 0x1ef   : > { %1036 = vrot.lane.b32.xlu2 %v2592_v25, %s2420_s23 }
 0x1f0   : > { %1034 = vrot.lane.b32.xlu1 %v2598_v27, %s2420_s23  ;;  %1032 = vrot.lane.b32.xlu0 %v2604_v29, %s2420_s23 }
 0x1f1   : > { %v3553_v2 = vpop.permute.xlu2 %938 }
 0x1f2   : > { %v3555_v1 = vpop.permute.xlu1 %886  ;;  %v3557_v9 = vpop.permute.xlu0 %884 }
 0x1f7   : > { %1042 = vrot.lane.b32.xlu2 %v2626_v38, %s2420_s23 }
 0x1f8   : > { %1040 = vrot.lane.b32.xlu1 %v2632_v40, %s2420_s23  ;;  %1038 = vrot.lane.b32.xlu0 %v2595_v26, %s2420_s23 }
 0x1f9   : > { %v3565_v25 = vpop.permute.xlu2 %944 }
 0x1fa   : > { %v3567_v27 = vpop.permute.xlu1 %892  ;;  %v3569_v29 = vpop.permute.xlu0 %890 }
 0x1ff   : > { %1048 = vrot.lane.b32.xlu2 %v2657_v49, %s2420_s23 }
 0x200   : > { %1046 = vrot.lane.b32.xlu1 %v2663_v51, %s2420_s23  ;;  %1044 = vrot.lane.b32.xlu0 %v2669_v53, %s2420_s23 }
 0x201   : > { %v3577_v38 = vpop.permute.xlu2 %950 }
 0x202   : > { %v3579_v40 = vpop.permute.xlu1 %898  ;;  %v3581_v26 = vpop.permute.xlu0 %896 }
 0x207   : > { %1054 = vrot.lane.b32.xlu2 %v2692_v62, %s2420_s23  ;;  %v1365_v62 = vsel %vm1349_vm4, %v1332_v16, %v3196_v6 }
 0x208   : > { %1052 = vrot.lane.b32.xlu1 %v2698_v0, %s2420_s23  ;;  %1050 = vrot.lane.b32.xlu0 %v2660_v50, %s2420_s23  ;;  %v1398_v0 = vsel %vm1382_vm5, %v1365_v62, %v3372_v30  ;;  %v1335_v30 = vsel %vm1316_vm3, %v2735_v31, %v3125_v58 }
 0x209   : > { %v3589_v49 = vpop.permute.xlu2 %956  ;;  %v1431_v50 = vsel %vm1415_vm6, %v1398_v0, %v867_v60 }
 0x20a   : > { %v3591_v51 = vpop.permute.xlu1 %936  ;;  %v3593_v53 = vpop.permute.xlu0 %934 }
 0x20f   : > { %1060 = vrot.lane.b32.xlu2 %v2723_v20, %s2420_s23 }
 0x210   : > { %1058 = vrot.lane.b32.xlu1 %v2729_v24, %s2420_s23  ;;  %1056 = vrot.lane.b32.xlu0 %v2735_v31, %s2420_s23  ;;  %v1368_v24 = vsel %vm1349_vm4, %v1335_v30, %v3208_v46 }
 0x211   : > { %v963_v39 = vpop.permute.xlu2 %962  ;;  %v1401_v60 = vsel %vm1382_vm5, %v1368_v24, %v3390_v37  ;;  %v1338_v37 = vsel %vm1316_vm3, %v2726_v21, %v3140_v19 }
 0x212   : > { %v3609_v41 = vpop.permute.xlu1 %942  ;;  %v3612_v6 = vsel %vm1448_vm7, %v1431_v50, %v963_v39  ;;  %v3614_v20 = vpop.permute.xlu0 %940  ;;  %v1434_v16 = vsel %vm1415_vm6, %v1401_v60, %v873_v28  ;;  %v4802_v50 = vld [vmem:[#allocation51_spill] sm:$0xff]  ;;  %v2329_v39 = vld [vmem:[%s2496_s4 + $0x98] sm:$0xff]  ;;  %v4805_v60 = vld [vmem:[#allocation128_spill] sm:$0xff] }
 0x217   : > { %1076 = vrot.lane.b32.xlu2 %v2830_v18, %s2420_s23  ;;  %v1371_v18 = vsel %vm1349_vm4, %v1338_v37, %v3220_v3 }
 0x218   : > { %1064 = vrot.lane.b32.xlu1 %v2764_v57, %s2420_s23  ;;  %1062 = vrot.lane.b32.xlu0 %v2726_v21, %s2420_s23  ;;  %v1404_v57 = vsel %vm1382_vm5, %v1371_v18, %v3408_v35  ;;  %v1341_v35 = vsel %vm1316_vm3, %v2801_v7, %v3152_v54 }
 0x219   : > { %v969_v62 = vpop.permute.xlu2 %968  ;;  %v1437_v21 = vsel %vm1415_vm6, %v1404_v57, %v879_v42  ;;  %v1374_v30 = vsel %vm1349_vm4, %v1341_v35, %v3232_v55  ;;  %v4804_v55 = vld [vmem:[#allocation117_spill] sm:$0xff]  ;;  %v2330_v35 = vld [vmem:[%s2496_s4 + $0xc8] sm:$0xff] }
 0x21a   : > { %v3630_v0 = vpop.permute.xlu1 %948  ;;  %v3633_v31 = vsel %vm1448_vm7, %v1434_v16, %v969_v62  ;;  %v3635_v58 = vpop.permute.xlu0 %946  ;;  %v1407_v54 = vsel %vm1382_vm5, %v1374_v30, %v3420_v11 }
 0x21f   : > { %1252 = vrot.lane.b32.xlu2 %v3032_v8, %s2421_s24  ;;  %v2328_v8 = vld [vmem:[%s2496_s4 + $0xa8] sm:$0xff] }
 0x220   : > { %1172 = vrot.lane.b32.xlu1 %v4757_v36, %s2422_s25  ;;  %1156 = vrot.lane.b32.xlu0 %v4747_v23, %s2422_s25  ;;  %v1331_v36 = vsel %vm1316_vm3, %v2328_v8, %v4802_v50  ;;  %v4803_v23 = vld [vmem:[#allocation69_spill] sm:$0xff]  ;;  %v4809_v50 = vld [vmem:[#allocation75_spill] sm:$0xff] }
 0x221   : > { %v975_v28 = vpop.permute.xlu2 %974  ;;  %v1330_v42 = vsel %vm1316_vm3, %v2329_v39, %v4803_v23  ;;  %v1364_v24 = vsel %vm1349_vm4, %v1331_v36, %v3234_v4  ;;  %v4810_v39 = vld [vmem:[#allocation98_spill] sm:$0xff] }
 0x222   : > { %v3651_v19 = vpop.permute.xlu1 %954  ;;  %v3654_v3 = vsel %vm1448_vm7, %v1437_v21, %v975_v28  ;;  %v3656_v46 = vpop.permute.xlu0 %952  ;;  %v1363_v7 = vsel %vm1349_vm4, %v1330_v42, %v3236_v63  ;;  %v1397_v4 = vsel %vm1382_vm5, %v1364_v24, %v4805_v60  ;;  %v1440_v63 = vsel %vm1415_vm6, %v1407_v54, %v3557_v9  ;;  %v4806_v21 = vld [vmem:[#allocation85_spill] sm:$0xff]  ;;  %v4807_v9 = vld [vmem:[#allocation22_spill] sm:$0xff]  ;;  %v4811_v42 = vld [vmem:[#allocation99_spill] sm:$0xff] }
 0x223   : > { %v1430_v11 = vsel %vm1415_vm6, %v1397_v4, %v3466_v32  ;;  %v1344_v28 = vsel %vm1316_vm3, %v4807_v9, %v4806_v21  ;;  %v4808_v32 = vld [vmem:[#allocation57_spill] sm:$0xff]  ;;  %v4812_v24 = vld [vmem:[#allocation100_spill] sm:$0xff]  ;;  %v4815_v60 = vld [vmem:[#allocation130_spill] sm:$0xff] }
 0x224   : > { %v1334_v8 = vsel %vm1316_vm3, %v2330_v35, %v4808_v32  ;;  %v1377_v23 = vsel %vm1349_vm4, %v1344_v28, %v4810_v39  ;;  %v4816_v9 = vld [vmem:[#allocation88_spill] sm:$0xff]  ;;  %v2332_v35 = vld [vmem:[%s2496_s4 + $0xf0] sm:$0xff] }
 0x225   : > { %v1367_v30 = vsel %vm1349_vm4, %v1334_v8, %v4811_v42  ;;  %v1410_v54 = vsel %vm1382_vm5, %v1377_v23, %v3432_v10  ;;  %v4819_v8 = vld [vmem:[#allocation78_spill] sm:$0xff]  ;;  %v4821_v39 = vld [vmem:[#allocation104_spill] sm:$0xff]  ;;  %v4822_v42 = vld [vmem:[#allocation105_spill] sm:$0xff] }
 0x226   : > { %v1400_v4 = vsel %vm1382_vm5, %v1367_v30, %v4815_v60 }
 0x227   : > { %1140 = vrot.lane.b32.xlu2 %v4728_v17, %s2422_s25  ;;  %v1396_v17 = vsel %vm1382_vm5, %v1363_v7, %v4804_v55  ;;  %v4813_v55 = vld [vmem:[#allocation26_spill] sm:$0xff]  ;;  %v1433_v10 = vsel %vm1415_vm6, %v1400_v4, %v3478_v59 }
 0x228   : > { %1124 = vrot.lane.b32.xlu1 %v2564_v14, %s2422_s25  ;;  %1268 = vrot.lane.b32.xlu0 %v3112_v52, %s2421_s24  ;;  %v1429_v14 = vsel %vm1415_vm6, %v1396_v17, %v3504_v43  ;;  %v2331_v43 = vld [vmem:[%s2496_s4 + $0xc0] sm:$0xff]  ;;  %v4814_v17 = vld [vmem:[#allocation120_spill] sm:$0xff]  ;;  %v4818_v59 = vld [vmem:[#allocation62_spill] sm:$0xff] }
 0x229   : > { %v981_v16 = vpop.permute.xlu2 %980  ;;  %v1333_v36 = vsel %vm1316_vm3, %v2331_v43, %v4809_v50  ;;  %v1337_v32 = vsel %vm1316_vm3, %v2332_v35, %v4818_v59  ;;  %v4820_v50 = vld [vmem:[#allocation103_spill] sm:$0xff]  ;;  %v3790_v35 = vld [vmem:[%s2496_s4 + $0x110] sm:$0xff] }
 0x22a   : > { %v961_v62 = vpop.permute.xlu1 %960  ;;  %v3692_v37 = vsel %vm1448_vm7, %v1440_v63, %v981_v16  ;;  %v959_v52 = vpop.permute.xlu0 %958  ;;  %v1366_v7 = vsel %vm1349_vm4, %v1333_v36, %v4812_v24  ;;  %v1443_v63 = vsel %vm1415_vm6, %v1410_v54, %v3569_v29  ;;  %v4817_v29 = vld [vmem:[#allocation30_spill] sm:$0xff]  ;;  %v1370_v23 = vsel %vm1349_vm4, %v1337_v32, %v4821_v39  ;;  %v4824_v54 = vld [vmem:[#allocation21_spill] sm:$0xff]  ;;  %v2336_v32 = vld [vmem:[%s2496_s4 + $0x108] sm:$0xff] }
 0x22b   : > { %v3695_v18 = vsel %vm1448_vm7, %v1430_v11, %v961_v62  ;;  %v3698_v57 = vsel %vm1448_vm7, %v1429_v14, %v959_v52  ;;  %v1347_v28 = vsel %vm1316_vm3, %v4817_v29, %v4816_v9  ;;  %v2334_v9 = vld [vmem:[%s2496_s4 + $0x8] sm:$0xff]  ;;  %v4833_v39 = vld [vmem:[#allocation107_spill] sm:$0xff] }
 0x22c   : > { %v1380_v36 = vsel %vm1349_vm4, %v1347_v28, %v4820_v50  ;;  %v4828_v28 = vld [vmem:[#allocation91_spill] sm:$0xff] }
 0x22d   : > { %v1413_v24 = vsel %vm1382_vm5, %v1380_v36, %v3444_v61  ;;  %v4832_v36 = vld [vmem:[#allocation11_spill] sm:$0xff] }
 0x22e   : > { %v1446_v60 = vsel %vm1415_vm6, %v1413_v24, %v3581_v26  ;;  %v4827_v26 = vld [vmem:[#allocation53_spill] sm:$0xff] }
 0x22f   : > { %1236 = vrot.lane.b32.xlu2 %v4781_v47, %s2421_s24  ;;  %v1399_v47 = vsel %vm1382_vm5, %v1366_v7, %v4814_v17  ;;  %v4823_v7 = vld [vmem:[#allocation27_spill] sm:$0xff]  ;;  %v4826_v17 = vld [vmem:[#allocation134_spill] sm:$0xff]  ;;  %v1318_v29 = vsel %vm1316_vm3, %v2334_v9, %v4827_v26 }
 0x230   : > { %1220 = vrot.lane.b32.xlu1 %v2916_v48, %s2421_s24  ;;  %1078 = vrot.lane.b32.xlu0 %v4813_v55, %s2420_s23  ;;  %v1432_v48 = vsel %vm1415_vm6, %v1399_v47, %v3518_v13  ;;  %v2333_v13 = vld [vmem:[%s2496_s4 + $0xe0] sm:$0xff]  ;;  %v4825_v55 = vld [vmem:[#allocation16_spill] sm:$0xff]  ;;  %v1403_v47 = vsel %vm1382_vm5, %v1370_v23, %v4826_v17 }
 0x231   : > { %v987_v16 = vpop.permute.xlu2 %986  ;;  %v1336_v43 = vsel %vm1316_vm3, %v2333_v13, %v4819_v8  ;;  %v1436_v61 = vsel %vm1415_vm6, %v1403_v47, %v3490_v22  ;;  %v1351_v22 = vsel %vm1349_vm4, %v1318_v29, %v4828_v28  ;;  %v4830_v13 = vld [vmem:[#allocation80_spill] sm:$0xff]  ;;  %v4838_v17 = vld [vmem:[#allocation135_spill] sm:$0xff]  ;;  %v4840_v28 = vld [vmem:[#allocation34_spill] sm:$0xff] }
 0x232   : > { %v967_v11 = vpop.permute.xlu1 %966  ;;  %v3734_v14 = vsel %vm1448_vm7, %v1443_v63, %v987_v16  ;;  %v965_v62 = vpop.permute.xlu0 %964  ;;  %v1369_v30 = vsel %vm1349_vm4, %v1336_v43, %v4822_v42  ;;  %v1339_v8 = vsel %vm1316_vm3, %v2336_v32, %v4830_v13  ;;  %v4831_v43 = vld [vmem:[#allocation106_spill] sm:$0xff]  ;;  %v4834_v42 = vld [vmem:[#allocation108_spill] sm:$0xff] }
 0x233   : > { %v3737_v52 = vsel %vm1448_vm7, %v1433_v10, %v967_v11  ;;  %v3740_v21 = vsel %vm1448_vm7, %v1432_v48, %v965_v62  ;;  %v1384_v50 = vsel %vm1382_vm5, %v1351_v22, %v4831_v43  ;;  %v4842_v32 = vld [vmem:[#allocation74_spill] sm:$0xff] }
 0x234   : > { %v1417_v24 = vsel %vm1415_vm6, %v1384_v50, %v3456_v12  ;;  %v4843_v43 = vld [vmem:[#allocation82_spill] sm:$0xff] }
 0x237   : > { %1254 = vrot.lane.b32.xlu2 %v4792_v45, %s2421_s24  ;;  %v1402_v45 = vsel %vm1382_vm5, %v1369_v30, %v4825_v55  ;;  %v1372_v30 = vsel %vm1349_vm4, %v1339_v8, %v4834_v42  ;;  %v4837_v55 = vld [vmem:[#allocation125_spill] sm:$0xff]  ;;  %v3843_v8 = vld [vmem:[%s2496_s4 + $0x128] sm:$0xff]  ;;  %v4846_v42 = vld [vmem:[#allocation110_spill] sm:$0xff] }
 0x238   : > { %1174 = vrot.lane.b32.xlu1 %v4823_v7, %s2422_s25  ;;  %1158 = vrot.lane.b32.xlu0 %v4824_v54, %s2422_s25  ;;  %v1435_v63 = vsel %vm1415_vm6, %v1402_v45, %v3532_v44  ;;  %v4829_v44 = vld [vmem:[#allocation68_spill] sm:$0xff]  ;;  %v4835_v7 = vld [vmem:[#allocation3_spill] sm:$0xff]  ;;  %v1405_v45 = vsel %vm1382_vm5, %v1372_v30, %v4837_v55  ;;  %v1342_v50 = vsel %vm1316_vm3, %v3843_v8, %v4843_v43 }
 0x239   : > { %v993_v4 = vpop.permute.xlu2 %992  ;;  %v1340_v59 = vsel %vm1316_vm3, %v3790_v35, %v4829_v44  ;;  %v4836_v54 = vld [vmem:[#allocation76_spill] sm:$0xff]  ;;  %v4841_v44 = vld [vmem:[#allocation93_spill] sm:$0xff] }
 0x23a   : > { %v973_v16 = vpop.permute.xlu1 %972  ;;  %v3776_v10 = vsel %vm1448_vm7, %v1446_v60, %v993_v4  ;;  %v971_v48 = vpop.permute.xlu0 %970  ;;  %v1373_v23 = vsel %vm1349_vm4, %v1340_v59, %v4833_v39  ;;  %v1450_v60 = vsel %vm1448_vm7, %v1417_v24, %v3593_v53  ;;  %v2337_v53 = vld [vmem:[%s2496_s4 + $0x30] sm:$0xff]  ;;  %v4847_v24 = vld [vmem:[#allocation111_spill] sm:$0xff] }
 0x23b   : > { %v3779_v11 = vsel %vm1448_vm7, %v1436_v61, %v973_v16  ;;  %v3782_v62 = vsel %vm1448_vm7, %v1435_v63, %v971_v48  ;;  %v1406_v47 = vsel %vm1382_vm5, %v1373_v23, %v4838_v17  ;;  %v4839_v61 = vld [vmem:[#allocation146_spill] sm:$0xff]  ;;  %v1438_v63 = vsel %vm1415_vm6, %v1405_v45, %v3545_v5  ;;  %v4849_v45 = vld [vmem:[#allocation36_spill] sm:$0xff] }
 0x23c   : > { %v1439_v12 = vsel %vm1415_vm6, %v1406_v47, %v4839_v61  ;;  %v1321_v22 = vsel %vm1316_vm3, %v2337_v53, %v4840_v28  ;;  %v3837_v5 = vld [vmem:[%s2496_s4 + $0x138] sm:$0xff]  ;;  %v2340_v17 = vld [vmem:[%s2496_s4 + $0x168] sm:$0xff] }
 0x23d   : > { %v1354_v59 = vsel %vm1349_vm4, %v1321_v22, %v4841_v44  ;;  %v1343_v13 = vsel %vm1316_vm3, %v3837_v5, %v4842_v32  ;;  %v4845_v23 = vld [vmem:[#allocation50_spill] sm:$0xff]  ;;  %v4850_v47 = vld [vmem:[#allocation28_spill] sm:$0xff] }
 0x23e   : > { %v1376_v30 = vsel %vm1349_vm4, %v1343_v13, %v4846_v42  ;;  %v2341_v13 = vld [vmem:[%s2496_s4 + $0x50] sm:$0xff] }
 0x23f   : > { %1142 = vrot.lane.b32.xlu2 %v4832_v36, %s2422_s25  ;;  %v4844_v36 = vld [vmem:[#allocation109_spill] sm:$0xff] }
 0x240   : > { %1126 = vrot.lane.b32.xlu1 %v4835_v7, %s2422_s25  ;;  %1270 = vrot.lane.b32.xlu0 %v4836_v54, %s2421_s24  ;;  %v1387_v39 = vsel %vm1382_vm5, %v1354_v59, %v4844_v36  ;;  %v1375_v7 = vsel %vm1349_vm4, %v1342_v50, %v4847_v24  ;;  %v4848_v54 = vld [vmem:[#allocation141_spill] sm:$0xff]  ;;  %v4854_v50 = vld [vmem:[#allocation95_spill] sm:$0xff] }
 0x241   : > { %v1031_v4 = vpop.permute.xlu2 %1030  ;;  %v1420_v55 = vsel %vm1415_vm6, %v1387_v39, %v4848_v54  ;;  %v2342_v39 = vld [vmem:[%s2496_s4 + $0x158] sm:$0xff]  ;;  %v2343_v42 = vld [vmem:[%s2496_s4 + $0x150] sm:$0xff] }
 0x242   : > { %v979_v16 = vpop.permute.xlu1 %978  ;;  %v3823_v48 = vsel %vm1481_vm8, %v1450_v60, %v1031_v4  ;;  %v977_v9 = vpop.permute.xlu0 %976  ;;  %v1408_v60 = vsel %vm1382_vm5, %v1375_v7, %v4850_v47  ;;  %v4851_v4 = vld [vmem:[#allocation137_spill] sm:$0xff]  ;;  %v4857_v7 = vld [vmem:[#allocation112_spill] sm:$0xff]  ;;  %v4860_v47 = vld [vmem:[#allocation114_spill] sm:$0xff] }
 0x243   : > { %v3826_v26 = vsel %vm1448_vm7, %v1439_v12, %v979_v16  ;;  %v3829_v29 = vsel %vm1448_vm7, %v1438_v63, %v977_v9  ;;  %v1409_v61 = vsel %vm1382_vm5, %v1376_v30, %v4851_v4  ;;  %v1453_v12 = vsel %vm1448_vm7, %v1420_v55, %v3614_v20  ;;  %v4852_v16 = vld [vmem:[#allocation148_spill] sm:$0xff]  ;;  %v4853_v20 = vld [vmem:[#allocation58_spill] sm:$0xff]  ;;  %v4858_v55 = vld [vmem:[#allocation67_spill] sm:$0xff] }
 0x244   : > { %v1442_v9 = vsel %vm1415_vm6, %v1409_v61, %v4852_v16  ;;  %v1441_v53 = vsel %vm1415_vm6, %v1408_v60, %v3555_v1  ;;  %v1324_v43 = vsel %vm1316_vm3, %v2341_v13, %v4853_v20  ;;  %v4855_v1 = vld [vmem:[#allocation77_spill] sm:$0xff]  ;;  %v4856_v30 = vld [vmem:[#allocation84_spill] sm:$0xff]  ;;  %v4861_v4 = vld [vmem:[#allocation143_spill] sm:$0xff] }
 0x245   : > { %v1357_v36 = vsel %vm1349_vm4, %v1324_v43, %v4854_v50  ;;  %v1345_v24 = vsel %vm1316_vm3, %v2343_v42, %v4856_v30  ;;  %v4864_v16 = vld [vmem:[#allocation129_spill] sm:$0xff]  ;;  %v2344_v42 = vld [vmem:[%s2496_s4 + $0x78] sm:$0xff] }
 0x246   : > { %v1390_v54 = vsel %vm1382_vm5, %v1357_v36, %v4857_v7  ;;  %v1378_v60 = vsel %vm1349_vm4, %v1345_v24, %v4860_v47  ;;  %v2345_v24 = vld [vmem:[%s2496_s4] sm:$0xff] }
 0x247   : > { %1238 = vrot.lane.b32.xlu2 %v4845_v23, %s2421_s24  ;;  %v1346_v23 = vsel %vm1316_vm3, %v2342_v39, %v4855_v1  ;;  %v1423_v61 = vsel %vm1415_vm6, %v1390_v54, %v4861_v4  ;;  %v4870_v47 = vld [vmem:[#allocation87_spill] sm:$0xff]  ;;  %v4871_v4 = vld [vmem:[#allocation12_spill] sm:$0xff] }
 0x248   : > { %1222 = vrot.lane.b32.xlu1 %v4849_v45, %s2421_s24  ;;  %1080 = vrot.lane.b32.xlu0 %v2340_v17, %s2420_s23  ;;  %v4859_v45 = vld [vmem:[#allocation113_spill] sm:$0xff] }
 0x249   : > { %v1037_v63 = vpop.permute.xlu2 %1036  ;;  %v1379_v17 = vsel %vm1349_vm4, %v1346_v23, %v4859_v45 }
 0x24a   : > { %v985_v28 = vpop.permute.xlu1 %984  ;;  %v3873_v22 = vsel %vm1481_vm8, %v1453_v12, %v1037_v63  ;;  %v983_v44 = vpop.permute.xlu0 %982  ;;  %v4862_v12 = vld [vmem:[#allocation32_spill] sm:$0xff] }
 0x24b   : > { %v3876_v59 = vsel %vm1448_vm7, %v1442_v9, %v985_v28  ;;  %v3879_v32 = vsel %vm1448_vm7, %v1441_v53, %v983_v44  ;;  %v4863_v63 = vld [vmem:[#allocation20_spill] sm:$0xff]  ;;  %v1411_v9 = vsel %vm1382_vm5, %v1378_v60, %v4864_v16  ;;  %v4865_v53 = vld [vmem:[#allocation139_spill] sm:$0xff]  ;;  %v1456_v44 = vsel %vm1448_vm7, %v1423_v61, %v3635_v58 }
 0x24c   : > { %v1412_v28 = vsel %vm1382_vm5, %v1379_v17, %v4865_v53  ;;  %v1444_v43 = vsel %vm1415_vm6, %v1411_v9, %v3567_v27  ;;  %v4866_v58 = vld [vmem:[#allocation63_spill] sm:$0xff]  ;;  %v4868_v27 = vld [vmem:[#allocation97_spill] sm:$0xff]  ;;  %v4874_v9 = vld [vmem:[#allocation116_spill] sm:$0xff] }
 0x24d   : > { %v1445_v20 = vsel %vm1415_vm6, %v1412_v28, %v3529_v34  ;;  %v1327_v30 = vsel %vm1316_vm3, %v2344_v42, %v4866_v58  ;;  %v4867_v34 = vld [vmem:[#allocation47_spill] sm:$0xff]  ;;  %v2346_v17 = vld [vmem:[%s2496_s4 + $0x170] sm:$0xff]  ;;  %v4875_v28 = vld [vmem:[#allocation60_spill] sm:$0xff] }
 0x24e   : > { %v1317_v7 = vsel %vm1316_vm3, %v2345_v24, %v4867_v34  ;;  %v1360_v54 = vsel %vm1349_vm4, %v1327_v30, %v4868_v27  ;;  %v1348_v60 = vsel %vm1316_vm3, %v2346_v17, %v4870_v47  ;;  %v4880_v47 = vld [vmem:[#allocation52_spill] sm:$0xff] }
 0x24f   : > { %1256 = vrot.lane.b32.xlu2 %v4858_v55, %s2421_s24  ;;  %v4869_v55 = vld [vmem:[#allocation79_spill] sm:$0xff]  ;;  %v1393_v61 = vsel %vm1382_vm5, %v1360_v54, %v4871_v4  ;;  %v1381_v53 = vsel %vm1349_vm4, %v1348_v60, %v4874_v9  ;;  %v4881_v60 = vld [vmem:[#allocation81_spill] sm:$0xff] }
 0x250   : > { %1176 = vrot.lane.b32.xlu1 %v4862_v12, %s2422_s25  ;;  %1160 = vrot.lane.b32.xlu0 %v4863_v63, %s2422_s25  ;;  %v1350_v45 = vsel %vm1349_vm4, %v1317_v7, %v4869_v55  ;;  %v4872_v12 = vld [vmem:[#allocation10_spill] sm:$0xff]  ;;  %v4873_v63 = vld [vmem:[#allocation115_spill] sm:$0xff] }
 0x251   : > { %v1043_v13 = vpop.permute.xlu2 %1042  ;;  %v1383_v16 = vsel %vm1382_vm5, %v1350_v45, %v4873_v63  ;;  %v4879_v55 = vld [vmem:[#allocation46_spill] sm:$0xff]  ;;  %v4883_v63 = vld [vmem:[#allocation35_spill] sm:$0xff] }
 0x252   : > { %v991_v50 = vpop.permute.xlu1 %990  ;;  %v3917_v36 = vsel %vm1481_vm8, %v1456_v44, %v1043_v13  ;;  %v989_v39 = vpop.permute.xlu0 %988  ;;  %v1426_v44 = vsel %vm1415_vm6, %v1393_v61, %v4875_v28  ;;  %v4876_v13 = vld [vmem:[#allocation6_spill] sm:$0xff] }
 0x253   : > { %v3920_v1 = vsel %vm1448_vm7, %v1445_v20, %v991_v50  ;;  %v3923_v23 = vsel %vm1448_vm7, %v1444_v43, %v989_v39  ;;  %v4877_v20 = vld [vmem:[#allocation133_spill] sm:$0xff]  ;;  %v4878_v50 = vld [vmem:[#allocation140_spill] sm:$0xff]  ;;  %v1459_v42 = vsel %vm1448_vm7, %v1426_v44, %v3656_v46  ;;  %v2347_v46 = vld [vmem:[%s2496_s4 + $0x18] sm:$0xff] }
 0x254   : > { %v1414_v43 = vsel %vm1382_vm5, %v1381_v53, %v4877_v20  ;;  %v1416_v39 = vsel %vm1415_vm6, %v1383_v16, %v4878_v50  ;;  %v1319_v45 = vsel %vm1316_vm3, %v2347_v46, %v4879_v55  ;;  %v4882_v61 = vld [vmem:[#allocation90_spill] sm:$0xff]  ;;  %v4885_v53 = vld [vmem:[#allocation119_spill] sm:$0xff]  ;;  %v4886_v44 = vld [vmem:[#allocation33_spill] sm:$0xff] }
 0x255   : > { %v1449_v30 = vsel %vm1448_vm7, %v1416_v39, %v3543_v33  ;;  %v1447_v24 = vsel %vm1415_vm6, %v1414_v43, %v3579_v40  ;;  %v2348_v33 = vld [vmem:[%s2496_s4 + $0x20] sm:$0xff]  ;;  %v4884_v16 = vld [vmem:[#allocation118_spill] sm:$0xff]  ;;  %v2350_v55 = vld [vmem:[%s2496_s4 + $0x48] sm:$0xff] }
 0x256   : > { %v1320_v40 = vsel %vm1316_vm3, %v2348_v33, %v4880_v47  ;;  %v4887_v20 = vld [vmem:[#allocation142_spill] sm:$0xff]  ;;  %v4890_v47 = vld [vmem:[#allocation83_spill] sm:$0xff] }
 0x257   : > { %1144 = vrot.lane.b32.xlu2 %v4872_v12, %s2422_s25  ;;  %v1353_v4 = vsel %vm1349_vm4, %v1320_v40, %v4881_v60  ;;  %v1352_v12 = vsel %vm1349_vm4, %v1319_v45, %v4882_v61  ;;  %v4889_v45 = vld [vmem:[#allocation59_spill] sm:$0xff]  ;;  %v4891_v60 = vld [vmem:[#allocation92_spill] sm:$0xff] }
 0x258   : > { %1128 = vrot.lane.b32.xlu1 %v4876_v13, %s2422_s25  ;;  %1272 = vrot.lane.b32.xlu0 %v3106_v15, %s2421_s24  ;;  %v1386_v9 = vsel %vm1382_vm5, %v1353_v4, %v4884_v16  ;;  %v1385_v28 = vsel %vm1382_vm5, %v1352_v12, %v4885_v53  ;;  %v1323_v33 = vsel %vm1316_vm3, %v2350_v55, %v4889_v45  ;;  %v4892_v61 = vld [vmem:[#allocation31_spill] sm:$0xff]  ;;  %v4893_v12 = vld [vmem:[#allocation121_spill] sm:$0xff]  ;;  %v4894_v16 = vld [vmem:[#allocation122_spill] sm:$0xff] }
 0x259   : > { %v1049_v58 = vpop.permute.xlu2 %1048  ;;  %v1418_v13 = vsel %vm1415_vm6, %v1385_v28, %v4886_v44  ;;  %v1419_v43 = vsel %vm1415_vm6, %v1386_v9, %v4887_v20  ;;  %v1356_v40 = vsel %vm1349_vm4, %v1323_v33, %v4890_v47  ;;  %v4895_v53 = vld [vmem:[#allocation19_spill] sm:$0xff]  ;;  %v4896_v28 = vld [vmem:[#allocation49_spill] sm:$0xff]  ;;  %v1583_v44 = vld [vmem:[%s3987_s29 + $0x8] sm:$0xff] }
 0x25a   : > { %v1029_v34 = vpop.permute.xlu1 %1028  ;;  %v3963_v7 = vsel %vm1481_vm8, %v1459_v42, %v1049_v58  ;;  %v995_v15 = vpop.permute.xlu0 %994  ;;  %v1452_v39 = vsel %vm1448_vm7, %v1419_v43, %v3553_v2  ;;  %v1451_v42 = vsel %vm1448_vm7, %v1418_v13, %v3591_v51  ;;  %v1585_v2 = vld [vmem:[%s3987_s29 + $0x18] sm:$0xff]  ;;  %v1584_v51 = vld [vmem:[%s3987_s29 + $0x10] sm:$0xff]  ;;  %v4897_v13 = vld [vmem:[#allocation136_spill] sm:$0xff] }
 0x25b   : > { %v3966_v27 = vsel %vm1481_vm8, %v1449_v30, %v1029_v34  ;;  %v3969_v54 = vsel %vm1448_vm7, %v1447_v24, %v995_v15  ;;  %v1586_v30 = vld [vmem:[%s3987_s29 + $0x20] sm:$0xf]  ;;  %v4888_v15 = vld [vmem:[#allocation37_spill] sm:$0xff]  ;;  %v4898_v43 = vld [vmem:[#allocation144_spill] sm:$0xff] }
 0x25c   : > { %2246 = vmatpush.msk.msra.mxu1 %vm1716_vm9, %v1586_v30  ;;  %2247 = vmatpush.msk.msra.mxu2 %vm1716_vm9, %v1586_v30  ;;  %v2351_v45 = vld [vmem:[%s2496_s4 + $0x80] sm:$0xff]  ;;  %v4901_v33 = vld [vmem:[#allocation45_spill] sm:$0xff] }
 0x25d   : > { %2248 = vmatpush.msk.msra.mxu3 %vm1716_vm9, %v1586_v30  ;;  %2210 = vmatpush.msk.msra.mxu0 %vm1716_vm9, %v1586_v30  ;;  %v1328_v47 = vsel %vm1316_vm3, %v2351_v45, %v4901_v33 }
 0x25e   : > { %2249 = vmatpush.msra.mxu1 %v1585_v2  ;;  %2250 = vmatpush.msra.mxu2 %v1585_v2 }
 0x25f   : > { %1224 = vrot.lane.b32.xlu2 %v4883_v63, %s2421_s24  ;;  %2251 = vmatpush.msra.mxu3 %v1585_v2  ;;  %v1389_v63 = vsel %vm1382_vm5, %v1356_v40, %v4893_v12  ;;  %v2352_v40 = vld [vmem:[%s2496_s4 + $0x90] sm:$0xff] }
 0x260   : > { %1082 = vrot.lane.b32.xlu1 %v2346_v17, %s2420_s23  ;;  %1066 = vrot.lane.b32.xlu0 %v3790_v35, %s2420_s23 }
 0x261   : > { %v1055_v50 = vpop.permute.xlu2 %1054  ;;  %1732 = vmatpush.msra.mxu0 %v1585_v2  ;;  %2252 = vmatpush.msra.mxu1 %v1584_v51  ;;  %v1582_v2 = vld [vmem:[%s3987_s29] sm:$0xff] }
 0x262   : > { %v1035_v58 = vpop.permute.xlu1 %1034  ;;  %v4006_v17 = vsel %vm1481_vm8, %v3698_v57, %v1055_v50  ;;  %v1033_v35 = vpop.permute.xlu0 %1032  ;;  %v2349_v57 = vld [vmem:[%s2496_s4 + $0x38] sm:$0xff]  ;;  %v1422_v50 = vsel %vm1415_vm6, %v1389_v63, %v4898_v43  ;;  %2253 = vmatpush.msra.mxu2 %v1584_v51  ;;  %2254 = vmatpush.msra.mxu3 %v1584_v51 }
 0x263   : > { %v4010_v24 = vsel %vm1481_vm8, %v1452_v39, %v1035_v58  ;;  %v4013_v34 = vsel %vm1481_vm8, %v1451_v42, %v1033_v35  ;;  %v1322_v46 = vsel %vm1316_vm3, %v2349_v57, %v4888_v15  ;;  %2255 = vmatpush.msra.mxu1 %v1583_v44  ;;  %v1455_v42 = vsel %vm1448_vm7, %v1422_v50, %v3565_v25  ;;  %v4900_v25 = vld [vmem:[#allocation66_spill] sm:$0xff] }
 0x264   : > { %v1355_v4 = vsel %vm1349_vm4, %v1322_v46, %v4891_v60  ;;  %1733 = vmatpush.msra.mxu0 %v1584_v51  ;;  %2256 = vmatpush.msra.mxu2 %v1583_v44  ;;  %v4902_v60 = vld [vmem:[#allocation70_spill] sm:$0xff] }
 0x265   : > { %v1388_v9 = vsel %vm1382_vm5, %v1355_v4, %v4894_v16  ;;  %2258 = vmatpush.msra.mxu1 %v1582_v2  ;;  %2257 = vmatpush.msra.mxu3 %v1583_v44  ;;  %v1329_v4 = vsel %vm1316_vm3, %v2352_v40, %v4902_v60  ;;  %v4905_v16 = vld [vmem:[#allocation102_spill] sm:$0xff]  ;;  %v4912_v40 = vld [vmem:[#allocation48_spill] sm:$0xff] }
 0x266   : > { %v1421_v20 = vsel %vm1415_vm6, %v1388_v9, %v4897_v13  ;;  %1734 = vmatpush.msra.mxu0 %v1583_v44  ;;  %2259 = vmatpush.msra.mxu2 %v1582_v2  ;;  %v4906_v9 = vld [vmem:[#allocation126_spill] sm:$0xff]  ;;  %v2353_v13 = vld [vmem:[%s2496_s4 + $0x120] sm:$0xff]  ;;  %v4913_v60 = vld [vmem:[#allocation40_spill] sm:$0xff] }
 0x267   : > { %1178 = vrot.lane.b32.xlu2 %v4892_v61, %s2422_s25  ;;  %v1454_v58 = vsel %vm1448_vm7, %v1421_v20, %v3609_v41  ;;  %2260 = vmatpush.msra.mxu3 %v1582_v2  ;;  %v4899_v41 = vld [vmem:[#allocation5_spill] sm:$0xff]  ;;  %v4908_v20 = vld [vmem:[#allocation15_spill] sm:$0xff]  ;;  %v4909_v43 = vld [vmem:[#allocation42_spill] sm:$0xff] }
 0x268   : > { %1162 = vrot.lane.b32.xlu1 %v4895_v53, %s2422_s25  ;;  %1240 = vrot.lane.b32.xlu0 %v4896_v28, %s2421_s24  ;;  %v4903_v61 = vld [vmem:[#allocation89_spill] sm:$0xff]  ;;  %v4907_v28 = vld [vmem:[#allocation127_spill] sm:$0xff] }
 0x269   : > { %v4042_v39 = vpop.permute.xlu2 %1060  ;;  %1735 = vmatpush.msra.mxu0 %v1582_v2  ;;  %v1362_v12 = vsel %vm1349_vm4, %v1329_v4, %v4903_v61  ;;  %v2354_v61 = vld [vmem:[%s2496_s4 + $0x60] sm:$0xff] }
 0x26a   : > { %v1041_v35 = vpop.permute.xlu1 %1040  ;;  %v1039_v30 = vpop.permute.xlu0 %1038  ;;  %v1395_v53 = vsel %vm1382_vm5, %v1362_v12, %v4906_v9  ;;  %v4914_v12 = vld [vmem:[#allocation41_spill] sm:$0xff]  ;;  %v4915_v9 = vld [vmem:[#allocation94_spill] sm:$0xff] }
 0x26b   : > { %v4050_v57 = vsel %vm1481_vm8, %v1455_v42, %v1041_v35  ;;  %v4053_v15 = vsel %vm1481_vm8, %v1454_v58, %v1039_v30  ;;  %v4910_v42 = vld [vmem:[#allocation147_spill] sm:$0xff] }
 0x26c   : > { %v1428_v58 = vsel %vm1415_vm6, %v1395_v53, %v4910_v42  ;;  %v4920_v42 = vld [vmem:[#allocation132_spill] sm:$0xff] }
 0x26d   : > { %v1461_v30 = vsel %vm1448_vm7, %v1428_v58, %v3589_v49 }
 0x26f   : > { %1130 = vrot.lane.b32.xlu2 %v4899_v41, %s2422_s25 }
 0x270   : > { %1274 = vrot.lane.b32.xlu1 %v3128_v56, %s2421_s24  ;;  %1258 = vrot.lane.b32.xlu0 %v4900_v25, %s2421_s24  ;;  %v4904_v56 = vld [vmem:[#allocation96_spill] sm:$0xff] }
 0x271   : > { %v4061_v51 = vpop.permute.xlu2 %1076  ;;  %v1361_v63 = vsel %vm1349_vm4, %v1328_v47, %v4904_v56  ;;  %v4911_v47 = vld [vmem:[#allocation25_spill] sm:$0xff]  ;;  %v1325_v56 = vsel %vm1316_vm3, %v2354_v61, %v4914_v12  ;;  %v4924_v61 = vld [vmem:[#allocation39_spill] sm:$0xff] }
 0x272   : > { %v4063_v46 = vpop.permute.xlu1 %1046  ;;  %v1045_v55 = vpop.permute.xlu0 %1044  ;;  %v1394_v44 = vsel %vm1382_vm5, %v1361_v63, %v4907_v28  ;;  %v1358_v53 = vsel %vm1349_vm4, %v1325_v56, %v4915_v9  ;;  %v4916_v28 = vld [vmem:[#allocation124_spill] sm:$0xff]  ;;  %v4925_v12 = vld [vmem:[#allocation101_spill] sm:$0xff] }
 0x273   : > { %v1427_v50 = vsel %vm1415_vm6, %v1394_v44, %v4909_v43  ;;  %v1391_v44 = vsel %vm1382_vm5, %v1358_v53, %v4916_v28  ;;  %v2355_v53 = vld [vmem:[%s2496_s4 + $0x68] sm:$0xff] }
 0x274   : > { %v1460_v2 = vsel %vm1448_vm7, %v1427_v50, %v3651_v19  ;;  %v4919_v50 = vld [vmem:[#allocation65_spill] sm:$0xff]  ;;  %v4926_v28 = vld [vmem:[#allocation64_spill] sm:$0xff] }
 0x277   : > { %1084 = vrot.lane.b32.xlu2 %v4905_v16, %s2420_s23 }
 0x278   : > { %1068 = vrot.lane.b32.xlu1 %v2353_v13, %s2420_s23  ;;  %1146 = vrot.lane.b32.xlu0 %v4908_v20, %s2422_s25  ;;  %v4917_v13 = vld [vmem:[#allocation138_spill] sm:$0xff] }
 0x279   : > { %v1253_v35 = vpop.permute.xlu2 %1252  ;;  %v1424_v20 = vsel %vm1415_vm6, %v1391_v44, %v4917_v13  ;;  %v1326_v44 = vsel %vm1316_vm3, %v2355_v53, %v4926_v28  ;;  %v4936_v53 = vld [vmem:[#allocation38_spill] sm:$0xff] }
 0x27a   : > { %v1053_v41 = vpop.permute.xlu1 %1052  ;;  %v1051_v25 = vpop.permute.xlu0 %1050  ;;  %v1457_v43 = vsel %vm1448_vm7, %v1424_v20, %v3630_v0  ;;  %v4927_v20 = vld [vmem:[#allocation86_spill] sm:$0xff] }
 0x27b   : > { %v4094_v45 = vsel %vm1481_vm8, %v1461_v30, %v1053_v41  ;;  %v4097_v33 = vsel %vm1481_vm8, %v1460_v2, %v1051_v25  ;;  %v4922_v25 = vld [vmem:[#allocation4_spill] sm:$0xff] }
 0x27f   : > { %1164 = vrot.lane.b32.xlu2 %v4911_v47, %s2422_s25 }
 0x280   : > { %1242 = vrot.lane.b32.xlu1 %v4912_v40, %s2421_s24  ;;  %1226 = vrot.lane.b32.xlu0 %v4913_v60, %s2421_s24  ;;  %v1498_v40 = vsel %vm1481_vm8, %v3740_v21, %v4042_v39  ;;  %v1506_v21 = vsel %vm1481_vm8, %v3692_v37, %v4061_v51  ;;  %v4929_v37 = vld [vmem:[#allocation145_spill] sm:$0xff] }
 0x281   : > { %v1141_v49 = vpop.permute.xlu2 %1140 }
 0x282   : > { %v1059_v4 = vpop.permute.xlu1 %1058  ;;  %v1057_v19 = vpop.permute.xlu0 %1056 }
 0x283   : > { %v4110_v63 = vsel %vm1481_vm8, %v3612_v6, %v1059_v4  ;;  %v4114_v16 = vsel %vm1481_vm8, %v3695_v18, %v1057_v19  ;;  %v4918_v6 = vld [vmem:[#allocation149_spill] sm:$0xff]  ;;  %v1490_v18 = vsel %vm1481_vm8, %v1457_v43, %v1045_v55  ;;  %v4921_v55 = vld [vmem:[#allocation14_spill] sm:$0xff]  ;;  %v1359_v43 = vsel %vm1349_vm4, %v1326_v44, %v4927_v20 }
 0x284   : > { %v1523_v58 = vsel %vm1514_vm10, %v1490_v18, %v1141_v49 }
 0x287   : > { %1276 = vrot.lane.b32.xlu2 %v4918_v6, %s2421_s24  ;;  %v4928_v6 = vld [vmem:[#allocation123_spill] sm:$0xff] }
 0x288   : > { %1260 = vrot.lane.b32.xlu1 %v4919_v50, %s2421_s24  ;;  %1180 = vrot.lane.b32.xlu0 %v4920_v42, %s2422_s25  ;;  %v1392_v18 = vsel %vm1382_vm5, %v1359_v43, %v4928_v6  ;;  %v4930_v42 = vld [vmem:[#allocation73_spill] sm:$0xff] }
 0x289   : > { %v1237_v30 = vpop.permute.xlu2 %1236  ;;  %v1425_v51 = vsel %vm1415_vm6, %v1392_v18, %v4929_v37  ;;  %v4937_v18 = vld [vmem:[#allocation23_spill] sm:$0xff] }
 0x28a   : > { %v4132_v2 = vpop.permute.xlu1 %1064  ;;  %v1063_v41 = vpop.permute.xlu0 %1062  ;;  %v1556_v0 = vsel %vm1547_vm11, %v1523_v58, %v1237_v30  ;;  %v1458_v50 = vsel %vm1448_vm7, %v1425_v51, %v3577_v38  ;;  %v4931_v30 = vld [vmem:[#allocation131_spill] sm:$0xff] }
 0x28b   : > { %2219 = vmatmul.msk.f32.vlgmr.msra.gmra.mxu1 %vm1619_vm12, %v1556_v0  ;;  %v1491_v58 = vsel %vm1481_vm8, %v1458_v50, %v4063_v46  ;;  %v4932_v0 = vld [vmem:[#allocation24_spill] sm:$0xff] }
 0x28f   : > { %1070 = vrot.lane.b32.xlu2 %v3843_v8, %s2420_s23  ;;  %v4923_v8 = vld [vmem:[#allocation56_spill] sm:$0xff] }
 0x290   : > { %1148 = vrot.lane.b32.xlu1 %v4921_v55, %s2422_s25  ;;  %1132 = vrot.lane.b32.xlu0 %v4922_v25, %s2422_s25 }
 0x291   : > { %v1255_v47 = vpop.permute.xlu2 %1254 }
 0x292   : > { %v1173_v60 = vpop.permute.xlu1 %1172  ;;  %v1157_v49 = vpop.permute.xlu0 %1156 }
 0x293   : > { %v1531_v4 = vsel %vm1514_vm10, %v1498_v40, %v1157_v49  ;;  %v1539_v56 = vsel %vm1514_vm10, %v1506_v21, %v1173_v60 }
 0x294   : > { %v1564_v19 = vsel %vm1547_vm11, %v1531_v4, %v1253_v35  ;;  %v4933_v4 = vld [vmem:[#allocation13_spill] sm:$0xff] }
 0x295   : > { %2227 = vmatmul.msk.f32.vlgmr.msra.gmra.mxu2 %vm1619_vm12, %v1564_v19  ;;  %v4934_v19 = vld [vmem:[#allocation9_spill] sm:$0xff] }
 0x297   : > { %1244 = vrot.lane.b32.xlu2 %v4923_v8, %s2421_s24 }
 0x298   : > { %1228 = vrot.lane.b32.xlu1 %v4924_v61, %s2421_s24  ;;  %1086 = vrot.lane.b32.xlu0 %v4925_v12, %s2420_s23  ;;  %v1499_v61 = vsel %vm1481_vm8, %v3737_v52, %v1063_v41 }
 0x299   : > { %v1143_v39 = vpop.permute.xlu2 %1142 }
 0x29a   : > { %v1125_v9 = vpop.permute.xlu1 %1124  ;;  %v1269_v35 = vpop.permute.xlu0 %1268  ;;  %v1524_v55 = vsel %vm1514_vm10, %v1491_v58, %v1143_v39 }
 0x29b   : > { %v1572_v13 = vsel %vm1547_vm11, %v1539_v56, %v1269_v35  ;;  %v1515_v40 = vsel %vm1514_vm10, %v3966_v27, %v1125_v9  ;;  %v4935_v27 = vld [vmem:[#allocation150_spill] sm:$0xff]  ;;  %v310_v35 = vld [vmem:[%s2496_s4 + $0x1a0] sm:$0xff] }
 0x29c   : > { %2235 = vmatmul.msk.f32.vlgmr.msra.gmra.mxu3 %vm1619_vm12, %v1572_v13  ;;  %v309_v9 = vld [vmem:[%s2496_s4 + $0x198] sm:$0xff]  ;;  %v539_v52 = vrot.slane %v310_v35, 1  ;;  %v544_v51 = vrot.slane %v310_v35, 2 }
 0x29d   : > { %v538_v28 = vrot.slane %v309_v9, 1 }
 0x29f   : > { %1262 = vrot.lane.b32.xlu2 %v4930_v42, %s2421_s24  ;;  %v540_v6 = vsel %vm360_vm1, %v538_v28, %v539_v52 }
 0x2a0   : > { %1182 = vrot.lane.b32.xlu1 %v4931_v30, %s2422_s25  ;;  %1166 = vrot.lane.b32.xlu0 %v4932_v0, %s2422_s25 }
 0x2a1   : > { %v1239_v25 = vpop.permute.xlu2 %1238 }
 0x2a2   : > { %v1221_v60 = vpop.permute.xlu1 %1220  ;;  %v1079_v38 = vpop.permute.xlu0 %1078  ;;  %v1557_v49 = vsel %vm1547_vm11, %v1524_v55, %v1239_v25  ;;  %v4939_v55 = vld [vmem:[#allocation8_spill] sm:$0xff] }
 0x2a3   : > { %v1548_v46 = vsel %vm1547_vm11, %v1515_v40, %v1221_v60  ;;  %2220 = vmatmul.msk.f32.gmra.mxu1 %vm1619_vm12, %v1557_v49  ;;  %v1507_v41 = vsel %vm1481_vm8, %v3879_v32, %v1079_v38  ;;  %v543_v32 = vrot.slane %v309_v9, 2  ;;  %v4940_v25 = vld [vmem:[#allocation72_spill] sm:$0xff] }
 0x2a4   : > { %2211 = vmatmul.msk.f32.vlgmr.msra.gmra.mxu0 %vm1619_vm12, %v1548_v46 }
 0x2a5   : > { %v545_v0 = vsel %vm441_vm2, %v543_v32, %v544_v51 }
 0x2a7   : > { %1150 = vrot.lane.b32.xlu2 %v4933_v4, %s2422_s25  ;;  %v2356_v4 = vld [vmem:[%s2496_s4 + $0x140] sm:$0xff] }
 0x2a8   : > { %1134 = vrot.lane.b32.xlu1 %v4934_v19, %s2422_s25  ;;  %1278 = vrot.lane.b32.xlu0 %v4935_v27, %s2421_s24  ;;  %v4941_v19 = vld [vmem:[#allocation18_spill] sm:$0xff] }
 0x2a9   : > { %v1257_v8 = vpop.permute.xlu2 %1256 }
 0x2aa   : > { %v1175_v12 = vpop.permute.xlu1 %1174  ;;  %v1159_v21 = vpop.permute.xlu0 %1158 }
 0x2ab   : > { %v1532_v39 = vsel %vm1514_vm10, %v1499_v61, %v1159_v21 }
 0x2ac   : > { %v1565_v56 = vsel %vm1547_vm11, %v1532_v39, %v1255_v47  ;;  %v1540_v47 = vsel %vm1514_vm10, %v1507_v41, %v1175_v12 }
 0x2ad   : > { %2228 = vmatmul.msk.f32.gmra.mxu2 %vm1619_vm12, %v1565_v56  ;;  %v311_v56 = vld [vmem:[%s2496_s4 + $0x1a8] sm:$0x3] }
 0x2af   : > { %1230 = vrot.lane.b32.xlu2 %v4936_v53, %s2421_s24  ;;  %v546_v53 = vrot.slane %v311_v56, 2 }
 0x2b0   : > { %1088 = vrot.lane.b32.xlu1 %v309_v9, %s2420_s23  ;;  %1072 = vrot.lane.b32.xlu0 %v3837_v5, %s2420_s23  ;;  %v4938_v5 = vld [vmem:[#allocation55_spill] sm:$0xff]  ;;  %v4942_v9 = vld [vmem:[#allocation29_spill] sm:$0xff] }
 0x2b1   : > { %v1145_v44 = vpop.permute.xlu2 %1144 }
 0x2b2   : > { %v1127_v13 = vpop.permute.xlu1 %1126  ;;  %v1271_v20 = vpop.permute.xlu0 %1270 }
 0x2b3   : > { %v1573_v43 = vsel %vm1547_vm11, %v1540_v47, %v1271_v20  ;;  %v1516_v50 = vsel %vm1514_vm10, %v3823_v48, %v1127_v13  ;;  %v1500_v48 = vsel %vm1481_vm8, %v3633_v31, %v4132_v2  ;;  %v547_v13 = vsel %vm441_vm2, %v544_v51, %v546_v53  ;;  %v4946_v51 = vld [vmem:[#allocation43_spill] sm:$0xff] }
 0x2b4   : > { %2236 = vmatmul.msk.f32.gmra.mxu3 %vm1619_vm12, %v1573_v43  ;;  %v4945_v43 = vld [vmem:[#allocation71_spill] sm:$0xff] }
 0x2b7   : > { %1184 = vrot.lane.b32.xlu2 %v540_v6, %s2422_s25  ;;  %v1525_v6 = vsel %vm1514_vm10, %v3963_v7, %v1145_v44 }
 0x2b8   : > { %1168 = vrot.lane.b32.xlu1 %v4937_v18, %s2422_s25  ;;  %1246 = vrot.lane.b32.xlu0 %v4938_v5, %s2421_s24 }
 0x2b9   : > { %v1225_v37 = vpop.permute.xlu2 %1224 }
 0x2ba   : > { %v1223_v42 = vpop.permute.xlu1 %1222  ;;  %v1081_v58 = vpop.permute.xlu0 %1080 }
 0x2bb   : > { %v1549_v30 = vsel %vm1547_vm11, %v1516_v50, %v1223_v42  ;;  %v1508_v31 = vsel %vm1481_vm8, %v3876_v59, %v1081_v58  ;;  %v4943_v59 = vld [vmem:[#allocation54_spill] sm:$0xff]  ;;  %v4947_v50 = vld [vmem:[#allocation17_spill] sm:$0xff]  ;;  %v4948_v42 = vld [vmem:[#allocation7_spill] sm:$0xff] }
 0x2bc   : > { %2212 = vmatmul.msk.f32.gmra.mxu0 %vm1619_vm12, %v1549_v30 }
 0x2bf   : > { %1136 = vrot.lane.b32.xlu2 %v4939_v55, %s2422_s25 }
 0x2c0   : > { %1280 = vrot.lane.b32.xlu1 %v545_v0, %s2421_s24  ;;  %1264 = vrot.lane.b32.xlu0 %v4940_v25, %s2421_s24 }
 0x2c1   : > { %v1179_v40 = vpop.permute.xlu2 %1178 }
 0x2c2   : > { %v1177_v60 = vpop.permute.xlu1 %1176  ;;  %v1161_v38 = vpop.permute.xlu0 %1160 }
 0x2c3   : > { %v1533_v49 = vsel %vm1514_vm10, %v1500_v48, %v1161_v38  ;;  %v1541_v27 = vsel %vm1514_vm10, %v1508_v31, %v1177_v60  ;;  %v4949_v48 = vld [vmem:[#allocation61_spill] sm:$0xff] }
 0x2c4   : > { %v1566_v46 = vsel %vm1547_vm11, %v1533_v49, %v1257_v8 }
 0x2c5   : > { %2229 = vmatmul.msk.f32.gmra.mxu2 %vm1619_vm12, %v1566_v46 }
 0x2c7   : > { %1090 = vrot.lane.b32.xlu2 %v310_v35, %s2420_s23  ;;  %v4944_v35 = vld [vmem:[#allocation44_spill] sm:$0xff] }
 0x2c8   : > { %1074 = vrot.lane.b32.xlu1 %v2356_v4, %s2420_s23  ;;  %1152 = vrot.lane.b32.xlu0 %v4941_v19, %s2422_s25 }
 0x2c9   : > { %v1131_v2 = vpop.permute.xlu2 %1130 }
 0x2ca   : > { %v1129_v61 = vpop.permute.xlu1 %1128  ;;  %v1273_v12 = vpop.permute.xlu0 %1272  ;;  %v1518_v49 = vsel %vm1514_vm10, %v4010_v24, %v1131_v2 }
 0x2cb   : > { %v1517_v8 = vsel %vm1514_vm10, %v4013_v34, %v1129_v61  ;;  %v1574_v21 = vsel %vm1547_vm11, %v1541_v27, %v1273_v12  ;;  %v541_v34 = vrot.slane %v311_v56, 1 }
 0x2cc   : > { %2237 = vmatmul.msk.f32.gmra.mxu3 %vm1619_vm12, %v1574_v21  ;;  %v1550_v39 = vsel %vm1547_vm11, %v1517_v8, %v1225_v37 }
 0x2cd   : > { %2213 = vmatmul.msk.f32.gmra.mxu0 %vm1619_vm12, %v1550_v39  ;;  %v542_v20 = vsel %vm360_vm1, %v539_v52, %v541_v34 }
 0x2cf   : > { %1170 = vrot.lane.b32.xlu2 %v4942_v9, %s2422_s25 }
 0x2d0   : > { %1248 = vrot.lane.b32.xlu1 %v4943_v59, %s2421_s24  ;;  %1232 = vrot.lane.b32.xlu0 %v4944_v35, %s2421_s24  ;;  %v1595_v35 = vld [vmem:[#allocation2 + $0x40] sm:$0xff] }
 0x2d1   : > { %v1085_v47 = vpop.permute.xlu2 %1084 }
 0x2d2   : > { %v1083_v28 = vpop.permute.xlu1 %1082  ;;  %v1067_v41 = vpop.permute.xlu0 %1066  ;;  %v1510_v61 = vsel %vm1481_vm8, %v3923_v23, %v1085_v47 }
 0x2d3   : > { %v1509_v52 = vsel %vm1481_vm8, %v3734_v14, %v1083_v28  ;;  %v1501_v7 = vsel %vm1481_vm8, %v3782_v62, %v1067_v41 }
 0x2d4   : > { %v1542_v0 = vsel %vm1514_vm10, %v1509_v52, %v1179_v40 }
 0x2d7   : > { %1282 = vrot.lane.b32.xlu2 %v547_v13, %s2421_s24 }
 0x2d8   : > { %1266 = vrot.lane.b32.xlu1 %v4945_v43, %s2421_s24  ;;  %1186 = vrot.lane.b32.xlu0 %v542_v20, %s2422_s25 }
 0x2d9   : > { %v1165_v37 = vpop.permute.xlu2 %1164 }
 0x2da   : > { %v1163_v18 = vpop.permute.xlu1 %1162  ;;  %v1241_v5 = vpop.permute.xlu0 %1240 }
 0x2db   : > { %v1558_v32 = vsel %vm1547_vm11, %v1525_v6, %v1241_v5  ;;  %v1534_v44 = vsel %vm1514_vm10, %v1501_v7, %v1163_v18 }
 0x2dc   : > { %2221 = vmatmul.msk.f32.gmra.mxu1 %vm1619_vm12, %v1558_v32 }
 0x2df   : > { %1234 = vrot.lane.b32.xlu2 %v4946_v51, %s2421_s24 }
 0x2e0   : > { %1154 = vrot.lane.b32.xlu1 %v4947_v50, %s2422_s25  ;;  %1138 = vrot.lane.b32.xlu0 %v4948_v42, %s2422_s25 }
 0x2e1   : > { %v1277_v25 = vpop.permute.xlu2 %1276 }
 0x2e2   : > { %v1275_v58 = vpop.permute.xlu1 %1274  ;;  %v1259_v30 = vpop.permute.xlu0 %1258 }
 0x2e3   : > { %v1567_v14 = vsel %vm1547_vm11, %v1534_v44, %v1259_v30  ;;  %v1575_v55 = vsel %vm1547_vm11, %v1542_v0, %v1275_v58  ;;  %v1611_v30 = vld [vmem:[#allocation2 + $0xc0] sm:$0xff] }
 0x2e4   : > { %2230 = vmatmul.msk.f32.gmra.mxu2 %vm1619_vm12, %v1567_v14  ;;  %2238 = vmatmul.msk.f32.gmra.mxu3 %vm1619_vm12, %v1575_v55  ;;  %v1587_v14 = vld [vmem:[#allocation2] sm:$0xff] }
 0x2e8   : > { %1250 = vrot.lane.b32.xlu0 %v4949_v48, %s2421_s24 }
 0x2e9   : > { %v1071_v38 = vpop.permute.xlu2 %1070 }
 0x2ea   : > { %v1069_v60 = vpop.permute.xlu1 %1068  ;;  %v1147_v62 = vpop.permute.xlu0 %1146  ;;  %v1503_v20 = vsel %vm1481_vm8, %v3654_v3, %v1071_v38 }
 0x2eb   : > { %v1526_v40 = vsel %vm1514_vm10, %v4097_v33, %v1147_v62  ;;  %v1502_v27 = vsel %vm1481_vm8, %v3779_v11, %v1069_v60 }
 0x2ec   : > { %v1535_v33 = vsel %vm1514_vm10, %v1502_v27, %v1165_v37  ;;  %v1604_v27 = vld [vmem:[#allocation2 + $0x88] sm:$0xff] }
 0x2f1   : > { %v1245_v12 = vpop.permute.xlu2 %1244 }
 0x2f2   : > { %v1243_v46 = vpop.permute.xlu1 %1242  ;;  %v1227_v4 = vpop.permute.xlu0 %1226 }
 0x2f3   : > { %v1551_v19 = vsel %vm1547_vm11, %v1518_v49, %v1227_v4  ;;  %v1559_v31 = vsel %vm1547_vm11, %v1526_v40, %v1243_v46 }
 0x2f4   : > { %2214 = vmatmul.msk.f32.gmra.mxu0 %vm1619_vm12, %v1551_v19  ;;  %2222 = vmatmul.msk.f32.gmra.mxu1 %vm1619_vm12, %v1559_v31 }
 0x2f9   : > { %v1263_v59 = vpop.permute.xlu2 %1262 }
 0x2fa   : > { %v1261_v24 = vpop.permute.xlu1 %1260  ;;  %v1181_v2 = vpop.permute.xlu0 %1180 }
 0x2fb   : > { %v1543_v8 = vsel %vm1514_vm10, %v1510_v61, %v1181_v2  ;;  %v1568_v21 = vsel %vm1547_vm11, %v1535_v33, %v1261_v24 }
 0x2fc   : > { %2231 = vmatmul.msk.f32.gmra.mxu2 %vm1619_vm12, %v1568_v21  ;;  %v1576_v39 = vsel %vm1547_vm11, %v1543_v8, %v1277_v25 }
 0x2fd   : > { %2239 = vmatmul.msk.f32.gmra.mxu3 %vm1619_vm12, %v1576_v39 }
 0x302   : > { %v1149_v56 = vpop.permute.xlu1 %1148  ;;  %v1133_v11 = vpop.permute.xlu0 %1132 }
 0x303   : > { %v1527_v23 = vsel %vm1514_vm10, %v4094_v45, %v1149_v56  ;;  %v1519_v28 = vsel %vm1514_vm10, %v3873_v22, %v1133_v11  ;;  %v1151_v45 = vpop.permute.xlu2 %1150  ;;  %v1603_v22 = vld [vmem:[#allocation2 + $0x80] sm:$0xff] }
 0x304   : > { %v1560_v9 = vsel %vm1547_vm11, %v1527_v23, %v1245_v12  ;;  %v1528_v40 = vsel %vm1514_vm10, %v4006_v17, %v1151_v45 }
 0x305   : > { %2223 = vmatmul.msk.f32.gmra.mxu1 %vm1619_vm12, %v1560_v9 }
 0x308   : > { %v1761_v53 = vpop.f32.mrf.mxu1 }
 0x309   : > { %v1841_v34 = vadd.f32 %v1761_v53, %v1595_v35 }
 0x30a   : > { %v1229_v41 = vpop.permute.xlu1 %1228  ;;  %v1087_v47 = vpop.permute.xlu0 %1086 }
 0x30b   : > { %1873 = vst.msk [vmem:[#allocation2 + $0x40] sm:$0xff] %vm1349_vm4, %v1841_v34  ;;  %v1552_v13 = vsel %vm1547_vm11, %v1519_v28, %v1229_v41  ;;  %v1231_v37 = vpop.permute.xlu2 %1230  ;;  %v1511_v52 = vsel %vm1481_vm8, %v3920_v1, %v1087_v47  ;;  %v1596_v1 = vld [vmem:[#allocation2 + $0x48] sm:$0xff] }
 0x30c   : > { %2215 = vmatmul.msk.f32.gmra.mxu0 %vm1619_vm12, %v1552_v13 }
 0x312   : > { %v1183_v43 = vpop.permute.xlu1 %1182  ;;  %v1167_v6 = vpop.permute.xlu0 %1166 }
 0x313   : > { %v1536_v18 = vsel %vm1514_vm10, %v1503_v20, %v1167_v6  ;;  %v1544_v50 = vsel %vm1514_vm10, %v1511_v52, %v1183_v43  ;;  %v1185_v49 = vpop.permute.xlu2 %1184  ;;  %v1605_v6 = vld [vmem:[#allocation2 + $0x90] sm:$0xff] }
 0x314   : > { %v1569_v5 = vsel %vm1547_vm11, %v1536_v18, %v1263_v59 }
 0x315   : > { %2232 = vmatmul.msk.f32.gmra.mxu2 %vm1619_vm12, %v1569_v5 }
 0x318   : > { %v1785_v32 = vpop.f32.mrf.mxu2 }
 0x319   : > { %v1849_v51 = vadd.f32 %v1785_v32, %v1603_v22  ;;  %v1589_v22 = vld [vmem:[#allocation2 + $0x10] sm:$0xff] }
 0x31a   : > { %v1135_v42 = vpop.permute.xlu1 %1134  ;;  %v1279_v7 = vpop.permute.xlu0 %1278 }
 0x31b   : > { %1881 = vst.msk [vmem:[#allocation2 + $0x80] sm:$0xff] %vm1349_vm4, %v1849_v51  ;;  %v1520_v3 = vsel %vm1514_vm10, %v4053_v15, %v1135_v42  ;;  %v1577_v44 = vsel %vm1547_vm11, %v1544_v50, %v1279_v7  ;;  %v1137_v31 = vpop.permute.xlu2 %1136 }
 0x31c   : > { %2240 = vmatmul.msk.f32.gmra.mxu3 %vm1619_vm12, %v1577_v44  ;;  %v1553_v58 = vsel %vm1547_vm11, %v1520_v3, %v1231_v37  ;;  %v1521_v41 = vsel %vm1514_vm10, %v4050_v57, %v1137_v31  ;;  %v1613_v44 = vld [vmem:[#allocation2 + $0xd0] sm:$0xff]  ;;  %v1590_v31 = vld [vmem:[#allocation2 + $0x18] sm:$0xff] }
 0x31d   : > { %2216 = vmatmul.msk.f32.gmra.mxu0 %vm1619_vm12, %v1553_v58 }
 0x31f   : > { %v1809_v0 = vpop.f32.mrf.mxu3 }
 0x320   : > { %v1857_v55 = vadd.f32 %v1809_v0, %v1611_v30  ;;  %v1764_v25 = vpop.f32.mrf.mxu1 }
 0x321   : > { %v1737_v48 = vpop.f32.mrf.mxu0  ;;  %v1842_v60 = vadd.f32 %v1764_v25, %v1596_v1 }
 0x322   : > { %1889 = vst.msk [vmem:[#allocation2 + $0xc0] sm:$0xff] %vm1349_vm4, %v1857_v55  ;;  %v1833_v62 = vadd.f32 %v1737_v48, %v1587_v14  ;;  %v1089_v15 = vpop.permute.xlu1 %1088  ;;  %v1073_v38 = vpop.permute.xlu0 %1072  ;;  %v1597_v55 = vld [vmem:[#allocation2 + $0x50] sm:$0xff] }
 0x323   : > { %1874 = vst.msk [vmem:[#allocation2 + $0x48] sm:$0xff] %vm1349_vm4, %v1842_v60  ;;  %v1512_v61 = vsel %vm1481_vm8, %v3776_v10, %v1089_v15  ;;  %v1504_v2 = vsel %vm1481_vm8, %v3829_v29, %v1073_v38  ;;  %v1612_v10 = vld [vmem:[#allocation2 + $0xc8] sm:$0xff]  ;;  %v1091_v23 = vpop.permute.xlu2 %1090 }
 0x324   : > { %1865 = vst.msk [vmem:[#allocation2] sm:$0xff] %vm1349_vm4, %v1833_v62  ;;  %v1545_v21 = vsel %vm1514_vm10, %v1512_v61, %v1185_v49  ;;  %v1588_v29 = vld [vmem:[#allocation2 + $0x8] sm:$0xff]  ;;  %v1513_v51 = vsel %vm1481_vm8, %v3969_v54, %v1091_v23  ;;  %v1606_v49 = vld [vmem:[#allocation2 + $0x98] sm:$0xff] }
 0x32a   : > { %v1169_v46 = vpop.permute.xlu1 %1168  ;;  %v1247_v4 = vpop.permute.xlu0 %1246 }
 0x32b   : > { %v1561_v19 = vsel %vm1547_vm11, %v1528_v40, %v1247_v4  ;;  %v1537_v12 = vsel %vm1514_vm10, %v1504_v2, %v1169_v46  ;;  %v1171_v28 = vpop.permute.xlu2 %1170 }
 0x32c   : > { %2224 = vmatmul.msk.f32.gmra.mxu1 %vm1619_vm12, %v1561_v19 }
 0x330   : > { %v1788_v24 = vpop.f32.mrf.mxu2 }
 0x331   : > { %v1850_v33 = vadd.f32 %v1788_v24, %v1604_v27  ;;  %v1598_v27 = vld [vmem:[#allocation2 + $0x58] sm:$0xff] }
 0x332   : > { %v1281_v8 = vpop.permute.xlu1 %1280  ;;  %v1265_v17 = vpop.permute.xlu0 %1264 }
 0x333   : > { %1882 = vst.msk [vmem:[#allocation2 + $0x88] sm:$0xff] %vm1349_vm4, %v1850_v33  ;;  %v1570_v39 = vsel %vm1547_vm11, %v1537_v12, %v1265_v17  ;;  %v1578_v56 = vsel %vm1547_vm11, %v1545_v21, %v1281_v8  ;;  %v1283_v57 = vpop.permute.xlu2 %1282  ;;  %v1607_v33 = vld [vmem:[#allocation2 + $0xa0] sm:$0xff] }
 0x334   : > { %2233 = vmatmul.msk.f32.gmra.mxu2 %vm1619_vm12, %v1570_v39  ;;  %2241 = vmatmul.msk.f32.gmra.mxu3 %vm1619_vm12, %v1578_v56  ;;  %v1615_v12 = vld [vmem:[#allocation2 + $0xe0] sm:$0xff] }
 0x335   : > { %v1599_v39 = vld [vmem:[#allocation2 + $0x60] sm:$0xff] }
 0x337   : > { %v1812_v11 = vpop.f32.mrf.mxu3 }
 0x338   : > { %v1858_v9 = vadd.f32 %v1812_v11, %v1612_v10 }
 0x339   : > { %v1740_v59 = vpop.f32.mrf.mxu0 }
 0x33a   : > { %1890 = vst.msk [vmem:[#allocation2 + $0xc8] sm:$0xff] %vm1349_vm4, %v1858_v9  ;;  %v1834_v35 = vadd.f32 %v1740_v59, %v1588_v29  ;;  %v1075_v53 = vpop.permute.xlu1 %1074  ;;  %v1153_v34 = vpop.permute.xlu0 %1152  ;;  %v1591_v29 = vld [vmem:[#allocation2 + $0x20] sm:$0xff]  ;;  %v1608_v59 = vld [vmem:[#allocation2 + $0xa8] sm:$0xff] }
 0x33b   : > { %v1529_v47 = vsel %vm1514_vm10, %v4114_v16, %v1153_v34  ;;  %v1505_v18 = vsel %vm1481_vm8, %v3826_v26, %v1075_v53  ;;  %v1235_v54 = vpop.permute.xlu2 %1234  ;;  %v1592_v53 = vld [vmem:[#allocation2 + $0x28] sm:$0xff] }
 0x33c   : > { %1866 = vst.msk [vmem:[#allocation2 + $0x8] sm:$0xff] %vm1349_vm4, %v1834_v35  ;;  %v1538_v16 = vsel %vm1514_vm10, %v1505_v18, %v1171_v28  ;;  %v1609_v18 = vld [vmem:[#allocation2 + $0xb0] sm:$0xff] }
 0x342   : > { %v1249_v13 = vpop.permute.xlu1 %1248  ;;  %v1233_v45 = vpop.permute.xlu0 %1232 }
 0x343   : > { %v1554_v20 = vsel %vm1547_vm11, %v1521_v41, %v1233_v45  ;;  %v1562_v43 = vsel %vm1547_vm11, %v1529_v47, %v1249_v13  ;;  %v1616_v47 = vld [vmem:[#allocation2 + $0xe8] sm:$0xff] }
 0x344   : > { %2217 = vmatmul.msk.f32.gmra.mxu0 %vm1619_vm12, %v1554_v20  ;;  %2225 = vmatmul.msk.f32.gmra.mxu1 %vm1619_vm12, %v1562_v43  ;;  %v1600_v20 = vld [vmem:[#allocation2 + $0x68] sm:$0xff] }
 0x348   : > { %v1791_v5 = vpop.f32.mrf.mxu2 }
 0x349   : > { %v1851_v32 = vadd.f32 %v1791_v5, %v1605_v6  ;;  %v1617_v5 = vld [vmem:[#allocation2 + $0xf0] sm:$0xff] }
 0x34a   : > { %v1267_v37 = vpop.permute.xlu1 %1266  ;;  %v1743_v52 = vpop.f32.mrf.mxu0 }
 0x34b   : > { %1883 = vst.msk [vmem:[#allocation2 + $0x90] sm:$0xff] %vm1349_vm4, %v1851_v32  ;;  %v1835_v50 = vadd.f32 %v1743_v52, %v1589_v22  ;;  %v1187_v42 = vpop.permute.xlu0 %1186  ;;  %v1571_v7 = vsel %vm1547_vm11, %v1538_v16, %v1267_v37  ;;  %v1593_v37 = vld [vmem:[#allocation2 + $0x30] sm:$0xff] }
 0x34c   : > { %v1546_v3 = vsel %vm1514_vm10, %v1513_v51, %v1187_v42  ;;  %2234 = vmatmul.msk.f32.gmra.mxu2 %vm1619_vm12, %v1571_v7  ;;  %v1601_v52 = vld [vmem:[#allocation2 + $0x70] sm:$0xff] }
 0x34d   : > { %1867 = vst.msk [vmem:[#allocation2 + $0x10] sm:$0xff] %vm1349_vm4, %v1835_v50  ;;  %v1579_v26 = vsel %vm1547_vm11, %v1546_v3, %v1283_v57  ;;  %v1610_v3 = vld [vmem:[#allocation2 + $0xb8] sm:$0xff] }
 0x34e   : > { %2242 = vmatmul.msk.f32.gmra.mxu3 %vm1619_vm12, %v1579_v26 }
 0x34f   : > { %v1815_v58 = vpop.f32.mrf.mxu3 }
 0x350   : > { %v1859_v30 = vadd.f32 %v1815_v58, %v1613_v44  ;;  %v1618_v44 = vld [vmem:[#allocation2 + $0xf8] sm:$0xff] }
 0x352   : > { %1891 = vst.msk [vmem:[#allocation2 + $0xd0] sm:$0xff] %vm1349_vm4, %v1859_v30  ;;  %v1155_v25 = vpop.permute.xlu1 %1154 }
 0x353   : > { %v1139_v1 = vpop.permute.xlu0 %1138  ;;  %v1530_v62 = vsel %vm1514_vm10, %v4110_v63, %v1155_v25 }
 0x354   : > { %v1522_v0 = vsel %vm1514_vm10, %v3917_v36, %v1139_v1  ;;  %v1614_v36 = vld [vmem:[#allocation2 + $0xd8] sm:$0xff] }
 0x355   : > { %v1555_v14 = vsel %vm1547_vm11, %v1522_v0, %v1235_v54  ;;  %v1594_v54 = vld [vmem:[#allocation2 + $0x38] sm:$0xff] }
 0x356   : > { %2218 = vmatmul.msk.f32.gmra.mxu0 %vm1619_vm12, %v1555_v14 }
 0x359   : > { %v1767_v48 = vpop.f32.mrf.mxu1 }
 0x35a   : > { %v1843_v60 = vadd.f32 %v1767_v48, %v1597_v55  ;;  %v1602_v55 = vld [vmem:[#allocation2 + $0x78] sm:$0xff] }
 0x35b   : > { %v1251_v15 = vpop.permute.xlu0 %1250 }
 0x35c   : > { %1875 = vst.msk [vmem:[#allocation2 + $0x50] sm:$0xff] %vm1349_vm4, %v1843_v60  ;;  %v1563_v38 = vsel %vm1547_vm11, %v1530_v62, %v1251_v15 }
 0x35d   : > { %2226 = vmatmul.msk.f32.gmra.mxu1 %vm1619_vm12, %v1563_v38 }
 0x367   : > { %v1794_v40 = vpop.f32.mrf.mxu2  ;;  %v1818_v46 = vpop.f32.mrf.mxu3 }
 0x368   : > { %v1852_v4 = vadd.f32 %v1794_v40, %v1606_v49  ;;  %v1860_v19 = vadd.f32 %v1818_v46, %v1614_v36 }
 0x36a   : > { %1884 = vst.msk [vmem:[#allocation2 + $0x98] sm:$0xff] %vm1349_vm4, %v1852_v4 }
 0x36b   : > { %1892 = vst.msk [vmem:[#allocation2 + $0xd8] sm:$0xff] %vm1349_vm4, %v1860_v19 }
 0x371   : > { %v1746_v63 = vpop.f32.mrf.mxu0  ;;  %v1770_v61 = vpop.f32.mrf.mxu1 }
 0x372   : > { %v1836_v24 = vadd.f32 %v1746_v63, %v1590_v31  ;;  %v1844_v2 = vadd.f32 %v1770_v61, %v1598_v27 }
 0x374   : > { %1868 = vst.msk [vmem:[#allocation2 + $0x18] sm:$0xff] %vm1349_vm4, %v1836_v24 }
 0x375   : > { %1876 = vst.msk [vmem:[#allocation2 + $0x58] sm:$0xff] %vm1349_vm4, %v1844_v2 }
 0x37f   : > { %v1797_v8 = vpop.f32.mrf.mxu2 }
 0x380   : > { %v1853_v17 = vadd.f32 %v1797_v8, %v1607_v33  ;;  %v1821_v21 = vpop.f32.mrf.mxu3 }
 0x381   : > { %v1861_v56 = vadd.f32 %v1821_v21, %v1615_v12 }
 0x382   : > { %1885 = vst.msk [vmem:[#allocation2 + $0xa0] sm:$0xff] %vm1349_vm4, %v1853_v17  ;;  %v1773_v10 = vpop.f32.mrf.mxu1 }
 0x383   : > { %1893 = vst.msk [vmem:[#allocation2 + $0xe0] sm:$0xff] %vm1349_vm4, %v1861_v56  ;;  %v1845_v11 = vadd.f32 %v1773_v10, %v1599_v39 }
 0x385   : > { %1877 = vst.msk [vmem:[#allocation2 + $0x60] sm:$0xff] %vm1349_vm4, %v1845_v11 }
 0x389   : > { %v1749_v23 = vpop.f32.mrf.mxu0 }
 0x38a   : > { %v1837_v9 = vadd.f32 %v1749_v23, %v1591_v29 }
 0x38c   : > { %1869 = vst.msk [vmem:[#allocation2 + $0x20] sm:$0xff] %vm1349_vm4, %v1837_v9 }
 0x398   : > { %v1800_v35 = vpop.f32.mrf.mxu2 }
 0x399   : > { %v1854_v34 = vadd.f32 %v1800_v35, %v1608_v59 }
 0x39a   : > { %v1752_v28 = vpop.f32.mrf.mxu0 }
 0x39b   : > { %1886 = vst.msk [vmem:[#allocation2 + $0xa8] sm:$0xff] %vm1349_vm4, %v1854_v34  ;;  %v1838_v41 = vadd.f32 %v1752_v28, %v1592_v53 }
 0x39d   : > { %1870 = vst.msk [vmem:[#allocation2 + $0x28] sm:$0xff] %vm1349_vm4, %v1838_v41 }
 0x39f   : > { %v1824_v13 = vpop.f32.mrf.mxu3 }
 0x3a0   : > { %v1862_v45 = vadd.f32 %v1824_v13, %v1616_v47 }
 0x3a2   : > { %1894 = vst.msk [vmem:[#allocation2 + $0xe8] sm:$0xff] %vm1349_vm4, %v1862_v45 }
 0x3a9   : > { %v1776_v43 = vpop.f32.mrf.mxu1 }
 0x3aa   : > { %v1846_v6 = vadd.f32 %v1776_v43, %v1600_v20 }
 0x3ac   : > { %1878 = vst.msk [vmem:[#allocation2 + $0x68] sm:$0xff] %vm1349_vm4, %v1846_v6 }
 0x3b7   : > { %v1803_v22 = vpop.f32.mrf.mxu2  ;;  %v1827_v57 = vpop.f32.mrf.mxu3 }
 0x3b8   : > { %v1855_v32 = vadd.f32 %v1803_v22, %v1609_v18  ;;  %v1863_v16 = vadd.f32 %v1827_v57, %v1617_v5 }
 0x3ba   : > { %1887 = vst.msk [vmem:[#allocation2 + $0xb0] sm:$0xff] %vm1349_vm4, %v1855_v32 }
 0x3bb   : > { %1895 = vst.msk [vmem:[#allocation2 + $0xf0] sm:$0xff] %vm1349_vm4, %v1863_v16 }
 0x3c1   : > { %v1755_v51 = vpop.f32.mrf.mxu0  ;;  %v1779_v50 = vpop.f32.mrf.mxu1 }
 0x3c2   : > { %v1839_v42 = vadd.f32 %v1755_v51, %v1593_v37  ;;  %v1847_v7 = vadd.f32 %v1779_v50, %v1601_v52 }
 0x3c4   : > { %1871 = vst.msk [vmem:[#allocation2 + $0x30] sm:$0xff] %vm1349_vm4, %v1839_v42 }
 0x3c5   : > { %1879 = vst.msk [vmem:[#allocation2 + $0x70] sm:$0xff] %vm1349_vm4, %v1847_v7 }
 0x3cf   : > { %v1806_v26 = vpop.f32.mrf.mxu2 }
 0x3d0   : > { %v1856_v58 = vadd.f32 %v1806_v26, %v1610_v3 }
 0x3d1   : > { %v1830_v30 = vpop.f32.mrf.mxu3 }
 0x3d2   : > { %1888 = vst.msk [vmem:[#allocation2 + $0xb8] sm:$0xff] %vm1349_vm4, %v1856_v58  ;;  %v1864_v1 = vadd.f32 %v1830_v30, %v1618_v44 }
 0x3d3   : > { %v1758_v0 = vpop.f32.mrf.mxu0 }
 0x3d4   : > { %1896 = vst.msk [vmem:[#allocation2 + $0xf8] sm:$0xff] %vm1349_vm4, %v1864_v1  ;;  %v1840_v14 = vadd.f32 %v1758_v0, %v1594_v54 }
 0x3d6   : > { %1872 = vst.msk [vmem:[#allocation2 + $0x38] sm:$0xff] %vm1349_vm4, %v1840_v14 }
 0x3d9   : > { %1900 = sbr.rel (%p2243_p10) target bundleno = 1029 (0x405), region = 40 }
 0x3da   : > { %v1782_v25 = vpop.f32.mrf.mxu1 }
 0x3db   : > { %v1848_v48 = vadd.f32 %v1782_v25, %v1602_v55 }
 0x3dd   : > { %1880 = vst.msk [vmem:[#allocation2 + $0x78] sm:$0xff] %vm1349_vm4, %v1848_v48 }
 0x3de   : > { %v1901_v60 = vld [vmem:[#allocation2] sm:$0xff]  ;;  %v1902_v15 = vld [vmem:[#allocation2 + $0x8] sm:$0xff]  ;;  %v1903_v38 = vld [vmem:[#allocation2 + $0x10] sm:$0xff] }
 0x3df   : > { %v4396_v62 = vld [vmem:[%s4517_s2] ss:$0 sm:$0xff]  ;;  %v1904_v49 = vld [vmem:[#allocation2 + $0x18] sm:$0xff]  ;;  %v1906_v31 = vld [vmem:[#allocation2 + $0x28] sm:$0xff] }
 0x3e0   : > { %v1937_v36 = vadd.f32 %v4396_v62, %v1901_v60  ;;  %v1938_v40 = vadd.f32 %v4396_v62, %v1902_v15  ;;  %v1939_v46 = vadd.f32 %v4396_v62, %v1903_v38  ;;  %v1940_v4 = vadd.f32 %v4396_v62, %v1904_v49  ;;  %v1905_v19 = vld [vmem:[#allocation2 + $0x20] sm:$0xff]  ;;  %v1907_v27 = vld [vmem:[#allocation2 + $0x30] sm:$0xff]  ;;  %v1908_v2 = vld [vmem:[#allocation2 + $0x38] sm:$0xff] }
 0x3e1   : > { %v1941_v63 = vadd.f32 %v4396_v62, %v1905_v19  ;;  %v1942_v61 = vadd.f32 %v4396_v62, %v1906_v31  ;;  %v1943_v24 = vadd.f32 %v4396_v62, %v1907_v27  ;;  %v1909_v10 = vld [vmem:[#allocation2 + $0x40] sm:$0xff]  ;;  %v1910_v11 = vld [vmem:[#allocation2 + $0x48] sm:$0xff]  ;;  %v1911_v29 = vld [vmem:[#allocation2 + $0x50] sm:$0xff]  ;;  %v1944_v28 = vadd.f32 %v4396_v62, %v1908_v2 }
 0x3e2   : > { %vm1969_vm13 = vcmp.ge.f32.partialorder %v1937_v36, 0.0  ;;  %v2001_v33 = vmul.f32 0.1, %v1937_v36  ;;  %vm1970_vm14 = vcmp.ge.f32.partialorder %v1938_v40, 0.0  ;;  %v2002_v12 = vmul.f32 0.1, %v1938_v40 }
 0x3e3   : > { %vm1971_vm15 = vcmp.ge.f32.partialorder %v1939_v46, 0.0  ;;  %v2003_v8 = vmul.f32 0.1, %v1939_v46  ;;  %vm1972_vm0 = vcmp.ge.f32.partialorder %v1940_v4, 0.0  ;;  %v2004_v17 = vmul.f32 0.1, %v1940_v4 }
 0x3e4   : > { %v2033_v21 = vsel %vm1969_vm13, %v1937_v36, %v2001_v33  ;;  %v2034_v39 = vsel %vm1970_vm14, %v1938_v40, %v2002_v12  ;;  %vm1973_vm1 = vcmp.ge.f32.partialorder %v1941_v63, 0.0  ;;  %v2005_v56 = vmul.f32 0.1, %v1941_v63  ;;  %v1912_v35 = vld [vmem:[#allocation2 + $0x58] sm:$0xff]  ;;  %v1913_v20 = vld [vmem:[#allocation2 + $0x60] sm:$0xff]  ;;  %v1914_v43 = vld [vmem:[#allocation2 + $0x68] sm:$0xff] }
 0x3e5   : > { %2065 = vst.msk [vmem:[%s2501_s9] sm:$0xff] %vm1349_vm4, %v2033_v21  ;;  %v2035_v23 = vsel %vm1971_vm15, %v1939_v46, %v2003_v8  ;;  %v2036_v9 = vsel %vm1972_vm0, %v1940_v4, %v2004_v17  ;;  %vm1974_vm2 = vcmp.ge.f32.partialorder %v1942_v61, 0.0  ;;  %v2006_v59 = vmul.f32 0.1, %v1942_v61  ;;  %v1915_v22 = vld [vmem:[#allocation2 + $0x70] sm:$0xff]  ;;  %v1916_v57 = vld [vmem:[#allocation2 + $0x78] sm:$0xff] }
 0x3e6   : > { %2066 = vst.msk [vmem:[%s2501_s9 + $0x8] sm:$0xff] %vm1349_vm4, %v2034_v39  ;;  %v2037_v53 = vsel %vm1973_vm1, %v1941_v63, %v2005_v56  ;;  %vm1975_vm3 = vcmp.ge.f32.partialorder %v1943_v24, 0.0  ;;  %v2007_v34 = vmul.f32 0.1, %v1943_v24  ;;  %v1945_v47 = vadd.f32 %v4396_v62, %v1909_v10  ;;  %v1917_v3 = vld [vmem:[#allocation2 + $0x80] sm:$0xff]  ;;  %v1918_v54 = vld [vmem:[#allocation2 + $0x88] sm:$0xff] }
 0x3e7   : > { %2067 = vst.msk [vmem:[%s2501_s9 + $0x10] sm:$0xff] %vm1349_vm4, %v2035_v23  ;;  %v2038_v41 = vsel %vm1974_vm2, %v1942_v61, %v2006_v59  ;;  %v1946_v13 = vadd.f32 %v4396_v62, %v1910_v11  ;;  %v1947_v45 = vadd.f32 %v4396_v62, %v1911_v29  ;;  %vm1976_vm5 = vcmp.ge.f32.partialorder %v1944_v28, 0.0  ;;  %v1919_v1 = vld [vmem:[#allocation2 + $0x90] sm:$0xff]  ;;  %v1920_v55 = vld [vmem:[#allocation2 + $0x98] sm:$0xff]  ;;  %v1921_v36 = vld [vmem:[#allocation2 + $0xa0] sm:$0xff] }
 0x3e8   : > { %2068 = vst.msk [vmem:[%s2501_s9 + $0x18] sm:$0xff] %vm1349_vm4, %v2036_v9  ;;  %v2039_v6 = vsel %vm1975_vm3, %v1943_v24, %v2007_v34  ;;  %v2008_v18 = vmul.f32 0.1, %v1944_v28  ;;  %v1948_v5 = vadd.f32 %v4396_v62, %v1912_v35  ;;  %vm1977_vm6 = vcmp.ge.f32.partialorder %v1945_v47, 0.0  ;;  %v1922_v40 = vld [vmem:[#allocation2 + $0xa8] sm:$0xff]  ;;  %v1923_v31 = vld [vmem:[#allocation2 + $0xb0] sm:$0xff] }
 0x3e9   : > { %2069 = vst.msk [vmem:[%s2501_s9 + $0x20] sm:$0xff] %vm1349_vm4, %v2037_v53  ;;  %v2009_v32 = vmul.f32 0.1, %v1945_v47  ;;  %vm1978_vm7 = vcmp.ge.f32.partialorder %v1946_v13, 0.0  ;;  %vm1979_vm8 = vcmp.ge.f32.partialorder %v1947_v45, 0.0  ;;  %v1949_v42 = vadd.f32 %v4396_v62, %v1913_v20  ;;  %v1924_v8 = vld [vmem:[#allocation2 + $0xb8] sm:$0xff] }
 0x3ea   : > { %2070 = vst.msk [vmem:[%s2501_s9 + $0x28] sm:$0xff] %vm1349_vm4, %v2038_v41  ;;  %v2040_v16 = vsel %vm1976_vm5, %v1944_v28, %v2008_v18  ;;  %v2010_v37 = vmul.f32 0.1, %v1946_v13  ;;  %v2011_v52 = vmul.f32 0.1, %v1947_v45  ;;  %vm1980_vm9 = vcmp.ge.f32.partialorder %v1948_v5, 0.0 }
 0x3eb   : > { %2071 = vst.msk [vmem:[%s2501_s9 + $0x30] sm:$0xff] %vm1349_vm4, %v2039_v6  ;;  %v2041_v51 = vsel %vm1977_vm6, %v1945_v47, %v2009_v32  ;;  %v2012_v50 = vmul.f32 0.1, %v1948_v5  ;;  %v1950_v7 = vadd.f32 %v4396_v62, %v1914_v43  ;;  %v1951_v58 = vadd.f32 %v4396_v62, %v1915_v22  ;;  %v1925_v17 = vld [vmem:[#allocation2 + $0xc0] sm:$0xff]  ;;  %v1926_v10 = vld [vmem:[#allocation2 + $0xc8] sm:$0xff]  ;;  %v1927_v11 = vld [vmem:[#allocation2 + $0xd0] sm:$0xff] }
 0x3ec   : > { %2072 = vst.msk [vmem:[%s2501_s9 + $0x38] sm:$0xff] %vm1349_vm4, %v2040_v16  ;;  %v2042_v26 = vsel %vm1978_vm7, %v1946_v13, %v2010_v37  ;;  %v2043_v44 = vsel %vm1979_vm8, %v1947_v45, %v2011_v52  ;;  %v1952_v30 = vadd.f32 %v4396_v62, %v1916_v57  ;;  %vm1981_vm10 = vcmp.ge.f32.partialorder %v1949_v42, 0.0  ;;  %v1928_v41 = vld [vmem:[#allocation2 + $0xd8] sm:$0xff]  ;;  %v1929_v43 = vld [vmem:[#allocation2 + $0xe0] sm:$0xff] }
 0x3ed   : > { %2073 = vst.msk [vmem:[%s2501_s9 + $0x40] sm:$0xff] %vm1349_vm4, %v2041_v51  ;;  %v2044_v0 = vsel %vm1980_vm9, %v1948_v5, %v2012_v50  ;;  %v2013_v14 = vmul.f32 0.1, %v1949_v42  ;;  %vm1982_vm11 = vcmp.ge.f32.partialorder %v1950_v7, 0.0  ;;  %v2014_v25 = vmul.f32 0.1, %v1950_v7 }
 0x3ee   : > { %2074 = vst.msk [vmem:[%s2501_s9 + $0x48] sm:$0xff] %vm1349_vm4, %v2042_v26  ;;  %vm1983_vm12 = vcmp.ge.f32.partialorder %v1951_v58, 0.0  ;;  %v2015_v48 = vmul.f32 0.1, %v1951_v58  ;;  %v1953_v60 = vadd.f32 %v4396_v62, %v1917_v3  ;;  %vm1984_vm13 = vcmp.ge.f32.partialorder %v1952_v30, 0.0  ;;  %v1930_v5 = vld [vmem:[#allocation2 + $0xe8] sm:$0xff] }
 0x3ef   : > { %2075 = vst.msk [vmem:[%s2501_s9 + $0x50] sm:$0xff] %vm1349_vm4, %v2043_v44  ;;  %v2045_v15 = vsel %vm1981_vm10, %v1949_v42, %v2013_v14  ;;  %v2016_v38 = vmul.f32 0.1, %v1952_v30  ;;  %v1954_v49 = vadd.f32 %v4396_v62, %v1918_v54  ;;  %v2046_v46 = vsel %vm1982_vm11, %v1950_v7, %v2014_v25  ;;  %v1931_v51 = vld [vmem:[#allocation2 + $0xf0] sm:$0xff]  ;;  %v1932_v50 = vld [vmem:[#allocation2 + $0xf8] sm:$0xff] }
 0x3f0   : > { %2076 = vst.msk [vmem:[%s2501_s9 + $0x58] sm:$0xff] %vm1349_vm4, %v2044_v0  ;;  %v2047_v4 = vsel %vm1983_vm12, %v1951_v58, %v2015_v48  ;;  %vm1985_vm14 = vcmp.ge.f32.partialorder %v1953_v60, 0.0  ;;  %v2017_v19 = vmul.f32 0.1, %v1953_v60  ;;  %v1955_v61 = vadd.f32 %v4396_v62, %v1919_v1 }
 0x3f1   : > { %2077 = vst.msk [vmem:[%s2501_s9 + $0x60] sm:$0xff] %vm1349_vm4, %v2045_v15  ;;  %v2048_v27 = vsel %vm1984_vm13, %v1952_v30, %v2016_v38  ;;  %vm1986_vm15 = vcmp.ge.f32.partialorder %v1954_v49, 0.0  ;;  %v2018_v63 = vmul.f32 0.1, %v1954_v49  ;;  %v1956_v2 = vadd.f32 %v4396_v62, %v1920_v55 }
 0x3f2   : > { %2078 = vst.msk [vmem:[%s2501_s9 + $0x68] sm:$0xff] %vm1349_vm4, %v2046_v46  ;;  %v2049_v24 = vsel %vm1985_vm14, %v1953_v60, %v2017_v19  ;;  %v1957_v33 = vadd.f32 %v4396_v62, %v1921_v36  ;;  %v1958_v12 = vadd.f32 %v4396_v62, %v1922_v40  ;;  %vm1987_vm0 = vcmp.ge.f32.partialorder %v1955_v61, 0.0 }
 0x3f3   : > { %2079 = vst.msk [vmem:[%s2501_s9 + $0x70] sm:$0xff] %vm1349_vm4, %v2047_v4  ;;  %v2050_v21 = vsel %vm1986_vm15, %v1954_v49, %v2018_v63  ;;  %v2019_v39 = vmul.f32 0.1, %v1955_v61  ;;  %v1959_v56 = vadd.f32 %v4396_v62, %v1923_v31  ;;  %vm1988_vm1 = vcmp.ge.f32.partialorder %v1956_v2, 0.0 }
 0x3f4   : > { %2080 = vst.msk [vmem:[%s2501_s9 + $0x78] sm:$0xff] %vm1349_vm4, %v2048_v27  ;;  %v2020_v29 = vmul.f32 0.1, %v1956_v2  ;;  %vm1989_vm2 = vcmp.ge.f32.partialorder %v1957_v33, 0.0  ;;  %vm1990_vm3 = vcmp.ge.f32.partialorder %v1958_v12, 0.0  ;;  %v1960_v34 = vadd.f32 %v4396_v62, %v1924_v8 }
 0x3f5   : > { %2081 = vst.msk [vmem:[%s2501_s9 + $0x80] sm:$0xff] %vm1349_vm4, %v2049_v24  ;;  %v2051_v23 = vsel %vm1987_vm0, %v1955_v61, %v2019_v39  ;;  %v2021_v9 = vmul.f32 0.1, %v1957_v33  ;;  %v2022_v59 = vmul.f32 0.1, %v1958_v12  ;;  %vm1991_vm5 = vcmp.ge.f32.partialorder %v1959_v56, 0.0 }
 0x3f6   : > { %2082 = vst.msk [vmem:[%s2501_s9 + $0x88] sm:$0xff] %vm1349_vm4, %v2050_v21  ;;  %v2052_v35 = vsel %vm1988_vm1, %v1956_v2, %v2020_v29  ;;  %v2023_v53 = vmul.f32 0.1, %v1959_v56  ;;  %v1961_v28 = vadd.f32 %v4396_v62, %v1925_v17  ;;  %v1962_v45 = vadd.f32 %v4396_v62, %v1926_v10 }
 0x3f7   : > { %2083 = vst.msk [vmem:[%s2501_s9 + $0x90] sm:$0xff] %vm1349_vm4, %v2051_v23  ;;  %v2053_v47 = vsel %vm1989_vm2, %v1957_v33, %v2021_v9  ;;  %v2054_v13 = vsel %vm1990_vm3, %v1958_v12, %v2022_v59  ;;  %v1963_v20 = vadd.f32 %v4396_v62, %v1927_v11  ;;  %vm1992_vm6 = vcmp.ge.f32.partialorder %v1960_v34, 0.0 }
 0x3f8   : > { %2084 = vst.msk [vmem:[%s2501_s9 + $0x98] sm:$0xff] %vm1349_vm4, %v2052_v35  ;;  %v2055_v6 = vsel %vm1991_vm5, %v1959_v56, %v2023_v53  ;;  %v2024_v18 = vmul.f32 0.1, %v1960_v34  ;;  %vm1993_vm7 = vcmp.ge.f32.partialorder %v1961_v28, 0.0  ;;  %v2025_v22 = vmul.f32 0.1, %v1961_v28 }
 0x3f9   : > { %2085 = vst.msk [vmem:[%s2501_s9 + $0xa0] sm:$0xff] %vm1349_vm4, %v2053_v47  ;;  %vm1994_vm8 = vcmp.ge.f32.partialorder %v1962_v45, 0.0  ;;  %v2026_v57 = vmul.f32 0.1, %v1962_v45  ;;  %v1964_v32 = vadd.f32 %v4396_v62, %v1928_v41  ;;  %vm1995_vm9 = vcmp.ge.f32.partialorder %v1963_v20, 0.0 }
 0x3fa   : > { %2086 = vst.msk [vmem:[%s2501_s9 + $0xa8] sm:$0xff] %vm1349_vm4, %v2054_v13  ;;  %v2056_v16 = vsel %vm1992_vm6, %v1960_v34, %v2024_v18  ;;  %v2027_v37 = vmul.f32 0.1, %v1963_v20  ;;  %v1965_v52 = vadd.f32 %v4396_v62, %v1929_v43  ;;  %v2057_v42 = vsel %vm1993_vm7, %v1961_v28, %v2025_v22 }
 0x3fb   : > { %2087 = vst.msk [vmem:[%s2501_s9 + $0xb0] sm:$0xff] %vm1349_vm4, %v2055_v6  ;;  %v2058_v7 = vsel %vm1994_vm8, %v1962_v45, %v2026_v57  ;;  %vm1996_vm10 = vcmp.ge.f32.partialorder %v1964_v32, 0.0  ;;  %v2028_v3 = vmul.f32 0.1, %v1964_v32  ;;  %v1966_v58 = vadd.f32 %v4396_v62, %v1930_v5 }
 0x3fc   : > { %2088 = vst.msk [vmem:[%s2501_s9 + $0xb8] sm:$0xff] %vm1349_vm4, %v2056_v16  ;;  %v2059_v26 = vsel %vm1995_vm9, %v1963_v20, %v2027_v37  ;;  %vm1997_vm11 = vcmp.ge.f32.partialorder %v1965_v52, 0.0  ;;  %v2029_v44 = vmul.f32 0.1, %v1965_v52  ;;  %v1967_v54 = vadd.f32 %v4396_v62, %v1931_v51 }
 0x3fd   : > { %2089 = vst.msk [vmem:[%s2501_s9 + $0xc0] sm:$0xff] %vm1349_vm4, %v2057_v42  ;;  %v2060_v30 = vsel %vm1996_vm10, %v1964_v32, %v2028_v3  ;;  %v1968_v1 = vadd.f32 %v4396_v62, %v1932_v50  ;;  %vm1998_vm12 = vcmp.ge.f32.partialorder %v1966_v58, 0.0  ;;  %v2030_v14 = vmul.f32 0.1, %v1966_v58 }
 0x3fe   : > { %2090 = vst.msk [vmem:[%s2501_s9 + $0xc8] sm:$0xff] %vm1349_vm4, %v2058_v7  ;;  %v2061_v0 = vsel %vm1997_vm11, %v1965_v52, %v2029_v44  ;;  %vm1999_vm13 = vcmp.ge.f32.partialorder %v1967_v54, 0.0  ;;  %v2031_v55 = vmul.f32 0.1, %v1967_v54 }
 0x3ff   : > { %2091 = vst.msk [vmem:[%s2501_s9 + $0xd0] sm:$0xff] %vm1349_vm4, %v2059_v26  ;;  %vm2000_vm14 = vcmp.ge.f32.partialorder %v1968_v1, 0.0  ;;  %v2062_v25 = vsel %vm1998_vm12, %v1966_v58, %v2030_v14  ;;  %v2032_v48 = vmul.f32 0.1, %v1968_v1 }
 0x400   : > { %2092 = vst.msk [vmem:[%s2501_s9 + $0xd8] sm:$0xff] %vm1349_vm4, %v2060_v30  ;;  %v2063_v60 = vsel %vm1999_vm13, %v1967_v54, %v2031_v55 }
 0x401   : > { %2093 = vst.msk [vmem:[%s2501_s9 + $0xe0] sm:$0xff] %vm1349_vm4, %v2061_v0  ;;  %v2064_v62 = vsel %vm2000_vm14, %v1968_v1, %v2032_v48 }
 0x402   : > { %2094 = vst.msk [vmem:[%s2501_s9 + $0xe8] sm:$0xff] %vm1349_vm4, %v2062_v25 }
 0x403   : > { %2095 = vst.msk [vmem:[%s2501_s9 + $0xf0] sm:$0xff] %vm1349_vm4, %v2063_v60 }
 0x404   : > { %2096 = vst.msk [vmem:[%s2501_s9 + $0xf8] sm:$0xff] %vm1349_vm4, %v2064_v62 }
 0x405 PF: > { %s13_s18 = sadd.s32 1, %s2412_s18   ;;  %s4950_s12 = smov %s2400_s15 }
 0x406   : > { %p10_p11 = scmp.ge.s32.totalorder %s13_s18, 98   ;;  %s4951_s13 = smov %s2404_s16 }
 0x407   : > { %s4952_s14 = smov %s2408_s17  ;;  %s4953_s15 = smov %s4957_s19 }
 0x408   : > { %s4954_s16 = smov %s4961_s20  ;;  %s4955_s17 = smov %s4965_s21 }
 0x409   :  { %12 = sbr.rel (!%p10_p11) target bundleno = 4 (0x4), region = 71 }

</bundles_post_ra>
